<compile_context>
chip_gen: v7x
topology: tpu7x:2x2x1
jax: 0.10.0
libtpu: 0.0.40
codegen_flags: <defaults>
</compile_context>

<pallas_src>
import functools

import jax
import jax.numpy as jnp
from jax.experimental import pallas as pl
from jax.experimental.pallas import tpu as pltpu


def _tree_sum(xs):
    """Balanced (log-depth) sum of a list of equal-shape arrays."""
    xs = list(xs)
    while len(xs) > 1:
        nxt = [xs[i] + xs[i + 1] for i in range(0, len(xs) - 1, 2)]
        if len(xs) % 2:
            nxt.append(xs[-1])
        xs = nxt
    return xs[0]


def tn_layer_kernel(lens_ref, m0_ref, wih_ref, bih_ref, tabT_ref, tok_ref,
                    hid_ref, m_scr, *, rank, chunk, v_pad):
    """One grid step = `chunk` recurrent timesteps for one batch chunk.

    Layout (batch on the 128-lane axis):
      lens_ref : [1, Bc]      int32  sequence lengths
      m0_ref   : [R, Bc]      f32    initial recurrent state (init_m1)
      wih_ref  : [R, R]       f32    wih.weight, PyTorch (out, in) layout
      bih_ref  : [R, 1]       f32    wih.bias
      tabT_ref : [R*R, Vpad]  f32    fused (emb @ whh_w.T + whh_b).T table
      tok_ref  : [T, Bc]      int32  token ids for this chunk
      hid_ref  : [T, R, Bc]   f32    hidden states for this chunk
      m_scr    : [R, Bc]      f32    recurrent state carried across chunks
    """
    tc = pl.program_id(1)
    bc = m_scr.shape[-1]

    @pl.when(tc == 0)
    def _():
        m_scr[...] = m0_ref[...]                       # m = init_m1(batch)

    lens = lens_ref[...]                               # [1, Bc] int32
    wih = wih_ref[...]                                 # [R, R]
    tabT = tabT_ref[...]                               # [R2, Vpad]
    toks = tok_ref[...]                                # [T, Bc] int32
    m = m_scr[...]                                     # [R, Bc]
    base = tc * chunk

    # ---- hoisted, time-invariant values (JAX does not CSE broadcasts) -----
    wih_cols = [jnp.broadcast_to(wih[:, j:j + 1], (rank, bc))
                for j in range(rank)]                  # rank x [R, Bc]
    bih_b = jnp.broadcast_to(bih_ref[...], (rank, bc))  # [R, Bc]
    vidx = jax.lax.broadcasted_iota(jnp.int32, (v_pad, bc), 0)  # [Vpad, Bc]

    # Fully-unrolled inner time loop (chunk is a small static int).
    for t in range(chunk):
        # Materialise w2 for this timestep from the resident fused table via
        # a one-hot matmul on the otherwise-idle MXU:
        #   w2_t[j*R+k, b] = table[tok[t, b], j*R+k]
        tok_t = toks[t:t + 1, :]                                   # [1, Bc]
        onehot = (vidx == tok_t).astype(jnp.float32)               # [Vpad, Bc]
        w2_t = jnp.dot(tabT, onehot,
                       preferred_element_type=jnp.float32)         # [R2, Bc]

        # w1[i, b] = sum_j Wih[i, j] * m[j, b] + b_ih[i]
        # rank is tiny (8): tree-reduced VPU broadcast-FMAs, no MXU needed.
        w1 = _tree_sum([wih_cols[j] * m[j:j + 1, :] for j in range(rank)]
                       + [bih_b])                                  # [R, Bc]

        # hidden[k, b] = tanh(sum_j w1[j, b] * w2_t[j*R + k, b])
        # (matches einsum('bij,bjk->bik') with w2 = whh(unit).view(B, R, R));
        # the w2_t row slabs are 8-sublane aligned -> free vreg slices.
        h = jnp.tanh(_tree_sum(
            [w1[j:j + 1, :] * w2_t[j * rank:(j + 1) * rank, :]
             for j in range(rank)]))                               # [R, Bc]
        # TODO(synk): TN.h2o(hidden) is computed by the PyTorch module but its
        # result is discarded by TN_layer.forward, so it is skipped here.

        # hidden_next = hidden where (i < text_lens) else m   (single vselect)
        m = jnp.where(lens > (base + t), h, m)                     # [R, Bc]

        hid_ref[t] = m                                 # hiddens[base + t]

    m_scr[...] = m                                     # carry to next chunk


def _num_tensorcores():
    """2 on v7x (two TensorCores per chip), else 1 (v5e / v6e)."""
    try:
        kind = jax.devices()[0].device_kind.lower()
    except Exception:
        return 1
    return 2 if "v7" in kind else 1


def tn_layer_forward(x, text_lens, params, rank, *, chunk=32):
    B, S = x.shape
    R, R2 = rank, rank * rank
    vocab = params["emb"].shape[0]

    # ---- fused embedding -> whh table (one tiny matmul, done once) ---------
    # table[v, j*R+k] = (emb[v] @ whh_w.T + whh_b)[j*R+k]; transposed and
    # lane-padded so the in-kernel one-hot MXU gather has clean layout.
    table = (params["emb"].astype(jnp.float32) @ params["whh_w"].T
             + params["whh_b"])                                    # [V, R2]
    v_pad = ((vocab + 127) // 128) * 128
    tableT = jnp.zeros((R2, v_pad), jnp.float32).at[:, :vocab].set(table.T)

    # ---- time chunking ------------------------------------------------------
    chunk = max(1, min(chunk, S))
    if chunk < S:
        chunk = max(8, (chunk // 8) * 8)       # keep sublane-aligned blocks
    n_tc = pl.cdiv(S, chunk)
    s_pad = n_tc * chunk

    # ---- batch padding to 128 lanes (lane-dense loads/stores) ---------------
    b_pad = ((B + 127) // 128) * 128
    lens_p = jnp.zeros((1, b_pad), jnp.int32).at[0, :B].set(
        text_lens.astype(jnp.int32))
    m0_p = jnp.zeros((R, b_pad), jnp.float32).at[:, :B].set(params["m0"].T)
    tok_p = jnp.zeros((s_pad, b_pad), jnp.int32).at[:S, :B].set(
        x.astype(jnp.int32).T)
    wih = params["wih_w"].astype(jnp.float32)                      # [R, R]
    bih = params["wih_b"].astype(jnp.float32).reshape(R, 1)        # [R, 1]

    # ---- batch split across TensorCores: v7x only ---------------------------
    n_cores = _num_tensorcores()
    n_bc = n_cores if (n_cores > 1 and b_pad % (n_cores * 128) == 0) else 1
    bc_sz = b_pad // n_bc

    grid_spec = pltpu.PrefetchScalarGridSpec(
        num_scalar_prefetch=0,
        grid=(n_bc, n_tc),               # time MUST stay minor (scratch carry)
        in_specs=[
            pl.BlockSpec((1, bc_sz), lambda bc, tc: (0, bc)),      # text_lens
            pl.BlockSpec((R, bc_sz), lambda bc, tc: (0, bc)),      # m0
            pl.BlockSpec((R, R), lambda bc, tc: (0, 0)),           # Wih
            pl.BlockSpec((R, 1), lambda bc, tc: (0, 0)),           # b_ih
            pl.BlockSpec((R2, v_pad), lambda bc, tc: (0, 0)),      # fused table
            pl.BlockSpec((chunk, bc_sz), lambda bc, tc: (tc, bc)),  # token ids
        ],
        out_specs=pl.BlockSpec((chunk, R, bc_sz),
                               lambda bc, tc: (tc, 0, bc)),        # hiddens
        scratch_shapes=[pltpu.VMEM((R, bc_sz), jnp.float32)],      # recurrent m
    )

    # Explicit VMEM budget (double-buffered token + hidden blocks, resident
    # table, small params), capped well below the 64 MiB physical VMEM of v7x.
    blk_bytes = 4 * (2 * chunk * bc_sz          # tokens (double-buffered)
                     + 2 * chunk * R * bc_sz    # hiddens (double-buffered)
                     + R2 * v_pad               # resident fused table
                     + 8 * R * bc_sz)           # m0 / lens / scratch / slack
    vmem_limit = int(min(48 * 2 ** 20, max(4 * 2 ** 20, 2 * blk_bytes)))

    hid = pl.pallas_call(
        functools.partial(tn_layer_kernel, rank=rank, chunk=chunk, v_pad=v_pad),
        out_shape=jax.ShapeDtypeStruct((s_pad, R, b_pad), jnp.float32),
        grid_spec=grid_spec,
        compiler_params=pltpu.CompilerParams(
            dimension_semantics=("parallel", "arbitrary"),
            vmem_limit_bytes=vmem_limit),
    )(lens_p, m0_p, wih, bih, tableT, tok_p)

    # Epilogue relayout to the PyTorch output format [B, S, 1, R]; small
    # compared with the kernel's token/hidden streams.
    hidden_tensor = jnp.transpose(hid[:S, :, :B], (2, 0, 1))[:, :, None, :]
    final_hidden = hidden_tensor[:, S - 1]                          # [B, 1, R]
    return hidden_tensor, final_hidden


def init_params(key, rank, vocab_size, output_size, batch_size):
    R2 = rank * rank
    ks = jax.random.split(key, 6)

    emb = 0.1 * jax.random.normal(ks[0], (vocab_size, R2), jnp.float32)
    emb = emb.at[0].set(0.0)                      # nn.Embedding padding_idx=0

    def linear(k, fan_in, fan_out):               # PyTorch Linear-style init
        kw, kb = jax.random.split(k)
        bound = 1.0 / jnp.sqrt(fan_in)
        w = jax.random.uniform(kw, (fan_out, fan_in), jnp.float32, -bound, bound)
        b = jax.random.uniform(kb, (fan_out,), jnp.float32, -bound, bound)
        return w, b

    wih_w, wih_b = linear(ks[1], rank, rank)          # self.wih
    whh_w, whh_b = linear(ks[2], R2, R2)              # self.whh
    h2o_w, h2o_b = linear(ks[3], rank, output_size)   # self.h2o (output unused)

    # m = init_m1(batch): kaiming_uniform_ on [B, 1, rank]
    bound_m = jnp.sqrt(6.0 / rank)
    m0 = jax.random.uniform(ks[4], (batch_size, rank), jnp.float32,
                            -bound_m, bound_m)

    # NOTE: self.dropout(0.2) is defined in __init__ but never used in forward.
    return dict(emb=emb, wih_w=wih_w, wih_b=wih_b, whh_w=whh_w, whh_b=whh_b,
                h2o_w=h2o_w, h2o_b=h2o_b, m0=m0)


def ref_forward(x, text_lens, params, rank):
    """Pure-JAX reference mirroring the PyTorch module."""
    B, S = x.shape
    enc = params["emb"][x]
    m = params["m0"]
    hiddens = []
    for i in range(S):
        w1 = m @ params["wih_w"].T + params["wih_b"]
        w2 = (enc[:, i, :] @ params["whh_w"].T
              + params["whh_b"]).reshape(B, rank, rank)
        h = jnp.tanh(jnp.einsum('bj,bjk->bk', w1, w2))
        mask = (i < text_lens).astype(jnp.float32)[:, None]
        h = h * mask + m * (1.0 - mask)
        hiddens.append(h)
        m = h
    hidden_tensor = jnp.stack(hiddens, axis=1)[:, :, None, :]
    return hidden_tensor, m[:, None, :]


if __name__ == "__main__":
    rank, vocab_size, output_size = 8, 50, 16
    B, S = 2, 8

    key = jax.random.PRNGKey(0)
    kx, kp = jax.random.split(key)
    x = jax.random.randint(kx, (B, S), 0, vocab_size, dtype=jnp.int32)
    text_lens = jnp.array([8, 5], dtype=jnp.int32)
    params = init_params(kp, rank, vocab_size, output_size, B)

    hidden_tensor, final_hidden = tn_layer_forward(x, text_lens, params, rank)
    jax.block_until_ready((hidden_tensor, final_hidden))

    assert hidden_tensor.shape == (B, S, 1, rank)
    assert final_hidden.shape == (B, 1, rank)

    ref_hid, ref_fin = ref_forward(x, text_lens, params, rank)
    assert jnp.allclose(hidden_tensor, ref_hid, atol=1e-5), "hidden mismatch"
    assert jnp.allclose(final_hidden, ref_fin, atol=1e-5), "final hidden mismatch"

    print("KERNEL_OK")
</pallas_src>

<mosaic_0001>
module attributes {stable_mosaic.version = 11 : i64} {
  func.func @tn_layer_kernel(%arg0: i32, %arg1: i32, %arg2: memref<1x128xi32, #tpu.memory_space<vmem>>, %arg3: memref<8x128xf32, #tpu.memory_space<vmem>>, %arg4: memref<8x8xf32, #tpu.memory_space<vmem>>, %arg5: memref<8x1xf32, #tpu.memory_space<vmem>>, %arg6: memref<64x128xf32, #tpu.memory_space<vmem>>, %arg7: memref<8x128xi32, #tpu.memory_space<vmem>>, %arg8: memref<8x8x128xf32, #tpu.memory_space<vmem>>, %arg9: memref<8x128xf32, #tpu.memory_space<vmem>>) attributes {dimension_semantics = [#tpu.dimension_semantics<parallel>, #tpu.dimension_semantics<arbitrary>], iteration_bounds = array<i64: 1, 1>, scalar_prefetch = 0 : i64, scratch_operands = 1 : i64, tpu.core_type = #tpu.core_type<tc>, window_params = [{transform_indices = @transform_0, window_bounds = array<i64: 1, 128>}, {transform_indices = @transform_1, window_bounds = array<i64: 8, 128>}, {pipeline_mode = #tpu.pipeline_mode<synchronous>, transform_indices = @transform_2, window_bounds = array<i64: 8, 8>}, {pipeline_mode = #tpu.pipeline_mode<synchronous>, transform_indices = @transform_3, window_bounds = array<i64: 8, 1>}, {pipeline_mode = #tpu.pipeline_mode<synchronous>, transform_indices = @transform_4, window_bounds = array<i64: 64, 128>}, {transform_indices = @transform_5, window_bounds = array<i64: 8, 128>}, {transform_indices = @transform_6, window_bounds = array<i64: 8, 8, 128>}]} {
    %c0_i32 = arith.constant 0 : i32
    %0 = arith.cmpi eq, %arg1, %c0_i32 : i32
    %1 = arith.extui %0 : i1 to i32
    %c0_i32_0 = arith.constant 0 : i32
    %2 = arith.cmpi ne, %1, %c0_i32_0 : i32
    scf.if %2 {
      %c0_39 = arith.constant 0 : index
      %c0_40 = arith.constant 0 : index
      %734 = vector.load %arg3[%c0_39, %c0_40] : memref<8x128xf32, #tpu.memory_space<vmem>>, vector<8x128xf32>
      %c0_41 = arith.constant 0 : index
      %c0_42 = arith.constant 0 : index
      %735 = vector.load %arg9[%c0_41, %c0_42] : memref<8x128xf32, #tpu.memory_space<vmem>>, vector<8x128xf32>
      tpu.vector_store %arg9[%c0_41, %c0_42], %734 {strides = array<i32>} : memref<8x128xf32, #tpu.memory_space<vmem>>, vector<8x128xf32>,
    } else {
    }
    %c0 = arith.constant 0 : index
    %c0_1 = arith.constant 0 : index
    %3 = vector.load %arg2[%c0, %c0_1] : memref<1x128xi32, #tpu.memory_space<vmem>>, vector<1x128xi32>
    %c0_2 = arith.constant 0 : index
    %c0_3 = arith.constant 0 : index
    %4 = vector.load %arg4[%c0_2, %c0_3] : memref<8x8xf32, #tpu.memory_space<vmem>>, vector<8x8xf32>
    %c0_4 = arith.constant 0 : index
    %c0_5 = arith.constant 0 : index
    %5 = vector.load %arg6[%c0_4, %c0_5] : memref<64x128xf32, #tpu.memory_space<vmem>>, vector<64x128xf32>
    %c0_6 = arith.constant 0 : index
    %c0_7 = arith.constant 0 : index
    %6 = vector.load %arg7[%c0_6, %c0_7] : memref<8x128xi32, #tpu.memory_space<vmem>>, vector<8x128xi32>
    %c0_8 = arith.constant 0 : index
    %c0_9 = arith.constant 0 : index
    %7 = vector.load %arg9[%c0_8, %c0_9] : memref<8x128xf32, #tpu.memory_space<vmem>>, vector<8x128xf32>
    %c8_i32 = arith.constant 8 : i32
    %8 = arith.muli %arg1, %c8_i32 : i32
    %9 = vector.extract_strided_slice %4 {offsets = [0, 0], sizes = [8, 1], strides = [1, 1]} : vector<8x8xf32> to vector<8x1xf32>
    %10 = vector.shape_cast %9 : vector<8x1xf32> to vector<8x1xf32>
    %11 = vector.broadcast %10 : vector<8x1xf32> to vector<8x128xf32>
    %12 = vector.extract_strided_slice %4 {offsets = [0, 1], sizes = [8, 1], strides = [1, 1]} : vector<8x8xf32> to vector<8x1xf32>
    %13 = vector.shape_cast %12 : vector<8x1xf32> to vector<8x1xf32>
    %14 = vector.broadcast %13 : vector<8x1xf32> to vector<8x128xf32>
    %15 = vector.extract_strided_slice %4 {offsets = [0, 2], sizes = [8, 1], strides = [1, 1]} : vector<8x8xf32> to vector<8x1xf32>
    %16 = vector.shape_cast %15 : vector<8x1xf32> to vector<8x1xf32>
    %17 = vector.broadcast %16 : vector<8x1xf32> to vector<8x128xf32>
    %18 = vector.extract_strided_slice %4 {offsets = [0, 3], sizes = [8, 1], strides = [1, 1]} : vector<8x8xf32> to vector<8x1xf32>
    %19 = vector.shape_cast %18 : vector<8x1xf32> to vector<8x1xf32>
    %20 = vector.broadcast %19 : vector<8x1xf32> to vector<8x128xf32>
    %21 = vector.extract_strided_slice %4 {offsets = [0, 4], sizes = [8, 1], strides = [1, 1]} : vector<8x8xf32> to vector<8x1xf32>
    %22 = vector.shape_cast %21 : vector<8x1xf32> to vector<8x1xf32>
    %23 = vector.broadcast %22 : vector<8x1xf32> to vector<8x128xf32>
    %24 = vector.extract_strided_slice %4 {offsets = [0, 5], sizes = [8, 1], strides = [1, 1]} : vector<8x8xf32> to vector<8x1xf32>
    %25 = vector.shape_cast %24 : vector<8x1xf32> to vector<8x1xf32>
    %26 = vector.broadcast %25 : vector<8x1xf32> to vector<8x128xf32>
    %27 = vector.extract_strided_slice %4 {offsets = [0, 6], sizes = [8, 1], strides = [1, 1]} : vector<8x8xf32> to vector<8x1xf32>
    %28 = vector.shape_cast %27 : vector<8x1xf32> to vector<8x1xf32>
    %29 = vector.broadcast %28 : vector<8x1xf32> to vector<8x128xf32>
    %30 = vector.extract_strided_slice %4 {offsets = [0, 7], sizes = [8, 1], strides = [1, 1]} : vector<8x8xf32> to vector<8x1xf32>
    %31 = vector.shape_cast %30 : vector<8x1xf32> to vector<8x1xf32>
    %32 = vector.broadcast %31 : vector<8x1xf32> to vector<8x128xf32>
    %c0_10 = arith.constant 0 : index
    %c0_11 = arith.constant 0 : index
    %33 = vector.load %arg5[%c0_10, %c0_11] : memref<8x1xf32, #tpu.memory_space<vmem>>, vector<8x1xf32>
    %34 = vector.shape_cast %33 : vector<8x1xf32> to vector<8x1xf32>
    %35 = vector.broadcast %34 : vector<8x1xf32> to vector<8x128xf32>
    %36 = tpu.iota {dimensions = array<i32: 0>} : vector<128x128xi32>
    %37 = vector.extract_strided_slice %6 {offsets = [0, 0], sizes = [1, 128], strides = [1, 1]} : vector<8x128xi32> to vector<1x128xi32>
    %38 = vector.broadcast %37 : vector<1x128xi32> to vector<128x128xi32>
    %39 = arith.cmpi eq, %36, %38 : vector<128x128xi32>
    %40 = arith.extui %39 : vector<128x128xi1> to vector<128x128xi32>
    %41 = arith.sitofp %40 : vector<128x128xi32> to vector<128x128xf32>
    %cst = arith.constant dense<0.000000e+00> : vector<64x128xf32>
    %42 = tpu.matmul %5, %41, %cst {dimension_numbers = #tpu.dot_dimension_numbers<[1], [0], [0], [1], [0, 0, 1, 1], [], []>} : vector<64x128xf32>, vector<128x128xf32>, vector<64x128xf32> -> vector<64x128xf32>
    %43 = vector.extract_strided_slice %7 {offsets = [0, 0], sizes = [1, 128], strides = [1, 1]} : vector<8x128xf32> to vector<1x128xf32>
    %44 = vector.broadcast %43 : vector<1x128xf32> to vector<8x128xf32>
    %45 = arith.mulf %11, %44 : vector<8x128xf32>
    %46 = vector.extract_strided_slice %7 {offsets = [1, 0], sizes = [1, 128], strides = [1, 1]} : vector<8x128xf32> to vector<1x128xf32>
    %47 = vector.broadcast %46 : vector<1x128xf32> to vector<8x128xf32>
    %48 = arith.mulf %14, %47 : vector<8x128xf32>
    %49 = vector.extract_strided_slice %7 {offsets = [2, 0], sizes = [1, 128], strides = [1, 1]} : vector<8x128xf32> to vector<1x128xf32>
    %50 = vector.broadcast %49 : vector<1x128xf32> to vector<8x128xf32>
    %51 = arith.mulf %17, %50 : vector<8x128xf32>
    %52 = vector.extract_strided_slice %7 {offsets = [3, 0], sizes = [1, 128], strides = [1, 1]} : vector<8x128xf32> to vector<1x128xf32>
    %53 = vector.broadcast %52 : vector<1x128xf32> to vector<8x128xf32>
    %54 = arith.mulf %20, %53 : vector<8x128xf32>
    %55 = vector.extract_strided_slice %7 {offsets = [4, 0], sizes = [1, 128], strides = [1, 1]} : vector<8x128xf32> to vector<1x128xf32>
    %56 = vector.broadcast %55 : vector<1x128xf32> to vector<8x128xf32>
    %57 = arith.mulf %23, %56 : vector<8x128xf32>
    %58 = vector.extract_strided_slice %7 {offsets = [5, 0], sizes = [1, 128], strides = [1, 1]} : vector<8x128xf32> to vector<1x128xf32>
    %59 = vector.broadcast %58 : vector<1x128xf32> to vector<8x128xf32>
    %60 = arith.mulf %26, %59 : vector<8x128xf32>
    %61 = vector.extract_strided_slice %7 {offsets = [6, 0], sizes = [1, 128], strides = [1, 1]} : vector<8x128xf32> to vector<1x128xf32>
    %62 = vector.broadcast %61 : vector<1x128xf32> to vector<8x128xf32>
    %63 = arith.mulf %29, %62 : vector<8x128xf32>
    %64 = vector.extract_strided_slice %7 {offsets = [7, 0], sizes = [1, 128], strides = [1, 1]} : vector<8x128xf32> to vector<1x128xf32>
    %65 = vector.broadcast %64 : vector<1x128xf32> to vector<8x128xf32>
    %66 = arith.mulf %32, %65 : vector<8x128xf32>
    %67 = arith.addf %45, %48 : vector<8x128xf32>
    %68 = arith.addf %51, %54 : vector<8x128xf32>
    %69 = arith.addf %57, %60 : vector<8x128xf32>
    %70 = arith.addf %63, %66 : vector<8x128xf32>
    %71 = arith.addf %67, %68 : vector<8x128xf32>
    %72 = arith.addf %69, %70 : vector<8x128xf32>
    %73 = arith.addf %71, %72 : vector<8x128xf32>
    %74 = arith.addf %73, %35 : vector<8x128xf32>
    %75 = vector.extract_strided_slice %74 {offsets = [0, 0], sizes = [1, 128], strides = [1, 1]} : vector<8x128xf32> to vector<1x128xf32>
    %76 = vector.extract_strided_slice %42 {offsets = [0, 0], sizes = [8, 128], strides = [1, 1]} : vector<64x128xf32> to vector<8x128xf32>
    %77 = vector.broadcast %75 : vector<1x128xf32> to vector<8x128xf32>
    %78 = arith.mulf %77, %76 : vector<8x128xf32>
    %79 = vector.extract_strided_slice %74 {offsets = [1, 0], sizes = [1, 128], strides = [1, 1]} : vector<8x128xf32> to vector<1x128xf32>
    %80 = vector.extract_strided_slice %42 {offsets = [8, 0], sizes = [8, 128], strides = [1, 1]} : vector<64x128xf32> to vector<8x128xf32>
    %81 = vector.broadcast %79 : vector<1x128xf32> to vector<8x128xf32>
    %82 = arith.mulf %81, %80 : vector<8x128xf32>
    %83 = vector.extract_strided_slice %74 {offsets = [2, 0], sizes = [1, 128], strides = [1, 1]} : vector<8x128xf32> to vector<1x128xf32>
    %84 = vector.extract_strided_slice %42 {offsets = [16, 0], sizes = [8, 128], strides = [1, 1]} : vector<64x128xf32> to vector<8x128xf32>
    %85 = vector.broadcast %83 : vector<1x128xf32> to vector<8x128xf32>
    %86 = arith.mulf %85, %84 : vector<8x128xf32>
    %87 = vector.extract_strided_slice %74 {offsets = [3, 0], sizes = [1, 128], strides = [1, 1]} : vector<8x128xf32> to vector<1x128xf32>
    %88 = vector.extract_strided_slice %42 {offsets = [24, 0], sizes = [8, 128], strides = [1, 1]} : vector<64x128xf32> to vector<8x128xf32>
    %89 = vector.broadcast %87 : vector<1x128xf32> to vector<8x128xf32>
    %90 = arith.mulf %89, %88 : vector<8x128xf32>
    %91 = vector.extract_strided_slice %74 {offsets = [4, 0], sizes = [1, 128], strides = [1, 1]} : vector<8x128xf32> to vector<1x128xf32>
    %92 = vector.extract_strided_slice %42 {offsets = [32, 0], sizes = [8, 128], strides = [1, 1]} : vector<64x128xf32> to vector<8x128xf32>
    %93 = vector.broadcast %91 : vector<1x128xf32> to vector<8x128xf32>
    %94 = arith.mulf %93, %92 : vector<8x128xf32>
    %95 = vector.extract_strided_slice %74 {offsets = [5, 0], sizes = [1, 128], strides = [1, 1]} : vector<8x128xf32> to vector<1x128xf32>
    %96 = vector.extract_strided_slice %42 {offsets = [40, 0], sizes = [8, 128], strides = [1, 1]} : vector<64x128xf32> to vector<8x128xf32>
    %97 = vector.broadcast %95 : vector<1x128xf32> to vector<8x128xf32>
    %98 = arith.mulf %97, %96 : vector<8x128xf32>
    %99 = vector.extract_strided_slice %74 {offsets = [6, 0], sizes = [1, 128], strides = [1, 1]} : vector<8x128xf32> to vector<1x128xf32>
    %100 = vector.extract_strided_slice %42 {offsets = [48, 0], sizes = [8, 128], strides = [1, 1]} : vector<64x128xf32> to vector<8x128xf32>
    %101 = vector.broadcast %99 : vector<1x128xf32> to vector<8x128xf32>
    %102 = arith.mulf %101, %100 : vector<8x128xf32>
    %103 = vector.extract_strided_slice %74 {offsets = [7, 0], sizes = [1, 128], strides = [1, 1]} : vector<8x128xf32> to vector<1x128xf32>
    %104 = vector.extract_strided_slice %42 {offsets = [56, 0], sizes = [8, 128], strides = [1, 1]} : vector<64x128xf32> to vector<8x128xf32>
    %105 = vector.broadcast %103 : vector<1x128xf32> to vector<8x128xf32>
    %106 = arith.mulf %105, %104 : vector<8x128xf32>
    %107 = arith.addf %78, %82 : vector<8x128xf32>
    %108 = arith.addf %86, %90 : vector<8x128xf32>
    %109 = arith.addf %94, %98 : vector<8x128xf32>
    %110 = arith.addf %102, %106 : vector<8x128xf32>
    %111 = arith.addf %107, %108 : vector<8x128xf32>
    %112 = arith.addf %109, %110 : vector<8x128xf32>
    %113 = arith.addf %111, %112 : vector<8x128xf32>
    %114 = math.tanh %113 : vector<8x128xf32>
    %c0_i32_12 = arith.constant 0 : i32
    %115 = arith.addi %8, %c0_i32_12 : i32
    %116 = vector.broadcast %115 : i32 to vector<1x128xi32>
    %117 = arith.cmpi sgt, %3, %116 : vector<1x128xi32>
    %118 = vector.shape_cast %117 : vector<1x128xi1> to vector<1x128xi1>
    %119 = vector.broadcast %118 : vector<1x128xi1> to vector<8x128xi1>
    %120 = arith.select %119, %114, %7 : vector<8x128xi1>, vector<8x128xf32>
    %c0_13 = arith.constant 0 : index
    %c0_14 = arith.constant 0 : index
    %c0_15 = arith.constant 0 : index
    %121 = vector.load %arg8[%c0_13, %c0_14, %c0_15] : memref<8x8x128xf32, #tpu.memory_space<vmem>>, vector<1x8x128xf32>
    %122 = vector.shape_cast %121 : vector<1x8x128xf32> to vector<8x128xf32>
    %123 = vector.shape_cast %120 : vector<8x128xf32> to vector<1x8x128xf32>
    tpu.vector_store %arg8[%c0_13, %c0_14, %c0_15], %123 {strides = array<i32>} : memref<8x8x128xf32, #tpu.memory_space<vmem>>, vector<1x8x128xf32>,
    %124 = vector.extract_strided_slice %6 {offsets = [1, 0], sizes = [1, 128], strides = [1, 1]} : vector<8x128xi32> to vector<1x128xi32>
    %125 = vector.broadcast %124 : vector<1x128xi32> to vector<128x128xi32>
    %126 = arith.cmpi eq, %36, %125 : vector<128x128xi32>
    %127 = arith.extui %126 : vector<128x128xi1> to vector<128x128xi32>
    %128 = arith.sitofp %127 : vector<128x128xi32> to vector<128x128xf32>
    %cst_16 = arith.constant dense<0.000000e+00> : vector<64x128xf32>
    %129 = tpu.matmul %5, %128, %cst_16 {dimension_numbers = #tpu.dot_dimension_numbers<[1], [0], [0], [1], [0, 0, 1, 1], [], []>} : vector<64x128xf32>, vector<128x128xf32>, vector<64x128xf32> -> vector<64x128xf32>
    %130 = vector.extract_strided_slice %120 {offsets = [0, 0], sizes = [1, 128], strides = [1, 1]} : vector<8x128xf32> to vector<1x128xf32>
    %131 = vector.broadcast %130 : vector<1x128xf32> to vector<8x128xf32>
    %132 = arith.mulf %11, %131 : vector<8x128xf32>
    %133 = vector.extract_strided_slice %120 {offsets = [1, 0], sizes = [1, 128], strides = [1, 1]} : vector<8x128xf32> to vector<1x128xf32>
    %134 = vector.broadcast %133 : vector<1x128xf32> to vector<8x128xf32>
    %135 = arith.mulf %14, %134 : vector<8x128xf32>
    %136 = vector.extract_strided_slice %120 {offsets = [2, 0], sizes = [1, 128], strides = [1, 1]} : vector<8x128xf32> to vector<1x128xf32>
    %137 = vector.broadcast %136 : vector<1x128xf32> to vector<8x128xf32>
    %138 = arith.mulf %17, %137 : vector<8x128xf32>
    %139 = vector.extract_strided_slice %120 {offsets = [3, 0], sizes = [1, 128], strides = [1, 1]} : vector<8x128xf32> to vector<1x128xf32>
    %140 = vector.broadcast %139 : vector<1x128xf32> to vector<8x128xf32>
    %141 = arith.mulf %20, %140 : vector<8x128xf32>
    %142 = vector.extract_strided_slice %120 {offsets = [4, 0], sizes = [1, 128], strides = [1, 1]} : vector<8x128xf32> to vector<1x128xf32>
    %143 = vector.broadcast %142 : vector<1x128xf32> to vector<8x128xf32>
    %144 = arith.mulf %23, %143 : vector<8x128xf32>
    %145 = vector.extract_strided_slice %120 {offsets = [5, 0], sizes = [1, 128], strides = [1, 1]} : vector<8x128xf32> to vector<1x128xf32>
    %146 = vector.broadcast %145 : vector<1x128xf32> to vector<8x128xf32>
    %147 = arith.mulf %26, %146 : vector<8x128xf32>
    %148 = vector.extract_strided_slice %120 {offsets = [6, 0], sizes = [1, 128], strides = [1, 1]} : vector<8x128xf32> to vector<1x128xf32>
    %149 = vector.broadcast %148 : vector<1x128xf32> to vector<8x128xf32>
    %150 = arith.mulf %29, %149 : vector<8x128xf32>
    %151 = vector.extract_strided_slice %120 {offsets = [7, 0], sizes = [1, 128], strides = [1, 1]} : vector<8x128xf32> to vector<1x128xf32>
    %152 = vector.broadcast %151 : vector<1x128xf32> to vector<8x128xf32>
    %153 = arith.mulf %32, %152 : vector<8x128xf32>
    %154 = arith.addf %132, %135 : vector<8x128xf32>
    %155 = arith.addf %138, %141 : vector<8x128xf32>
    %156 = arith.addf %144, %147 : vector<8x128xf32>
    %157 = arith.addf %150, %153 : vector<8x128xf32>
    %158 = arith.addf %154, %155 : vector<8x128xf32>
    %159 = arith.addf %156, %157 : vector<8x128xf32>
    %160 = arith.addf %158, %159 : vector<8x128xf32>
    %161 = arith.addf %160, %35 : vector<8x128xf32>
    %162 = vector.extract_strided_slice %161 {offsets = [0, 0], sizes = [1, 128], strides = [1, 1]} : vector<8x128xf32> to vector<1x128xf32>
    %163 = vector.extract_strided_slice %129 {offsets = [0, 0], sizes = [8, 128], strides = [1, 1]} : vector<64x128xf32> to vector<8x128xf32>
    %164 = vector.broadcast %162 : vector<1x128xf32> to vector<8x128xf32>
    %165 = arith.mulf %164, %163 : vector<8x128xf32>
    %166 = vector.extract_strided_slice %161 {offsets = [1, 0], sizes = [1, 128], strides = [1, 1]} : vector<8x128xf32> to vector<1x128xf32>
    %167 = vector.extract_strided_slice %129 {offsets = [8, 0], sizes = [8, 128], strides = [1, 1]} : vector<64x128xf32> to vector<8x128xf32>
    %168 = vector.broadcast %166 : vector<1x128xf32> to vector<8x128xf32>
    %169 = arith.mulf %168, %167 : vector<8x128xf32>
    %170 = vector.extract_strided_slice %161 {offsets = [2, 0], sizes = [1, 128], strides = [1, 1]} : vector<8x128xf32> to vector<1x128xf32>
    %171 = vector.extract_strided_slice %129 {offsets = [16, 0], sizes = [8, 128], strides = [1, 1]} : vector<64x128xf32> to vector<8x128xf32>
    %172 = vector.broadcast %170 : vector<1x128xf32> to vector<8x128xf32>
    %173 = arith.mulf %172, %171 : vector<8x128xf32>
    %174 = vector.extract_strided_slice %161 {offsets = [3, 0], sizes = [1, 128], strides = [1, 1]} : vector<8x128xf32> to vector<1x128xf32>
    %175 = vector.extract_strided_slice %129 {offsets = [24, 0], sizes = [8, 128], strides = [1, 1]} : vector<64x128xf32> to vector<8x128xf32>
    %176 = vector.broadcast %174 : vector<1x128xf32> to vector<8x128xf32>
    %177 = arith.mulf %176, %175 : vector<8x128xf32>
    %178 = vector.extract_strided_slice %161 {offsets = [4, 0], sizes = [1, 128], strides = [1, 1]} : vector<8x128xf32> to vector<1x128xf32>
    %179 = vector.extract_strided_slice %129 {offsets = [32, 0], sizes = [8, 128], strides = [1, 1]} : vector<64x128xf32> to vector<8x128xf32>
    %180 = vector.broadcast %178 : vector<1x128xf32> to vector<8x128xf32>
    %181 = arith.mulf %180, %179 : vector<8x128xf32>
    %182 = vector.extract_strided_slice %161 {offsets = [5, 0], sizes = [1, 128], strides = [1, 1]} : vector<8x128xf32> to vector<1x128xf32>
    %183 = vector.extract_strided_slice %129 {offsets = [40, 0], sizes = [8, 128], strides = [1, 1]} : vector<64x128xf32> to vector<8x128xf32>
    %184 = vector.broadcast %182 : vector<1x128xf32> to vector<8x128xf32>
    %185 = arith.mulf %184, %183 : vector<8x128xf32>
    %186 = vector.extract_strided_slice %161 {offsets = [6, 0], sizes = [1, 128], strides = [1, 1]} : vector<8x128xf32> to vector<1x128xf32>
    %187 = vector.extract_strided_slice %129 {offsets = [48, 0], sizes = [8, 128], strides = [1, 1]} : vector<64x128xf32> to vector<8x128xf32>
    %188 = vector.broadcast %186 : vector<1x128xf32> to vector<8x128xf32>
    %189 = arith.mulf %188, %187 : vector<8x128xf32>
    %190 = vector.extract_strided_slice %161 {offsets = [7, 0], sizes = [1, 128], strides = [1, 1]} : vector<8x128xf32> to vector<1x128xf32>
    %191 = vector.extract_strided_slice %129 {offsets = [56, 0], sizes = [8, 128], strides = [1, 1]} : vector<64x128xf32> to vector<8x128xf32>
    %192 = vector.broadcast %190 : vector<1x128xf32> to vector<8x128xf32>
    %193 = arith.mulf %192, %191 : vector<8x128xf32>
    %194 = arith.addf %165, %169 : vector<8x128xf32>
    %195 = arith.addf %173, %177 : vector<8x128xf32>
    %196 = arith.addf %181, %185 : vector<8x128xf32>
    %197 = arith.addf %189, %193 : vector<8x128xf32>
    %198 = arith.addf %194, %195 : vector<8x128xf32>
    %199 = arith.addf %196, %197 : vector<8x128xf32>
    %200 = arith.addf %198, %199 : vector<8x128xf32>
    %201 = math.tanh %200 : vector<8x128xf32>
    %c1_i32 = arith.constant 1 : i32
    %202 = arith.addi %8, %c1_i32 : i32
    %203 = vector.broadcast %202 : i32 to vector<1x128xi32>
    %204 = arith.cmpi sgt, %3, %203 : vector<1x128xi32>
    %205 = vector.shape_cast %204 : vector<1x128xi1> to vector<1x128xi1>
    %206 = vector.broadcast %205 : vector<1x128xi1> to vector<8x128xi1>
    %207 = arith.select %206, %201, %120 : vector<8x128xi1>, vector<8x128xf32>
    %c1 = arith.constant 1 : index
    %c0_17 = arith.constant 0 : index
    %c0_18 = arith.constant 0 : index
    %208 = vector.load %arg8[%c1, %c0_17, %c0_18] : memref<8x8x128xf32, #tpu.memory_space<vmem>>, vector<1x8x128xf32>
    %209 = vector.shape_cast %208 : vector<1x8x128xf32> to vector<8x128xf32>
    %210 = vector.shape_cast %207 : vector<8x128xf32> to vector<1x8x128xf32>
    tpu.vector_store %arg8[%c1, %c0_17, %c0_18], %210 {strides = array<i32>} : memref<8x8x128xf32, #tpu.memory_space<vmem>>, vector<1x8x128xf32>,
    %211 = vector.extract_strided_slice %6 {offsets = [2, 0], sizes = [1, 128], strides = [1, 1]} : vector<8x128xi32> to vector<1x128xi32>
    %212 = vector.broadcast %211 : vector<1x128xi32> to vector<128x128xi32>
    %213 = arith.cmpi eq, %36, %212 : vector<128x128xi32>
    %214 = arith.extui %213 : vector<128x128xi1> to vector<128x128xi32>
    %215 = arith.sitofp %214 : vector<128x128xi32> to vector<128x128xf32>
    %cst_19 = arith.constant dense<0.000000e+00> : vector<64x128xf32>
    %216 = tpu.matmul %5, %215, %cst_19 {dimension_numbers = #tpu.dot_dimension_numbers<[1], [0], [0], [1], [0, 0, 1, 1], [], []>} : vector<64x128xf32>, vector<128x128xf32>, vector<64x128xf32> -> vector<64x128xf32>
    %217 = vector.extract_strided_slice %207 {offsets = [0, 0], sizes = [1, 128], strides = [1, 1]} : vector<8x128xf32> to vector<1x128xf32>
    %218 = vector.broadcast %217 : vector<1x128xf32> to vector<8x128xf32>
    %219 = arith.mulf %11, %218 : vector<8x128xf32>
    %220 = vector.extract_strided_slice %207 {offsets = [1, 0], sizes = [1, 128], strides = [1, 1]} : vector<8x128xf32> to vector<1x128xf32>
    %221 = vector.broadcast %220 : vector<1x128xf32> to vector<8x128xf32>
    %222 = arith.mulf %14, %221 : vector<8x128xf32>
    %223 = vector.extract_strided_slice %207 {offsets = [2, 0], sizes = [1, 128], strides = [1, 1]} : vector<8x128xf32> to vector<1x128xf32>
    %224 = vector.broadcast %223 : vector<1x128xf32> to vector<8x128xf32>
    %225 = arith.mulf %17, %224 : vector<8x128xf32>
    %226 = vector.extract_strided_slice %207 {offsets = [3, 0], sizes = [1, 128], strides = [1, 1]} : vector<8x128xf32> to vector<1x128xf32>
    %227 = vector.broadcast %226 : vector<1x128xf32> to vector<8x128xf32>
    %228 = arith.mulf %20, %227 : vector<8x128xf32>
    %229 = vector.extract_strided_slice %207 {offsets = [4, 0], sizes = [1, 128], strides = [1, 1]} : vector<8x128xf32> to vector<1x128xf32>
    %230 = vector.broadcast %229 : vector<1x128xf32> to vector<8x128xf32>
    %231 = arith.mulf %23, %230 : vector<8x128xf32>
    %232 = vector.extract_strided_slice %207 {offsets = [5, 0], sizes = [1, 128], strides = [1, 1]} : vector<8x128xf32> to vector<1x128xf32>
    %233 = vector.broadcast %232 : vector<1x128xf32> to vector<8x128xf32>
    %234 = arith.mulf %26, %233 : vector<8x128xf32>
    %235 = vector.extract_strided_slice %207 {offsets = [6, 0], sizes = [1, 128], strides = [1, 1]} : vector<8x128xf32> to vector<1x128xf32>
    %236 = vector.broadcast %235 : vector<1x128xf32> to vector<8x128xf32>
    %237 = arith.mulf %29, %236 : vector<8x128xf32>
    %238 = vector.extract_strided_slice %207 {offsets = [7, 0], sizes = [1, 128], strides = [1, 1]} : vector<8x128xf32> to vector<1x128xf32>
    %239 = vector.broadcast %238 : vector<1x128xf32> to vector<8x128xf32>
    %240 = arith.mulf %32, %239 : vector<8x128xf32>
    %241 = arith.addf %219, %222 : vector<8x128xf32>
    %242 = arith.addf %225, %228 : vector<8x128xf32>
    %243 = arith.addf %231, %234 : vector<8x128xf32>
    %244 = arith.addf %237, %240 : vector<8x128xf32>
    %245 = arith.addf %241, %242 : vector<8x128xf32>
    %246 = arith.addf %243, %244 : vector<8x128xf32>
    %247 = arith.addf %245, %246 : vector<8x128xf32>
    %248 = arith.addf %247, %35 : vector<8x128xf32>
    %249 = vector.extract_strided_slice %248 {offsets = [0, 0], sizes = [1, 128], strides = [1, 1]} : vector<8x128xf32> to vector<1x128xf32>
    %250 = vector.extract_strided_slice %216 {offsets = [0, 0], sizes = [8, 128], strides = [1, 1]} : vector<64x128xf32> to vector<8x128xf32>
    %251 = vector.broadcast %249 : vector<1x128xf32> to vector<8x128xf32>
    %252 = arith.mulf %251, %250 : vector<8x128xf32>
    %253 = vector.extract_strided_slice %248 {offsets = [1, 0], sizes = [1, 128], strides = [1, 1]} : vector<8x128xf32> to vector<1x128xf32>
    %254 = vector.extract_strided_slice %216 {offsets = [8, 0], sizes = [8, 128], strides = [1, 1]} : vector<64x128xf32> to vector<8x128xf32>
    %255 = vector.broadcast %253 : vector<1x128xf32> to vector<8x128xf32>
    %256 = arith.mulf %255, %254 : vector<8x128xf32>
    %257 = vector.extract_strided_slice %248 {offsets = [2, 0], sizes = [1, 128], strides = [1, 1]} : vector<8x128xf32> to vector<1x128xf32>
    %258 = vector.extract_strided_slice %216 {offsets = [16, 0], sizes = [8, 128], strides = [1, 1]} : vector<64x128xf32> to vector<8x128xf32>
    %259 = vector.broadcast %257 : vector<1x128xf32> to vector<8x128xf32>
    %260 = arith.mulf %259, %258 : vector<8x128xf32>
    %261 = vector.extract_strided_slice %248 {offsets = [3, 0], sizes = [1, 128], strides = [1, 1]} : vector<8x128xf32> to vector<1x128xf32>
    %262 = vector.extract_strided_slice %216 {offsets = [24, 0], sizes = [8, 128], strides = [1, 1]} : vector<64x128xf32> to vector<8x128xf32>
    %263 = vector.broadcast %261 : vector<1x128xf32> to vector<8x128xf32>
    %264 = arith.mulf %263, %262 : vector<8x128xf32>
    %265 = vector.extract_strided_slice %248 {offsets = [4, 0], sizes = [1, 128], strides = [1, 1]} : vector<8x128xf32> to vector<1x128xf32>
    %266 = vector.extract_strided_slice %216 {offsets = [32, 0], sizes = [8, 128], strides = [1, 1]} : vector<64x128xf32> to vector<8x128xf32>
    %267 = vector.broadcast %265 : vector<1x128xf32> to vector<8x128xf32>
    %268 = arith.mulf %267, %266 : vector<8x128xf32>
    %269 = vector.extract_strided_slice %248 {offsets = [5, 0], sizes = [1, 128], strides = [1, 1]} : vector<8x128xf32> to vector<1x128xf32>
    %270 = vector.extract_strided_slice %216 {offsets = [40, 0], sizes = [8, 128], strides = [1, 1]} : vector<64x128xf32> to vector<8x128xf32>
    %271 = vector.broadcast %269 : vector<1x128xf32> to vector<8x128xf32>
    %272 = arith.mulf %271, %270 : vector<8x128xf32>
    %273 = vector.extract_strided_slice %248 {offsets = [6, 0], sizes = [1, 128], strides = [1, 1]} : vector<8x128xf32> to vector<1x128xf32>
    %274 = vector.extract_strided_slice %216 {offsets = [48, 0], sizes = [8, 128], strides = [1, 1]} : vector<64x128xf32> to vector<8x128xf32>
    %275 = vector.broadcast %273 : vector<1x128xf32> to vector<8x128xf32>
    %276 = arith.mulf %275, %274 : vector<8x128xf32>
    %277 = vector.extract_strided_slice %248 {offsets = [7, 0], sizes = [1, 128], strides = [1, 1]} : vector<8x128xf32> to vector<1x128xf32>
    %278 = vector.extract_strided_slice %216 {offsets = [56, 0], sizes = [8, 128], strides = [1, 1]} : vector<64x128xf32> to vector<8x128xf32>
    %279 = vector.broadcast %277 : vector<1x128xf32> to vector<8x128xf32>
    %280 = arith.mulf %279, %278 : vector<8x128xf32>
    %281 = arith.addf %252, %256 : vector<8x128xf32>
    %282 = arith.addf %260, %264 : vector<8x128xf32>
    %283 = arith.addf %268, %272 : vector<8x128xf32>
    %284 = arith.addf %276, %280 : vector<8x128xf32>
    %285 = arith.addf %281, %282 : vector<8x128xf32>
    %286 = arith.addf %283, %284 : vector<8x128xf32>
    %287 = arith.addf %285, %286 : vector<8x128xf32>
    %288 = math.tanh %287 : vector<8x128xf32>
    %c2_i32 = arith.constant 2 : i32
    %289 = arith.addi %8, %c2_i32 : i32
    %290 = vector.broadcast %289 : i32 to vector<1x128xi32>
    %291 = arith.cmpi sgt, %3, %290 : vector<1x128xi32>
    %292 = vector.shape_cast %291 : vector<1x128xi1> to vector<1x128xi1>
    %293 = vector.broadcast %292 : vector<1x128xi1> to vector<8x128xi1>
    %294 = arith.select %293, %288, %207 : vector<8x128xi1>, vector<8x128xf32>
    %c2 = arith.constant 2 : index
    %c0_20 = arith.constant 0 : index
    %c0_21 = arith.constant 0 : index
    %295 = vector.load %arg8[%c2, %c0_20, %c0_21] : memref<8x8x128xf32, #tpu.memory_space<vmem>>, vector<1x8x128xf32>
    %296 = vector.shape_cast %295 : vector<1x8x128xf32> to vector<8x128xf32>
    %297 = vector.shape_cast %294 : vector<8x128xf32> to vector<1x8x128xf32>
    tpu.vector_store %arg8[%c2, %c0_20, %c0_21], %297 {strides = array<i32>} : memref<8x8x128xf32, #tpu.memory_space<vmem>>, vector<1x8x128xf32>,
    %298 = vector.extract_strided_slice %6 {offsets = [3, 0], sizes = [1, 128], strides = [1, 1]} : vector<8x128xi32> to vector<1x128xi32>
    %299 = vector.broadcast %298 : vector<1x128xi32> to vector<128x128xi32>
    %300 = arith.cmpi eq, %36, %299 : vector<128x128xi32>
    %301 = arith.extui %300 : vector<128x128xi1> to vector<128x128xi32>
    %302 = arith.sitofp %301 : vector<128x128xi32> to vector<128x128xf32>
    %cst_22 = arith.constant dense<0.000000e+00> : vector<64x128xf32>
    %303 = tpu.matmul %5, %302, %cst_22 {dimension_numbers = #tpu.dot_dimension_numbers<[1], [0], [0], [1], [0, 0, 1, 1], [], []>} : vector<64x128xf32>, vector<128x128xf32>, vector<64x128xf32> -> vector<64x128xf32>
    %304 = vector.extract_strided_slice %294 {offsets = [0, 0], sizes = [1, 128], strides = [1, 1]} : vector<8x128xf32> to vector<1x128xf32>
    %305 = vector.broadcast %304 : vector<1x128xf32> to vector<8x128xf32>
    %306 = arith.mulf %11, %305 : vector<8x128xf32>
    %307 = vector.extract_strided_slice %294 {offsets = [1, 0], sizes = [1, 128], strides = [1, 1]} : vector<8x128xf32> to vector<1x128xf32>
    %308 = vector.broadcast %307 : vector<1x128xf32> to vector<8x128xf32>
    %309 = arith.mulf %14, %308 : vector<8x128xf32>
    %310 = vector.extract_strided_slice %294 {offsets = [2, 0], sizes = [1, 128], strides = [1, 1]} : vector<8x128xf32> to vector<1x128xf32>
    %311 = vector.broadcast %310 : vector<1x128xf32> to vector<8x128xf32>
    %312 = arith.mulf %17, %311 : vector<8x128xf32>
    %313 = vector.extract_strided_slice %294 {offsets = [3, 0], sizes = [1, 128], strides = [1, 1]} : vector<8x128xf32> to vector<1x128xf32>
    %314 = vector.broadcast %313 : vector<1x128xf32> to vector<8x128xf32>
    %315 = arith.mulf %20, %314 : vector<8x128xf32>
    %316 = vector.extract_strided_slice %294 {offsets = [4, 0], sizes = [1, 128], strides = [1, 1]} : vector<8x128xf32> to vector<1x128xf32>
    %317 = vector.broadcast %316 : vector<1x128xf32> to vector<8x128xf32>
    %318 = arith.mulf %23, %317 : vector<8x128xf32>
    %319 = vector.extract_strided_slice %294 {offsets = [5, 0], sizes = [1, 128], strides = [1, 1]} : vector<8x128xf32> to vector<1x128xf32>
    %320 = vector.broadcast %319 : vector<1x128xf32> to vector<8x128xf32>
    %321 = arith.mulf %26, %320 : vector<8x128xf32>
    %322 = vector.extract_strided_slice %294 {offsets = [6, 0], sizes = [1, 128], strides = [1, 1]} : vector<8x128xf32> to vector<1x128xf32>
    %323 = vector.broadcast %322 : vector<1x128xf32> to vector<8x128xf32>
    %324 = arith.mulf %29, %323 : vector<8x128xf32>
    %325 = vector.extract_strided_slice %294 {offsets = [7, 0], sizes = [1, 128], strides = [1, 1]} : vector<8x128xf32> to vector<1x128xf32>
    %326 = vector.broadcast %325 : vector<1x128xf32> to vector<8x128xf32>
    %327 = arith.mulf %32, %326 : vector<8x128xf32>
    %328 = arith.addf %306, %309 : vector<8x128xf32>
    %329 = arith.addf %312, %315 : vector<8x128xf32>
    %330 = arith.addf %318, %321 : vector<8x128xf32>
    %331 = arith.addf %324, %327 : vector<8x128xf32>
    %332 = arith.addf %328, %329 : vector<8x128xf32>
    %333 = arith.addf %330, %331 : vector<8x128xf32>
    %334 = arith.addf %332, %333 : vector<8x128xf32>
    %335 = arith.addf %334, %35 : vector<8x128xf32>
    %336 = vector.extract_strided_slice %335 {offsets = [0, 0], sizes = [1, 128], strides = [1, 1]} : vector<8x128xf32> to vector<1x128xf32>
    %337 = vector.extract_strided_slice %303 {offsets = [0, 0], sizes = [8, 128], strides = [1, 1]} : vector<64x128xf32> to vector<8x128xf32>
    %338 = vector.broadcast %336 : vector<1x128xf32> to vector<8x128xf32>
    %339 = arith.mulf %338, %337 : vector<8x128xf32>
    %340 = vector.extract_strided_slice %335 {offsets = [1, 0], sizes = [1, 128], strides = [1, 1]} : vector<8x128xf32> to vector<1x128xf32>
    %341 = vector.extract_strided_slice %303 {offsets = [8, 0], sizes = [8, 128], strides = [1, 1]} : vector<64x128xf32> to vector<8x128xf32>
    %342 = vector.broadcast %340 : vector<1x128xf32> to vector<8x128xf32>
    %343 = arith.mulf %342, %341 : vector<8x128xf32>
    %344 = vector.extract_strided_slice %335 {offsets = [2, 0], sizes = [1, 128], strides = [1, 1]} : vector<8x128xf32> to vector<1x128xf32>
    %345 = vector.extract_strided_slice %303 {offsets = [16, 0], sizes = [8, 128], strides = [1, 1]} : vector<64x128xf32> to vector<8x128xf32>
    %346 = vector.broadcast %344 : vector<1x128xf32> to vector<8x128xf32>
    %347 = arith.mulf %346, %345 : vector<8x128xf32>
    %348 = vector.extract_strided_slice %335 {offsets = [3, 0], sizes = [1, 128], strides = [1, 1]} : vector<8x128xf32> to vector<1x128xf32>
    %349 = vector.extract_strided_slice %303 {offsets = [24, 0], sizes = [8, 128], strides = [1, 1]} : vector<64x128xf32> to vector<8x128xf32>
    %350 = vector.broadcast %348 : vector<1x128xf32> to vector<8x128xf32>
    %351 = arith.mulf %350, %349 : vector<8x128xf32>
    %352 = vector.extract_strided_slice %335 {offsets = [4, 0], sizes = [1, 128], strides = [1, 1]} : vector<8x128xf32> to vector<1x128xf32>
    %353 = vector.extract_strided_slice %303 {offsets = [32, 0], sizes = [8, 128], strides = [1, 1]} : vector<64x128xf32> to vector<8x128xf32>
    %354 = vector.broadcast %352 : vector<1x128xf32> to vector<8x128xf32>
    %355 = arith.mulf %354, %353 : vector<8x128xf32>
    %356 = vector.extract_strided_slice %335 {offsets = [5, 0], sizes = [1, 128], strides = [1, 1]} : vector<8x128xf32> to vector<1x128xf32>
    %357 = vector.extract_strided_slice %303 {offsets = [40, 0], sizes = [8, 128], strides = [1, 1]} : vector<64x128xf32> to vector<8x128xf32>
    %358 = vector.broadcast %356 : vector<1x128xf32> to vector<8x128xf32>
    %359 = arith.mulf %358, %357 : vector<8x128xf32>
    %360 = vector.extract_strided_slice %335 {offsets = [6, 0], sizes = [1, 128], strides = [1, 1]} : vector<8x128xf32> to vector<1x128xf32>
    %361 = vector.extract_strided_slice %303 {offsets = [48, 0], sizes = [8, 128], strides = [1, 1]} : vector<64x128xf32> to vector<8x128xf32>
    %362 = vector.broadcast %360 : vector<1x128xf32> to vector<8x128xf32>
    %363 = arith.mulf %362, %361 : vector<8x128xf32>
    %364 = vector.extract_strided_slice %335 {offsets = [7, 0], sizes = [1, 128], strides = [1, 1]} : vector<8x128xf32> to vector<1x128xf32>
    %365 = vector.extract_strided_slice %303 {offsets = [56, 0], sizes = [8, 128], strides = [1, 1]} : vector<64x128xf32> to vector<8x128xf32>
    %366 = vector.broadcast %364 : vector<1x128xf32> to vector<8x128xf32>
    %367 = arith.mulf %366, %365 : vector<8x128xf32>
    %368 = arith.addf %339, %343 : vector<8x128xf32>
    %369 = arith.addf %347, %351 : vector<8x128xf32>
    %370 = arith.addf %355, %359 : vector<8x128xf32>
    %371 = arith.addf %363, %367 : vector<8x128xf32>
    %372 = arith.addf %368, %369 : vector<8x128xf32>
    %373 = arith.addf %370, %371 : vector<8x128xf32>
    %374 = arith.addf %372, %373 : vector<8x128xf32>
    %375 = math.tanh %374 : vector<8x128xf32>
    %c3_i32 = arith.constant 3 : i32
    %376 = arith.addi %8, %c3_i32 : i32
    %377 = vector.broadcast %376 : i32 to vector<1x128xi32>
    %378 = arith.cmpi sgt, %3, %377 : vector<1x128xi32>
    %379 = vector.shape_cast %378 : vector<1x128xi1> to vector<1x128xi1>
    %380 = vector.broadcast %379 : vector<1x128xi1> to vector<8x128xi1>
    %381 = arith.select %380, %375, %294 : vector<8x128xi1>, vector<8x128xf32>
    %c3 = arith.constant 3 : index
    %c0_23 = arith.constant 0 : index
    %c0_24 = arith.constant 0 : index
    %382 = vector.load %arg8[%c3, %c0_23, %c0_24] : memref<8x8x128xf32, #tpu.memory_space<vmem>>, vector<1x8x128xf32>
    %383 = vector.shape_cast %382 : vector<1x8x128xf32> to vector<8x128xf32>
    %384 = vector.shape_cast %381 : vector<8x128xf32> to vector<1x8x128xf32>
    tpu.vector_store %arg8[%c3, %c0_23, %c0_24], %384 {strides = array<i32>} : memref<8x8x128xf32, #tpu.memory_space<vmem>>, vector<1x8x128xf32>,
    %385 = vector.extract_strided_slice %6 {offsets = [4, 0], sizes = [1, 128], strides = [1, 1]} : vector<8x128xi32> to vector<1x128xi32>
    %386 = vector.broadcast %385 : vector<1x128xi32> to vector<128x128xi32>
    %387 = arith.cmpi eq, %36, %386 : vector<128x128xi32>
    %388 = arith.extui %387 : vector<128x128xi1> to vector<128x128xi32>
    %389 = arith.sitofp %388 : vector<128x128xi32> to vector<128x128xf32>
    %cst_25 = arith.constant dense<0.000000e+00> : vector<64x128xf32>
    %390 = tpu.matmul %5, %389, %cst_25 {dimension_numbers = #tpu.dot_dimension_numbers<[1], [0], [0], [1], [0, 0, 1, 1], [], []>} : vector<64x128xf32>, vector<128x128xf32>, vector<64x128xf32> -> vector<64x128xf32>
    %391 = vector.extract_strided_slice %381 {offsets = [0, 0], sizes = [1, 128], strides = [1, 1]} : vector<8x128xf32> to vector<1x128xf32>
    %392 = vector.broadcast %391 : vector<1x128xf32> to vector<8x128xf32>
    %393 = arith.mulf %11, %392 : vector<8x128xf32>
    %394 = vector.extract_strided_slice %381 {offsets = [1, 0], sizes = [1, 128], strides = [1, 1]} : vector<8x128xf32> to vector<1x128xf32>
    %395 = vector.broadcast %394 : vector<1x128xf32> to vector<8x128xf32>
    %396 = arith.mulf %14, %395 : vector<8x128xf32>
    %397 = vector.extract_strided_slice %381 {offsets = [2, 0], sizes = [1, 128], strides = [1, 1]} : vector<8x128xf32> to vector<1x128xf32>
    %398 = vector.broadcast %397 : vector<1x128xf32> to vector<8x128xf32>
    %399 = arith.mulf %17, %398 : vector<8x128xf32>
    %400 = vector.extract_strided_slice %381 {offsets = [3, 0], sizes = [1, 128], strides = [1, 1]} : vector<8x128xf32> to vector<1x128xf32>
    %401 = vector.broadcast %400 : vector<1x128xf32> to vector<8x128xf32>
    %402 = arith.mulf %20, %401 : vector<8x128xf32>
    %403 = vector.extract_strided_slice %381 {offsets = [4, 0], sizes = [1, 128], strides = [1, 1]} : vector<8x128xf32> to vector<1x128xf32>
    %404 = vector.broadcast %403 : vector<1x128xf32> to vector<8x128xf32>
    %405 = arith.mulf %23, %404 : vector<8x128xf32>
    %406 = vector.extract_strided_slice %381 {offsets = [5, 0], sizes = [1, 128], strides = [1, 1]} : vector<8x128xf32> to vector<1x128xf32>
    %407 = vector.broadcast %406 : vector<1x128xf32> to vector<8x128xf32>
    %408 = arith.mulf %26, %407 : vector<8x128xf32>
    %409 = vector.extract_strided_slice %381 {offsets = [6, 0], sizes = [1, 128], strides = [1, 1]} : vector<8x128xf32> to vector<1x128xf32>
    %410 = vector.broadcast %409 : vector<1x128xf32> to vector<8x128xf32>
    %411 = arith.mulf %29, %410 : vector<8x128xf32>
    %412 = vector.extract_strided_slice %381 {offsets = [7, 0], sizes = [1, 128], strides = [1, 1]} : vector<8x128xf32> to vector<1x128xf32>
    %413 = vector.broadcast %412 : vector<1x128xf32> to vector<8x128xf32>
    %414 = arith.mulf %32, %413 : vector<8x128xf32>
    %415 = arith.addf %393, %396 : vector<8x128xf32>
    %416 = arith.addf %399, %402 : vector<8x128xf32>
    %417 = arith.addf %405, %408 : vector<8x128xf32>
    %418 = arith.addf %411, %414 : vector<8x128xf32>
    %419 = arith.addf %415, %416 : vector<8x128xf32>
    %420 = arith.addf %417, %418 : vector<8x128xf32>
    %421 = arith.addf %419, %420 : vector<8x128xf32>
    %422 = arith.addf %421, %35 : vector<8x128xf32>
    %423 = vector.extract_strided_slice %422 {offsets = [0, 0], sizes = [1, 128], strides = [1, 1]} : vector<8x128xf32> to vector<1x128xf32>
    %424 = vector.extract_strided_slice %390 {offsets = [0, 0], sizes = [8, 128], strides = [1, 1]} : vector<64x128xf32> to vector<8x128xf32>
    %425 = vector.broadcast %423 : vector<1x128xf32> to vector<8x128xf32>
    %426 = arith.mulf %425, %424 : vector<8x128xf32>
    %427 = vector.extract_strided_slice %422 {offsets = [1, 0], sizes = [1, 128], strides = [1, 1]} : vector<8x128xf32> to vector<1x128xf32>
    %428 = vector.extract_strided_slice %390 {offsets = [8, 0], sizes = [8, 128], strides = [1, 1]} : vector<64x128xf32> to vector<8x128xf32>
    %429 = vector.broadcast %427 : vector<1x128xf32> to vector<8x128xf32>
    %430 = arith.mulf %429, %428 : vector<8x128xf32>
    %431 = vector.extract_strided_slice %422 {offsets = [2, 0], sizes = [1, 128], strides = [1, 1]} : vector<8x128xf32> to vector<1x128xf32>
    %432 = vector.extract_strided_slice %390 {offsets = [16, 0], sizes = [8, 128], strides = [1, 1]} : vector<64x128xf32> to vector<8x128xf32>
    %433 = vector.broadcast %431 : vector<1x128xf32> to vector<8x128xf32>
    %434 = arith.mulf %433, %432 : vector<8x128xf32>
    %435 = vector.extract_strided_slice %422 {offsets = [3, 0], sizes = [1, 128], strides = [1, 1]} : vector<8x128xf32> to vector<1x128xf32>
    %436 = vector.extract_strided_slice %390 {offsets = [24, 0], sizes = [8, 128], strides = [1, 1]} : vector<64x128xf32> to vector<8x128xf32>
    %437 = vector.broadcast %435 : vector<1x128xf32> to vector<8x128xf32>
    %438 = arith.mulf %437, %436 : vector<8x128xf32>
    %439 = vector.extract_strided_slice %422 {offsets = [4, 0], sizes = [1, 128], strides = [1, 1]} : vector<8x128xf32> to vector<1x128xf32>
    %440 = vector.extract_strided_slice %390 {offsets = [32, 0], sizes = [8, 128], strides = [1, 1]} : vector<64x128xf32> to vector<8x128xf32>
    %441 = vector.broadcast %439 : vector<1x128xf32> to vector<8x128xf32>
    %442 = arith.mulf %441, %440 : vector<8x128xf32>
    %443 = vector.extract_strided_slice %422 {offsets = [5, 0], sizes = [1, 128], strides = [1, 1]} : vector<8x128xf32> to vector<1x128xf32>
    %444 = vector.extract_strided_slice %390 {offsets = [40, 0], sizes = [8, 128], strides = [1, 1]} : vector<64x128xf32> to vector<8x128xf32>
    %445 = vector.broadcast %443 : vector<1x128xf32> to vector<8x128xf32>
    %446 = arith.mulf %445, %444 : vector<8x128xf32>
    %447 = vector.extract_strided_slice %422 {offsets = [6, 0], sizes = [1, 128], strides = [1, 1]} : vector<8x128xf32> to vector<1x128xf32>
    %448 = vector.extract_strided_slice %390 {offsets = [48, 0], sizes = [8, 128], strides = [1, 1]} : vector<64x128xf32> to vector<8x128xf32>
    %449 = vector.broadcast %447 : vector<1x128xf32> to vector<8x128xf32>
    %450 = arith.mulf %449, %448 : vector<8x128xf32>
    %451 = vector.extract_strided_slice %422 {offsets = [7, 0], sizes = [1, 128], strides = [1, 1]} : vector<8x128xf32> to vector<1x128xf32>
    %452 = vector.extract_strided_slice %390 {offsets = [56, 0], sizes = [8, 128], strides = [1, 1]} : vector<64x128xf32> to vector<8x128xf32>
    %453 = vector.broadcast %451 : vector<1x128xf32> to vector<8x128xf32>
    %454 = arith.mulf %453, %452 : vector<8x128xf32>
    %455 = arith.addf %426, %430 : vector<8x128xf32>
    %456 = arith.addf %434, %438 : vector<8x128xf32>
    %457 = arith.addf %442, %446 : vector<8x128xf32>
    %458 = arith.addf %450, %454 : vector<8x128xf32>
    %459 = arith.addf %455, %456 : vector<8x128xf32>
    %460 = arith.addf %457, %458 : vector<8x128xf32>
    %461 = arith.addf %459, %460 : vector<8x128xf32>
    %462 = math.tanh %461 : vector<8x128xf32>
    %c4_i32 = arith.constant 4 : i32
    %463 = arith.addi %8, %c4_i32 : i32
    %464 = vector.broadcast %463 : i32 to vector<1x128xi32>
    %465 = arith.cmpi sgt, %3, %464 : vector<1x128xi32>
    %466 = vector.shape_cast %465 : vector<1x128xi1> to vector<1x128xi1>
    %467 = vector.broadcast %466 : vector<1x128xi1> to vector<8x128xi1>
    %468 = arith.select %467, %462, %381 : vector<8x128xi1>, vector<8x128xf32>
    %c4 = arith.constant 4 : index
    %c0_26 = arith.constant 0 : index
    %c0_27 = arith.constant 0 : index
    %469 = vector.load %arg8[%c4, %c0_26, %c0_27] : memref<8x8x128xf32, #tpu.memory_space<vmem>>, vector<1x8x128xf32>
    %470 = vector.shape_cast %469 : vector<1x8x128xf32> to vector<8x128xf32>
    %471 = vector.shape_cast %468 : vector<8x128xf32> to vector<1x8x128xf32>
    tpu.vector_store %arg8[%c4, %c0_26, %c0_27], %471 {strides = array<i32>} : memref<8x8x128xf32, #tpu.memory_space<vmem>>, vector<1x8x128xf32>,
    %472 = vector.extract_strided_slice %6 {offsets = [5, 0], sizes = [1, 128], strides = [1, 1]} : vector<8x128xi32> to vector<1x128xi32>
    %473 = vector.broadcast %472 : vector<1x128xi32> to vector<128x128xi32>
    %474 = arith.cmpi eq, %36, %473 : vector<128x128xi32>
    %475 = arith.extui %474 : vector<128x128xi1> to vector<128x128xi32>
    %476 = arith.sitofp %475 : vector<128x128xi32> to vector<128x128xf32>
    %cst_28 = arith.constant dense<0.000000e+00> : vector<64x128xf32>
    %477 = tpu.matmul %5, %476, %cst_28 {dimension_numbers = #tpu.dot_dimension_numbers<[1], [0], [0], [1], [0, 0, 1, 1], [], []>} : vector<64x128xf32>, vector<128x128xf32>, vector<64x128xf32> -> vector<64x128xf32>
    %478 = vector.extract_strided_slice %468 {offsets = [0, 0], sizes = [1, 128], strides = [1, 1]} : vector<8x128xf32> to vector<1x128xf32>
    %479 = vector.broadcast %478 : vector<1x128xf32> to vector<8x128xf32>
    %480 = arith.mulf %11, %479 : vector<8x128xf32>
    %481 = vector.extract_strided_slice %468 {offsets = [1, 0], sizes = [1, 128], strides = [1, 1]} : vector<8x128xf32> to vector<1x128xf32>
    %482 = vector.broadcast %481 : vector<1x128xf32> to vector<8x128xf32>
    %483 = arith.mulf %14, %482 : vector<8x128xf32>
    %484 = vector.extract_strided_slice %468 {offsets = [2, 0], sizes = [1, 128], strides = [1, 1]} : vector<8x128xf32> to vector<1x128xf32>
    %485 = vector.broadcast %484 : vector<1x128xf32> to vector<8x128xf32>
    %486 = arith.mulf %17, %485 : vector<8x128xf32>
    %487 = vector.extract_strided_slice %468 {offsets = [3, 0], sizes = [1, 128], strides = [1, 1]} : vector<8x128xf32> to vector<1x128xf32>
    %488 = vector.broadcast %487 : vector<1x128xf32> to vector<8x128xf32>
    %489 = arith.mulf %20, %488 : vector<8x128xf32>
    %490 = vector.extract_strided_slice %468 {offsets = [4, 0], sizes = [1, 128], strides = [1, 1]} : vector<8x128xf32> to vector<1x128xf32>
    %491 = vector.broadcast %490 : vector<1x128xf32> to vector<8x128xf32>
    %492 = arith.mulf %23, %491 : vector<8x128xf32>
    %493 = vector.extract_strided_slice %468 {offsets = [5, 0], sizes = [1, 128], strides = [1, 1]} : vector<8x128xf32> to vector<1x128xf32>
    %494 = vector.broadcast %493 : vector<1x128xf32> to vector<8x128xf32>
    %495 = arith.mulf %26, %494 : vector<8x128xf32>
    %496 = vector.extract_strided_slice %468 {offsets = [6, 0], sizes = [1, 128], strides = [1, 1]} : vector<8x128xf32> to vector<1x128xf32>
    %497 = vector.broadcast %496 : vector<1x128xf32> to vector<8x128xf32>
    %498 = arith.mulf %29, %497 : vector<8x128xf32>
    %499 = vector.extract_strided_slice %468 {offsets = [7, 0], sizes = [1, 128], strides = [1, 1]} : vector<8x128xf32> to vector<1x128xf32>
    %500 = vector.broadcast %499 : vector<1x128xf32> to vector<8x128xf32>
    %501 = arith.mulf %32, %500 : vector<8x128xf32>
    %502 = arith.addf %480, %483 : vector<8x128xf32>
    %503 = arith.addf %486, %489 : vector<8x128xf32>
    %504 = arith.addf %492, %495 : vector<8x128xf32>
    %505 = arith.addf %498, %501 : vector<8x128xf32>
    %506 = arith.addf %502, %503 : vector<8x128xf32>
    %507 = arith.addf %504, %505 : vector<8x128xf32>
    %508 = arith.addf %506, %507 : vector<8x128xf32>
    %509 = arith.addf %508, %35 : vector<8x128xf32>
    %510 = vector.extract_strided_slice %509 {offsets = [0, 0], sizes = [1, 128], strides = [1, 1]} : vector<8x128xf32> to vector<1x128xf32>
    %511 = vector.extract_strided_slice %477 {offsets = [0, 0], sizes = [8, 128], strides = [1, 1]} : vector<64x128xf32> to vector<8x128xf32>
    %512 = vector.broadcast %510 : vector<1x128xf32> to vector<8x128xf32>
    %513 = arith.mulf %512, %511 : vector<8x128xf32>
    %514 = vector.extract_strided_slice %509 {offsets = [1, 0], sizes = [1, 128], strides = [1, 1]} : vector<8x128xf32> to vector<1x128xf32>
    %515 = vector.extract_strided_slice %477 {offsets = [8, 0], sizes = [8, 128], strides = [1, 1]} : vector<64x128xf32> to vector<8x128xf32>
    %516 = vector.broadcast %514 : vector<1x128xf32> to vector<8x128xf32>
    %517 = arith.mulf %516, %515 : vector<8x128xf32>
    %518 = vector.extract_strided_slice %509 {offsets = [2, 0], sizes = [1, 128], strides = [1, 1]} : vector<8x128xf32> to vector<1x128xf32>
    %519 = vector.extract_strided_slice %477 {offsets = [16, 0], sizes = [8, 128], strides = [1, 1]} : vector<64x128xf32> to vector<8x128xf32>
    %520 = vector.broadcast %518 : vector<1x128xf32> to vector<8x128xf32>
    %521 = arith.mulf %520, %519 : vector<8x128xf32>
    %522 = vector.extract_strided_slice %509 {offsets = [3, 0], sizes = [1, 128], strides = [1, 1]} : vector<8x128xf32> to vector<1x128xf32>
    %523 = vector.extract_strided_slice %477 {offsets = [24, 0], sizes = [8, 128], strides = [1, 1]} : vector<64x128xf32> to vector<8x128xf32>
    %524 = vector.broadcast %522 : vector<1x128xf32> to vector<8x128xf32>
    %525 = arith.mulf %524, %523 : vector<8x128xf32>
    %526 = vector.extract_strided_slice %509 {offsets = [4, 0], sizes = [1, 128], strides = [1, 1]} : vector<8x128xf32> to vector<1x128xf32>
    %527 = vector.extract_strided_slice %477 {offsets = [32, 0], sizes = [8, 128], strides = [1, 1]} : vector<64x128xf32> to vector<8x128xf32>
    %528 = vector.broadcast %526 : vector<1x128xf32> to vector<8x128xf32>
    %529 = arith.mulf %528, %527 : vector<8x128xf32>
    %530 = vector.extract_strided_slice %509 {offsets = [5, 0], sizes = [1, 128], strides = [1, 1]} : vector<8x128xf32> to vector<1x128xf32>
    %531 = vector.extract_strided_slice %477 {offsets = [40, 0], sizes = [8, 128], strides = [1, 1]} : vector<64x128xf32> to vector<8x128xf32>
    %532 = vector.broadcast %530 : vector<1x128xf32> to vector<8x128xf32>
    %533 = arith.mulf %532, %531 : vector<8x128xf32>
    %534 = vector.extract_strided_slice %509 {offsets = [6, 0], sizes = [1, 128], strides = [1, 1]} : vector<8x128xf32> to vector<1x128xf32>
    %535 = vector.extract_strided_slice %477 {offsets = [48, 0], sizes = [8, 128], strides = [1, 1]} : vector<64x128xf32> to vector<8x128xf32>
    %536 = vector.broadcast %534 : vector<1x128xf32> to vector<8x128xf32>
    %537 = arith.mulf %536, %535 : vector<8x128xf32>
    %538 = vector.extract_strided_slice %509 {offsets = [7, 0], sizes = [1, 128], strides = [1, 1]} : vector<8x128xf32> to vector<1x128xf32>
    %539 = vector.extract_strided_slice %477 {offsets = [56, 0], sizes = [8, 128], strides = [1, 1]} : vector<64x128xf32> to vector<8x128xf32>
    %540 = vector.broadcast %538 : vector<1x128xf32> to vector<8x128xf32>
    %541 = arith.mulf %540, %539 : vector<8x128xf32>
    %542 = arith.addf %513, %517 : vector<8x128xf32>
    %543 = arith.addf %521, %525 : vector<8x128xf32>
    %544 = arith.addf %529, %533 : vector<8x128xf32>
    %545 = arith.addf %537, %541 : vector<8x128xf32>
    %546 = arith.addf %542, %543 : vector<8x128xf32>
    %547 = arith.addf %544, %545 : vector<8x128xf32>
    %548 = arith.addf %546, %547 : vector<8x128xf32>
    %549 = math.tanh %548 : vector<8x128xf32>
    %c5_i32 = arith.constant 5 : i32
    %550 = arith.addi %8, %c5_i32 : i32
    %551 = vector.broadcast %550 : i32 to vector<1x128xi32>
    %552 = arith.cmpi sgt, %3, %551 : vector<1x128xi32>
    %553 = vector.shape_cast %552 : vector<1x128xi1> to vector<1x128xi1>
    %554 = vector.broadcast %553 : vector<1x128xi1> to vector<8x128xi1>
    %555 = arith.select %554, %549, %468 : vector<8x128xi1>, vector<8x128xf32>
    %c5 = arith.constant 5 : index
    %c0_29 = arith.constant 0 : index
    %c0_30 = arith.constant 0 : index
    %556 = vector.load %arg8[%c5, %c0_29, %c0_30] : memref<8x8x128xf32, #tpu.memory_space<vmem>>, vector<1x8x128xf32>
    %557 = vector.shape_cast %556 : vector<1x8x128xf32> to vector<8x128xf32>
    %558 = vector.shape_cast %555 : vector<8x128xf32> to vector<1x8x128xf32>
    tpu.vector_store %arg8[%c5, %c0_29, %c0_30], %558 {strides = array<i32>} : memref<8x8x128xf32, #tpu.memory_space<vmem>>, vector<1x8x128xf32>,
    %559 = vector.extract_strided_slice %6 {offsets = [6, 0], sizes = [1, 128], strides = [1, 1]} : vector<8x128xi32> to vector<1x128xi32>
    %560 = vector.broadcast %559 : vector<1x128xi32> to vector<128x128xi32>
    %561 = arith.cmpi eq, %36, %560 : vector<128x128xi32>
    %562 = arith.extui %561 : vector<128x128xi1> to vector<128x128xi32>
    %563 = arith.sitofp %562 : vector<128x128xi32> to vector<128x128xf32>
    %cst_31 = arith.constant dense<0.000000e+00> : vector<64x128xf32>
    %564 = tpu.matmul %5, %563, %cst_31 {dimension_numbers = #tpu.dot_dimension_numbers<[1], [0], [0], [1], [0, 0, 1, 1], [], []>} : vector<64x128xf32>, vector<128x128xf32>, vector<64x128xf32> -> vector<64x128xf32>
    %565 = vector.extract_strided_slice %555 {offsets = [0, 0], sizes = [1, 128], strides = [1, 1]} : vector<8x128xf32> to vector<1x128xf32>
    %566 = vector.broadcast %565 : vector<1x128xf32> to vector<8x128xf32>
    %567 = arith.mulf %11, %566 : vector<8x128xf32>
    %568 = vector.extract_strided_slice %555 {offsets = [1, 0], sizes = [1, 128], strides = [1, 1]} : vector<8x128xf32> to vector<1x128xf32>
    %569 = vector.broadcast %568 : vector<1x128xf32> to vector<8x128xf32>
    %570 = arith.mulf %14, %569 : vector<8x128xf32>
    %571 = vector.extract_strided_slice %555 {offsets = [2, 0], sizes = [1, 128], strides = [1, 1]} : vector<8x128xf32> to vector<1x128xf32>
    %572 = vector.broadcast %571 : vector<1x128xf32> to vector<8x128xf32>
    %573 = arith.mulf %17, %572 : vector<8x128xf32>
    %574 = vector.extract_strided_slice %555 {offsets = [3, 0], sizes = [1, 128], strides = [1, 1]} : vector<8x128xf32> to vector<1x128xf32>
    %575 = vector.broadcast %574 : vector<1x128xf32> to vector<8x128xf32>
    %576 = arith.mulf %20, %575 : vector<8x128xf32>
    %577 = vector.extract_strided_slice %555 {offsets = [4, 0], sizes = [1, 128], strides = [1, 1]} : vector<8x128xf32> to vector<1x128xf32>
    %578 = vector.broadcast %577 : vector<1x128xf32> to vector<8x128xf32>
    %579 = arith.mulf %23, %578 : vector<8x128xf32>
    %580 = vector.extract_strided_slice %555 {offsets = [5, 0], sizes = [1, 128], strides = [1, 1]} : vector<8x128xf32> to vector<1x128xf32>
    %581 = vector.broadcast %580 : vector<1x128xf32> to vector<8x128xf32>
    %582 = arith.mulf %26, %581 : vector<8x128xf32>
    %583 = vector.extract_strided_slice %555 {offsets = [6, 0], sizes = [1, 128], strides = [1, 1]} : vector<8x128xf32> to vector<1x128xf32>
    %584 = vector.broadcast %583 : vector<1x128xf32> to vector<8x128xf32>
    %585 = arith.mulf %29, %584 : vector<8x128xf32>
    %586 = vector.extract_strided_slice %555 {offsets = [7, 0], sizes = [1, 128], strides = [1, 1]} : vector<8x128xf32> to vector<1x128xf32>
    %587 = vector.broadcast %586 : vector<1x128xf32> to vector<8x128xf32>
    %588 = arith.mulf %32, %587 : vector<8x128xf32>
    %589 = arith.addf %567, %570 : vector<8x128xf32>
    %590 = arith.addf %573, %576 : vector<8x128xf32>
    %591 = arith.addf %579, %582 : vector<8x128xf32>
    %592 = arith.addf %585, %588 : vector<8x128xf32>
    %593 = arith.addf %589, %590 : vector<8x128xf32>
    %594 = arith.addf %591, %592 : vector<8x128xf32>
    %595 = arith.addf %593, %594 : vector<8x128xf32>
    %596 = arith.addf %595, %35 : vector<8x128xf32>
    %597 = vector.extract_strided_slice %596 {offsets = [0, 0], sizes = [1, 128], strides = [1, 1]} : vector<8x128xf32> to vector<1x128xf32>
    %598 = vector.extract_strided_slice %564 {offsets = [0, 0], sizes = [8, 128], strides = [1, 1]} : vector<64x128xf32> to vector<8x128xf32>
    %599 = vector.broadcast %597 : vector<1x128xf32> to vector<8x128xf32>
    %600 = arith.mulf %599, %598 : vector<8x128xf32>
    %601 = vector.extract_strided_slice %596 {offsets = [1, 0], sizes = [1, 128], strides = [1, 1]} : vector<8x128xf32> to vector<1x128xf32>
    %602 = vector.extract_strided_slice %564 {offsets = [8, 0], sizes = [8, 128], strides = [1, 1]} : vector<64x128xf32> to vector<8x128xf32>
    %603 = vector.broadcast %601 : vector<1x128xf32> to vector<8x128xf32>
    %604 = arith.mulf %603, %602 : vector<8x128xf32>
    %605 = vector.extract_strided_slice %596 {offsets = [2, 0], sizes = [1, 128], strides = [1, 1]} : vector<8x128xf32> to vector<1x128xf32>
    %606 = vector.extract_strided_slice %564 {offsets = [16, 0], sizes = [8, 128], strides = [1, 1]} : vector<64x128xf32> to vector<8x128xf32>
    %607 = vector.broadcast %605 : vector<1x128xf32> to vector<8x128xf32>
    %608 = arith.mulf %607, %606 : vector<8x128xf32>
    %609 = vector.extract_strided_slice %596 {offsets = [3, 0], sizes = [1, 128], strides = [1, 1]} : vector<8x128xf32> to vector<1x128xf32>
    %610 = vector.extract_strided_slice %564 {offsets = [24, 0], sizes = [8, 128], strides = [1, 1]} : vector<64x128xf32> to vector<8x128xf32>
    %611 = vector.broadcast %609 : vector<1x128xf32> to vector<8x128xf32>
    %612 = arith.mulf %611, %610 : vector<8x128xf32>
    %613 = vector.extract_strided_slice %596 {offsets = [4, 0], sizes = [1, 128], strides = [1, 1]} : vector<8x128xf32> to vector<1x128xf32>
    %614 = vector.extract_strided_slice %564 {offsets = [32, 0], sizes = [8, 128], strides = [1, 1]} : vector<64x128xf32> to vector<8x128xf32>
    %615 = vector.broadcast %613 : vector<1x128xf32> to vector<8x128xf32>
    %616 = arith.mulf %615, %614 : vector<8x128xf32>
    %617 = vector.extract_strided_slice %596 {offsets = [5, 0], sizes = [1, 128], strides = [1, 1]} : vector<8x128xf32> to vector<1x128xf32>
    %618 = vector.extract_strided_slice %564 {offsets = [40, 0], sizes = [8, 128], strides = [1, 1]} : vector<64x128xf32> to vector<8x128xf32>
    %619 = vector.broadcast %617 : vector<1x128xf32> to vector<8x128xf32>
    %620 = arith.mulf %619, %618 : vector<8x128xf32>
    %621 = vector.extract_strided_slice %596 {offsets = [6, 0], sizes = [1, 128], strides = [1, 1]} : vector<8x128xf32> to vector<1x128xf32>
    %622 = vector.extract_strided_slice %564 {offsets = [48, 0], sizes = [8, 128], strides = [1, 1]} : vector<64x128xf32> to vector<8x128xf32>
    %623 = vector.broadcast %621 : vector<1x128xf32> to vector<8x128xf32>
    %624 = arith.mulf %623, %622 : vector<8x128xf32>
    %625 = vector.extract_strided_slice %596 {offsets = [7, 0], sizes = [1, 128], strides = [1, 1]} : vector<8x128xf32> to vector<1x128xf32>
    %626 = vector.extract_strided_slice %564 {offsets = [56, 0], sizes = [8, 128], strides = [1, 1]} : vector<64x128xf32> to vector<8x128xf32>
    %627 = vector.broadcast %625 : vector<1x128xf32> to vector<8x128xf32>
    %628 = arith.mulf %627, %626 : vector<8x128xf32>
    %629 = arith.addf %600, %604 : vector<8x128xf32>
    %630 = arith.addf %608, %612 : vector<8x128xf32>
    %631 = arith.addf %616, %620 : vector<8x128xf32>
    %632 = arith.addf %624, %628 : vector<8x128xf32>
    %633 = arith.addf %629, %630 : vector<8x128xf32>
    %634 = arith.addf %631, %632 : vector<8x128xf32>
    %635 = arith.addf %633, %634 : vector<8x128xf32>
    %636 = math.tanh %635 : vector<8x128xf32>
    %c6_i32 = arith.constant 6 : i32
    %637 = arith.addi %8, %c6_i32 : i32
    %638 = vector.broadcast %637 : i32 to vector<1x128xi32>
    %639 = arith.cmpi sgt, %3, %638 : vector<1x128xi32>
    %640 = vector.shape_cast %639 : vector<1x128xi1> to vector<1x128xi1>
    %641 = vector.broadcast %640 : vector<1x128xi1> to vector<8x128xi1>
    %642 = arith.select %641, %636, %555 : vector<8x128xi1>, vector<8x128xf32>
    %c6 = arith.constant 6 : index
    %c0_32 = arith.constant 0 : index
    %c0_33 = arith.constant 0 : index
    %643 = vector.load %arg8[%c6, %c0_32, %c0_33] : memref<8x8x128xf32, #tpu.memory_space<vmem>>, vector<1x8x128xf32>
    %644 = vector.shape_cast %643 : vector<1x8x128xf32> to vector<8x128xf32>
    %645 = vector.shape_cast %642 : vector<8x128xf32> to vector<1x8x128xf32>
    tpu.vector_store %arg8[%c6, %c0_32, %c0_33], %645 {strides = array<i32>} : memref<8x8x128xf32, #tpu.memory_space<vmem>>, vector<1x8x128xf32>,
    %646 = vector.extract_strided_slice %6 {offsets = [7, 0], sizes = [1, 128], strides = [1, 1]} : vector<8x128xi32> to vector<1x128xi32>
    %647 = vector.broadcast %646 : vector<1x128xi32> to vector<128x128xi32>
    %648 = arith.cmpi eq, %36, %647 : vector<128x128xi32>
    %649 = arith.extui %648 : vector<128x128xi1> to vector<128x128xi32>
    %650 = arith.sitofp %649 : vector<128x128xi32> to vector<128x128xf32>
    %cst_34 = arith.constant dense<0.000000e+00> : vector<64x128xf32>
    %651 = tpu.matmul %5, %650, %cst_34 {dimension_numbers = #tpu.dot_dimension_numbers<[1], [0], [0], [1], [0, 0, 1, 1], [], []>} : vector<64x128xf32>, vector<128x128xf32>, vector<64x128xf32> -> vector<64x128xf32>
    %652 = vector.extract_strided_slice %642 {offsets = [0, 0], sizes = [1, 128], strides = [1, 1]} : vector<8x128xf32> to vector<1x128xf32>
    %653 = vector.broadcast %652 : vector<1x128xf32> to vector<8x128xf32>
    %654 = arith.mulf %11, %653 : vector<8x128xf32>
    %655 = vector.extract_strided_slice %642 {offsets = [1, 0], sizes = [1, 128], strides = [1, 1]} : vector<8x128xf32> to vector<1x128xf32>
    %656 = vector.broadcast %655 : vector<1x128xf32> to vector<8x128xf32>
    %657 = arith.mulf %14, %656 : vector<8x128xf32>
    %658 = vector.extract_strided_slice %642 {offsets = [2, 0], sizes = [1, 128], strides = [1, 1]} : vector<8x128xf32> to vector<1x128xf32>
    %659 = vector.broadcast %658 : vector<1x128xf32> to vector<8x128xf32>
    %660 = arith.mulf %17, %659 : vector<8x128xf32>
    %661 = vector.extract_strided_slice %642 {offsets = [3, 0], sizes = [1, 128], strides = [1, 1]} : vector<8x128xf32> to vector<1x128xf32>
    %662 = vector.broadcast %661 : vector<1x128xf32> to vector<8x128xf32>
    %663 = arith.mulf %20, %662 : vector<8x128xf32>
    %664 = vector.extract_strided_slice %642 {offsets = [4, 0], sizes = [1, 128], strides = [1, 1]} : vector<8x128xf32> to vector<1x128xf32>
    %665 = vector.broadcast %664 : vector<1x128xf32> to vector<8x128xf32>
    %666 = arith.mulf %23, %665 : vector<8x128xf32>
    %667 = vector.extract_strided_slice %642 {offsets = [5, 0], sizes = [1, 128], strides = [1, 1]} : vector<8x128xf32> to vector<1x128xf32>
    %668 = vector.broadcast %667 : vector<1x128xf32> to vector<8x128xf32>
    %669 = arith.mulf %26, %668 : vector<8x128xf32>
    %670 = vector.extract_strided_slice %642 {offsets = [6, 0], sizes = [1, 128], strides = [1, 1]} : vector<8x128xf32> to vector<1x128xf32>
    %671 = vector.broadcast %670 : vector<1x128xf32> to vector<8x128xf32>
    %672 = arith.mulf %29, %671 : vector<8x128xf32>
    %673 = vector.extract_strided_slice %642 {offsets = [7, 0], sizes = [1, 128], strides = [1, 1]} : vector<8x128xf32> to vector<1x128xf32>
    %674 = vector.broadcast %673 : vector<1x128xf32> to vector<8x128xf32>
    %675 = arith.mulf %32, %674 : vector<8x128xf32>
    %676 = arith.addf %654, %657 : vector<8x128xf32>
    %677 = arith.addf %660, %663 : vector<8x128xf32>
    %678 = arith.addf %666, %669 : vector<8x128xf32>
    %679 = arith.addf %672, %675 : vector<8x128xf32>
    %680 = arith.addf %676, %677 : vector<8x128xf32>
    %681 = arith.addf %678, %679 : vector<8x128xf32>
    %682 = arith.addf %680, %681 : vector<8x128xf32>
    %683 = arith.addf %682, %35 : vector<8x128xf32>
    %684 = vector.extract_strided_slice %683 {offsets = [0, 0], sizes = [1, 128], strides = [1, 1]} : vector<8x128xf32> to vector<1x128xf32>
    %685 = vector.extract_strided_slice %651 {offsets = [0, 0], sizes = [8, 128], strides = [1, 1]} : vector<64x128xf32> to vector<8x128xf32>
    %686 = vector.broadcast %684 : vector<1x128xf32> to vector<8x128xf32>
    %687 = arith.mulf %686, %685 : vector<8x128xf32>
    %688 = vector.extract_strided_slice %683 {offsets = [1, 0], sizes = [1, 128], strides = [1, 1]} : vector<8x128xf32> to vector<1x128xf32>
    %689 = vector.extract_strided_slice %651 {offsets = [8, 0], sizes = [8, 128], strides = [1, 1]} : vector<64x128xf32> to vector<8x128xf32>
    %690 = vector.broadcast %688 : vector<1x128xf32> to vector<8x128xf32>
    %691 = arith.mulf %690, %689 : vector<8x128xf32>
    %692 = vector.extract_strided_slice %683 {offsets = [2, 0], sizes = [1, 128], strides = [1, 1]} : vector<8x128xf32> to vector<1x128xf32>
    %693 = vector.extract_strided_slice %651 {offsets = [16, 0], sizes = [8, 128], strides = [1, 1]} : vector<64x128xf32> to vector<8x128xf32>
    %694 = vector.broadcast %692 : vector<1x128xf32> to vector<8x128xf32>
    %695 = arith.mulf %694, %693 : vector<8x128xf32>
    %696 = vector.extract_strided_slice %683 {offsets = [3, 0], sizes = [1, 128], strides = [1, 1]} : vector<8x128xf32> to vector<1x128xf32>
    %697 = vector.extract_strided_slice %651 {offsets = [24, 0], sizes = [8, 128], strides = [1, 1]} : vector<64x128xf32> to vector<8x128xf32>
    %698 = vector.broadcast %696 : vector<1x128xf32> to vector<8x128xf32>
    %699 = arith.mulf %698, %697 : vector<8x128xf32>
    %700 = vector.extract_strided_slice %683 {offsets = [4, 0], sizes = [1, 128], strides = [1, 1]} : vector<8x128xf32> to vector<1x128xf32>
    %701 = vector.extract_strided_slice %651 {offsets = [32, 0], sizes = [8, 128], strides = [1, 1]} : vector<64x128xf32> to vector<8x128xf32>
    %702 = vector.broadcast %700 : vector<1x128xf32> to vector<8x128xf32>
    %703 = arith.mulf %702, %701 : vector<8x128xf32>
    %704 = vector.extract_strided_slice %683 {offsets = [5, 0], sizes = [1, 128], strides = [1, 1]} : vector<8x128xf32> to vector<1x128xf32>
    %705 = vector.extract_strided_slice %651 {offsets = [40, 0], sizes = [8, 128], strides = [1, 1]} : vector<64x128xf32> to vector<8x128xf32>
    %706 = vector.broadcast %704 : vector<1x128xf32> to vector<8x128xf32>
    %707 = arith.mulf %706, %705 : vector<8x128xf32>
    %708 = vector.extract_strided_slice %683 {offsets = [6, 0], sizes = [1, 128], strides = [1, 1]} : vector<8x128xf32> to vector<1x128xf32>
    %709 = vector.extract_strided_slice %651 {offsets = [48, 0], sizes = [8, 128], strides = [1, 1]} : vector<64x128xf32> to vector<8x128xf32>
    %710 = vector.broadcast %708 : vector<1x128xf32> to vector<8x128xf32>
    %711 = arith.mulf %710, %709 : vector<8x128xf32>
    %712 = vector.extract_strided_slice %683 {offsets = [7, 0], sizes = [1, 128], strides = [1, 1]} : vector<8x128xf32> to vector<1x128xf32>
    %713 = vector.extract_strided_slice %651 {offsets = [56, 0], sizes = [8, 128], strides = [1, 1]} : vector<64x128xf32> to vector<8x128xf32>
    %714 = vector.broadcast %712 : vector<1x128xf32> to vector<8x128xf32>
    %715 = arith.mulf %714, %713 : vector<8x128xf32>
    %716 = arith.addf %687, %691 : vector<8x128xf32>
    %717 = arith.addf %695, %699 : vector<8x128xf32>
    %718 = arith.addf %703, %707 : vector<8x128xf32>
    %719 = arith.addf %711, %715 : vector<8x128xf32>
    %720 = arith.addf %716, %717 : vector<8x128xf32>
    %721 = arith.addf %718, %719 : vector<8x128xf32>
    %722 = arith.addf %720, %721 : vector<8x128xf32>
    %723 = math.tanh %722 : vector<8x128xf32>
    %c7_i32 = arith.constant 7 : i32
    %724 = arith.addi %8, %c7_i32 : i32
    %725 = vector.broadcast %724 : i32 to vector<1x128xi32>
    %726 = arith.cmpi sgt, %3, %725 : vector<1x128xi32>
    %727 = vector.shape_cast %726 : vector<1x128xi1> to vector<1x128xi1>
    %728 = vector.broadcast %727 : vector<1x128xi1> to vector<8x128xi1>
    %729 = arith.select %728, %723, %642 : vector<8x128xi1>, vector<8x128xf32>
    %c7 = arith.constant 7 : index
    %c0_35 = arith.constant 0 : index
    %c0_36 = arith.constant 0 : index
    %730 = vector.load %arg8[%c7, %c0_35, %c0_36] : memref<8x8x128xf32, #tpu.memory_space<vmem>>, vector<1x8x128xf32>
    %731 = vector.shape_cast %730 : vector<1x8x128xf32> to vector<8x128xf32>
    %732 = vector.shape_cast %729 : vector<8x128xf32> to vector<1x8x128xf32>
    tpu.vector_store %arg8[%c7, %c0_35, %c0_36], %732 {strides = array<i32>} : memref<8x8x128xf32, #tpu.memory_space<vmem>>, vector<1x8x128xf32>,
    %c0_37 = arith.constant 0 : index
    %c0_38 = arith.constant 0 : index
    %733 = vector.load %arg9[%c0_37, %c0_38] : memref<8x128xf32, #tpu.memory_space<vmem>>, vector<8x128xf32>
    tpu.vector_store %arg9[%c0_37, %c0_38], %729 {strides = array<i32>} : memref<8x128xf32, #tpu.memory_space<vmem>>, vector<8x128xf32>,
    return
  }
  func.func @transform_0(%arg0: i32, %arg1: i32) -> (i32, i32) {
    %c0_i32 = arith.constant 0 : i32
    %c0_i32_0 = arith.constant 0 : i32
    return %c0_i32, %arg0 : i32, i32
  }
  func.func @transform_1(%arg0: i32, %arg1: i32) -> (i32, i32) {
    %c0_i32 = arith.constant 0 : i32
    %c0_i32_0 = arith.constant 0 : i32
    return %c0_i32, %arg0 : i32, i32
  }
  func.func @transform_2(%arg0: i32, %arg1: i32) -> (i32, i32) {
    %c0_i32 = arith.constant 0 : i32
    %c0_i32_0 = arith.constant 0 : i32
    %c0_i32_1 = arith.constant 0 : i32
    return %c0_i32, %c0_i32_0 : i32, i32
  }
  func.func @transform_3(%arg0: i32, %arg1: i32) -> (i32, i32) {
    %c0_i32 = arith.constant 0 : i32
    %c0_i32_0 = arith.constant 0 : i32
    %c0_i32_1 = arith.constant 0 : i32
    return %c0_i32, %c0_i32_0 : i32, i32
  }
  func.func @transform_4(%arg0: i32, %arg1: i32) -> (i32, i32) {
    %c0_i32 = arith.constant 0 : i32
    %c0_i32_0 = arith.constant 0 : i32
    %c0_i32_1 = arith.constant 0 : i32
    return %c0_i32, %c0_i32_0 : i32, i32
  }
  func.func @transform_5(%arg0: i32, %arg1: i32) -> (i32, i32) {
    %c0_i32 = arith.constant 0 : i32
    return %arg1, %arg0 : i32, i32
  }
  func.func @transform_6(%arg0: i32, %arg1: i32) -> (i32, i32, i32) {
    %c0_i32 = arith.constant 0 : i32
    %c0_i32_0 = arith.constant 0 : i32
    return %arg1, %c0_i32, %arg0 : i32, i32, i32
  }
}

</mosaic_0001>

<bundles_post_ra>
// kernel: tpu_custom_call.1
= control target key start
LH: loop header
LB: loop body
LE: loop exit
PB: predicated region body
PF: predicated region fallthrough
CT: control target
= control target key end

     0   :  { %11 = vsyncpa [#allocation4], 0  ;;  %s5001_s0 = inlined_call_operand.hbm [shape: s32[1,128], index: 0, kind: input, shape index: {}]   ;;  %s5002_s1 = inlined_call_operand.vmem [shape: f32[8,128], index: 1, kind: input, shape index: {}]   ;;  %s5003_s2 = inlined_call_operand.vmem [shape: f32[8,8], index: 2, kind: input, shape index: {}]   ;;  %s5004_s3 = inlined_call_operand.vmem [shape: f32[8,1], index: 3, kind: input, shape index: {}]   ;;  %s5005_s4 = inlined_call_operand.hbm [shape: f32[64,128], index: 4, kind: input, shape index: {}]   ;;  %s5006_s5 = inlined_call_operand.vmem [shape: s32[8,128], index: 5, kind: input, shape index: {}]   ;;  %s5007_s6 = inlined_call_operand.hbm [shape: f32[8,8,128], index: 6, kind: output, shape index: {}]  }
   0x1   :  { %12 = vsyncpa [#allocation7], 0 }
   0x2   :  { %13 = vsyncpa [#allocation5], 0  ;;  %s3429_s21 = smov [#allocation3]   ;;  %s3430_s23 = smov [#allocation6]  }
   0x3   :  { %s20_s22 = sshll.u32 %s3429_s21, 4  ;;  %s35_s24 = sshll.u32 %s3430_s23, 4  ;;  %s21_s22 = int_to_ptr.vmem [resolvable:$true] %s20_s22  ;;  %s3478_s24 = int_to_ptr.vmem [resolvable:$true] %s35_s24 }
   0x4   :  { %s3357_s27 = scalar_lea.hbm %s5001_s0, 16 }
   0x5   :  { %p3358_p0 = scmp.ne.s32.totalorder %s5001_s0, %s3357_s27  ;;  %p3361_p1 = scmp.lt.u32.totalorder %s3357_s27, %s5001_s0 }
   0x7   :  { %p3363_p2 = pnand %p3361_p1, %p3358_p0 }
   0x9   :  { %3366 = shalt.err (!%p3363_p2)
}
   0xa   :  { %s3367_s8 = scalar_lea.vmem %s21_s22, 16  ;;  %s3371_s9 = scalar_lea.vmem %s21_s22, 32 }
   0xb   :  { %p3368_p3 = scmp.ne.s32.totalorder %s21_s22, %s3367_s8  ;;  %p3372_p4 = scmp.lt.s32.totalorder %s21_s22, %s21_s22 }
   0xc   :  { %p3373_p5 = scmp.lt.s32.totalorder %s3371_s9, %s3367_s8 }
   0xe   :  { %p3374_p6 = por %p3373_p5, %p3372_p4 }
  0x10   :  { %p3375_p7 = pnand %p3374_p6, %p3368_p3 }
  0x12   :  { %3378 = shalt.err (!%p3375_p7)
}
  0x13   :  { %23 = dma.hbm_to_vmem [thread:$0]  %s5001_s0, 16, %s21_s22, [#allocation4]  }
  0x14   :  { %s3379_s14 = scalar_lea.hbm %s5005_s4, 1024 }
  0x15   :  { %p3380_p8 = scmp.ne.s32.totalorder %s5005_s4, %s3379_s14  ;;  %p3383_p9 = scmp.lt.u32.totalorder %s3379_s14, %s5005_s4 }
  0x17   :  { %p3385_p10 = pnand %p3383_p9, %p3380_p8 }
  0x19   :  { %3388 = shalt.err (!%p3385_p10)
}
  0x1a   :  { %s3389_s19 = scalar_lea.vmem %s3478_s24, 1024  ;;  %p3394_p12 = scmp.lt.s32.totalorder %s3478_s24, %s3478_s24 }
  0x1b   :  { %p3390_p11 = scmp.ne.s32.totalorder %s3478_s24, %s3389_s19  ;;  %p3395_p13 = scmp.lt.s32.totalorder %s3389_s19, %s3389_s19 }
  0x1d   :  { %p3396_p0 = por %p3395_p13, %p3394_p12 }
  0x1f   :  { %p3397_p1 = pnand %p3396_p0, %p3390_p11 }
  0x21   :  { %3400 = shalt.err (!%p3397_p1)
}
  0x22   :  { %s3431_s0 = smov 128   ;;  %s3432_s20 = smov 8  }
  0x23   :  { %41 = dma.hbm_to_vmem [thread:$0]  %s5005_s4, 1024, %s3478_s24, [#allocation7], %s3431_s0, %s3431_s0, %s3432_s20  }
  0x24   :  { %3423 = dma.done.wait [#allocation4], 16  }
  0x25   :  { %3424 = vsyncadd [#allocation4], 4294967280 }
  0x26   :  { %3425 = dma.done.wait [#allocation7], 1024  }
  0x27   :  { %3426 = vsyncadd [#allocation7], 4294966272  ;;  %v108_v0 = vlaneseq  ;;  %v3433_v1 = vmov 2   ;;  %v5011_v3 = vmov 0   ;;  %v3530_v8 = vld [vmem:[%s5006_s5] sm:$0xff]  ;;  %v3436_v23 = vmov 3  }
  0x28   :  { %3334 = vset.pattern.permute.xlu1 %v3433_v1  ;;  %3332 = vset.pattern.permute.xlu0 %v5011_v3  ;;  %v3532_v9 = vld [vmem:[#allocation6] sm:$0xff]  ;;  %v3435_v17 = vmov 1.0|1.0   ;;  %v3437_v27 = vmov 1   ;;  %v3438_v33 = vmov 4   ;;  %v3439_v40 = vmov 6  }
  0x29   :  { %v3512_v2 = vshrl.u32 %v108_v0, 7  ;;  %2742 = vmatprep.mubr.f32.mxu0 %v3532_v9  ;;  %2786 = vmatprep.mubr.f32.mxu1 %v3532_v9  ;;  %v3560_v14 = vld [vmem:[%s5003_s2] sm:$0xff]  ;;  %v3440_v41 = vmov 5   ;;  %v3441_v54 = vmov 7   ;;  %v3877_v58 = vld [vmem:[#allocation6 + $0x8] sm:$0xff]  ;;  %v3893_v60 = vld [vmem:[#allocation6 + $0x10] sm:$0xff] }
  0x2a   :  { %79 = vperm.xlu1 %3334, %v3560_v14   ;;  %71 = vperm.xlu0 %3332, %v3560_v14   ;;  %v102_v48 = vld [vmem:[%s5004_s3] sm:$0xff]  ;;  %v5063_v28 = vmov 0 }
  0x2b   :  { %v3516_v4 = vsub.s32 0, %v3512_v2  ;;  %v3519_v5 = vadd.s32 8, %v3512_v2  ;;  %v3522_v6 = vadd.s32 16, %v3512_v2  ;;  %v3525_v7 = vadd.s32 24, %v3512_v2  ;;  %v3931_v1 = vld [vmem:[#allocation6 + $0x18] sm:$0xff] }
  0x2c   :  { %v3539_v11 = vadd.s32 32, %v3512_v2  ;;  %v3542_v12 = vadd.s32 40, %v3512_v2  ;;  %v3547_v13 = vsub.s32 1, %v3512_v2  ;;  %v3563_v15 = vadd.s32 48, %v3512_v2  ;;  %v4047_v29 = vld [vmem:[#allocation6 + $0x38] sm:$0xff] }
  0x2d   :  { %v3536_v10 = vrot.slane %v3530_v8, %v3516_v4  ;;  %v3566_v16 = vadd.s32 56, %v3512_v2  ;;  %v3596_v21 = vadd.s32 64, %v3512_v2  ;;  %v3599_v22 = vadd.s32 72, %v3512_v2 }
  0x2e   :  { %v3584_v19 = vrot.slane %v3530_v8, %v3547_v13  ;;  %3335 = vset.pattern.permute.xlu1 %v3436_v23  ;;  %v3625_v25 = vadd.s32 80, %v3512_v2  ;;  %v3628_v26 = vadd.s32 88, %v3512_v2  ;;  %3333 = vset.pattern.permute.xlu0 %v3437_v27  ;;  %v3658_v30 = vadd.s32 96, %v3512_v2  ;;  %v4002_v23 = vld [vmem:[#allocation6 + $0x30] sm:$0xff] }
  0x2f   :  { %vm129_vm0 = vcmp.eq.s32.totalorder %v3512_v2, %v3536_v10  ;;  %vm130_vm1 = vcmp.eq.s32.totalorder %v3519_v5, %v3536_v10  ;;  %vm131_vm2 = vcmp.eq.s32.totalorder %v3522_v6, %v3536_v10  ;;  %vm132_vm3 = vcmp.eq.s32.totalorder %v3525_v7, %v3536_v10  ;;  %83 = vperm.xlu1 %3335, %v3560_v14  }
  0x30   :  { %vm3062_vm4 = vmpackc.low %vm130_vm1, %vm129_vm0  ;;  %vm133_vm6 = vcmp.eq.s32.totalorder %v3539_v11, %v3536_v10  ;;  %vm134_vm7 = vcmp.eq.s32.totalorder %v3542_v12, %v3536_v10  ;;  %vm135_vm9 = vcmp.eq.s32.totalorder %v3563_v15, %v3536_v10  ;;  %vm136_vm10 = vcmp.eq.s32.totalorder %v3566_v16, %v3536_v10  ;;  %75 = vperm.xlu0 %3333, %v3560_v14  }
  0x31   :  { %3063 = vmatprep.subr.msk.bf16.mxu0 %vm3062_vm4, %v3435_v17  ;;  %vm3570_vm5 = vmpackc.low %vm132_vm3, %vm131_vm2  ;;  %vm392_vm11 = vcmp.eq.s32.totalorder %v3512_v2, %v3584_v19  ;;  %vm393_vm12 = vcmp.eq.s32.totalorder %v3519_v5, %v3584_v19  ;;  %vm394_vm13 = vcmp.eq.s32.totalorder %v3522_v6, %v3584_v19  ;;  %vm395_vm14 = vcmp.eq.s32.totalorder %v3525_v7, %v3584_v19 }
  0x32   :  { %3065 = vmatpush3.bf16.msk.msra.mxu0 %vm3062_vm4, %v3435_v17  ;;  %vm3587_vm8 = vmpackc.low %vm134_vm7, %vm133_vm6  ;;  %vm137_vm0 = vcmp.eq.s32.totalorder %v3596_v21, %v3536_v10  ;;  %vm138_vm1 = vcmp.eq.s32.totalorder %v3599_v22, %v3536_v10  ;;  %vm396_vm4 = vcmp.eq.s32.totalorder %v3539_v11, %v3584_v19  ;;  %vm139_vm7 = vcmp.eq.s32.totalorder %v3625_v25, %v3536_v10 }
  0x33   :  { %3067 = vmatprep.subr.msk.bf16.mxu0 %vm3570_vm5, %v3435_v17  ;;  %vm3616_vm15 = vmpackc.low %vm136_vm10, %vm135_vm9  ;;  %v3661_v31 = vadd.s32 104, %v3512_v2  ;;  %3336 = vset.pattern.permute.xlu1 %v3438_v33  ;;  %vm398_vm10 = vcmp.eq.s32.totalorder %v3563_v15, %v3584_v19  ;;  %v3690_v35 = vsub.s32 5, %v3512_v2  ;;  %v3697_v36 = vadd.s32 112, %v3512_v2 }
  0x34   :  { %vm3094_vm2 = vmpackc.low %vm393_vm12, %vm392_vm11  ;;  %vm399_vm11 = vcmp.eq.s32.totalorder %v3566_v16, %v3584_v19  ;;  %87 = vperm.xlu1 %3336, %v3560_v14   ;;  %v3700_v37 = vadd.s32 120, %v3512_v2  ;;  %v3711_v39 = vsub.s32 2, %v3512_v2  ;;  %3337 = vset.pattern.permute.xlu0 %v3440_v41  ;;  %v3720_v42 = vsub.s32 4, %v3512_v2 }
  0x35   :  { %3095 = vmatprep.subr.msk.bf16.mxu1 %vm3094_vm2, %v3435_v17  ;;  %vm3631_vm3 = vmpackc.low %vm395_vm14, %vm394_vm13  ;;  %vm141_vm13 = vcmp.eq.s32.totalorder %v3658_v30, %v3536_v10  ;;  %vm142_vm14 = vcmp.eq.s32.totalorder %v3661_v31, %v3536_v10  ;;  %v3723_v43 = vsub.s32 6, %v3512_v2  ;;  %v3743_v45 = vrot.slane %v3530_v8, %v3690_v35  ;;  %91 = vperm.xlu0 %3337, %v3560_v14  }
  0x36   :  { %3069 = vmatpush3.bf16.msk.msra.mxu0 %vm3570_vm5, %v3435_v17  ;;  %vm397_vm5 = vcmp.eq.s32.totalorder %v3542_v12, %v3584_v19  ;;  %3097 = vmatpush3.bf16.msk.msra.mxu1 %vm3094_vm2, %v3435_v17  ;;  %vm3646_vm6 = vmpackc.low %vm138_vm1, %vm137_vm0  ;;  %vm400_vm0 = vcmp.eq.s32.totalorder %v3596_v21, %v3584_v19  ;;  %vm401_vm1 = vcmp.eq.s32.totalorder %v3599_v22, %v3584_v19  ;;  %v3801_v52 = vsub.s32 3, %v3512_v2 }
  0x37   :  { %3071 = vmatprep.subr.msk.bf16.mxu0 %vm3587_vm8, %v3435_v17  ;;  %3099 = vmatprep.subr.msk.bf16.mxu1 %vm3631_vm3, %v3435_v17  ;;  %vm3663_vm9 = vmpackc.low %vm397_vm5, %vm396_vm4  ;;  %vm144_vm4 = vcmp.eq.s32.totalorder %v3700_v37, %v3536_v10  ;;  %v3767_v47 = vrot.slane %v3530_v8, %v3711_v39  ;;  %v3780_v49 = vrot.slane %v3530_v8, %v3720_v42  ;;  %v3928_v0 = vsub.s32 7, %v3512_v2 }
  0x38   :  { %3338 = vset.pattern.permute.xlu1 %v3439_v40  ;;  %vm3734_vm2 = vmpackc.low %vm142_vm14, %vm141_vm13  ;;  %v3784_v50 = vrot.slane %v3530_v8, %v3723_v43  ;;  %v3852_v56 = vrot.slane %v3530_v8, %v3801_v52  ;;  %v5075_v40 = vmov 0  ;;  %v5079_v41 = vmov 0 }
  0x39   :  { %vm3755_vm5 = vmpackc.low %vm401_vm1, %vm400_vm0  ;;  %95 = vperm.xlu1 %3338, %v3560_v14   ;;  %3340 = vset.pattern.permute.xlu0 %v5011_v3  ;;  %vm657_vm0 = vcmp.eq.s32.totalorder %v3512_v2, %v3767_v47  ;;  %vm658_vm1 = vcmp.eq.s32.totalorder %v3519_v5, %v3767_v47  ;;  %vm1189_vm14 = vcmp.eq.s32.totalorder %v3522_v6, %v3780_v49 }
  0x3a   :  { %3073 = vmatpush3.bf16.msk.msra.mxu0 %vm3587_vm8, %v3435_v17  ;;  %vm140_vm8 = vcmp.eq.s32.totalorder %v3628_v26, %v3536_v10  ;;  %3101 = vmatpush3.bf16.msk.msra.mxu1 %vm3631_vm3, %v3435_v17  ;;  %vm143_vm3 = vcmp.eq.s32.totalorder %v3697_v36, %v3536_v10  ;;  %v3940_v10 = vld [vmem:[#allocation6 + $0x20] sm:$0xff]  ;;  %vm929_vm13 = vcmp.eq.s32.totalorder %v3566_v16, %v3852_v56 }
  0x3b   :  { %3075 = vmatprep.subr.msk.bf16.mxu0 %vm3616_vm15, %v3435_v17  ;;  %vm3682_vm12 = vmpackc.low %vm140_vm8, %vm139_vm7  ;;  %3103 = vmatprep.subr.msk.bf16.mxu1 %vm3663_vm9, %v3435_v17  ;;  %vm403_vm7 = vcmp.eq.s32.totalorder %v3628_v26, %v3584_v19 }
  0x3c   :  { %vm3789_vm8 = vmpackc.low %vm144_vm4, %vm143_vm3  ;;  %105 = vperm.xlu0 %3340, %v102_v48   ;;  %vm407_vm4 = vcmp.eq.s32.totalorder %v3700_v37, %v3584_v19 }
  0x3d   :  { %3339 = vset.pattern.permute.xlu1 %v3441_v54 }
  0x3e   :  { %3077 = vmatpush3.bf16.msk.msra.mxu0 %vm3616_vm15, %v3435_v17  ;;  %vm3702_vm15 = vmpackc.low %vm399_vm11, %vm398_vm10  ;;  %3105 = vmatpush3.bf16.msk.msra.mxu1 %vm3663_vm9, %v3435_v17  ;;  %vm404_vm9 = vcmp.eq.s32.totalorder %v3658_v30, %v3584_v19  ;;  %vm405_vm10 = vcmp.eq.s32.totalorder %v3661_v31, %v3584_v19  ;;  %vm5062_vm11 = vcmp.eq.s32.totalorder %v3525_v7, %v3743_v45 }
  0x3f   :  { %3079 = vmatprep.subr.msk.bf16.mxu0 %vm3646_vm6, %v3435_v17  ;;  %3107 = vmatprep.subr.msk.bf16.mxu1 %vm3702_vm15, %v3435_v17  ;;  %vm3842_vm3 = vmpackc.low %vm405_vm10, %vm404_vm9  ;;  %vm1187_vm9 = vcmp.eq.s32.totalorder %v3512_v2, %v3780_v49 }
  0x40   :  { %99 = vperm.xlu1 %3339, %v3560_v14   ;;  %v3954_v14 = vrot.slane %v3530_v8, %v3928_v0 }
  0x42   :  { %3081 = vmatpush3.bf16.msk.msra.mxu0 %vm3646_vm6, %v3435_v17  ;;  %vm402_vm6 = vcmp.eq.s32.totalorder %v3625_v25, %v3584_v19  ;;  %3109 = vmatpush3.bf16.msk.msra.mxu1 %vm3702_vm15, %v3435_v17  ;;  %vm1188_vm15 = vcmp.eq.s32.totalorder %v3519_v5, %v3780_v49 }
  0x43   :  { %3083 = vmatprep.subr.msk.bf16.mxu0 %vm3682_vm12, %v3435_v17  ;;  %3111 = vmatprep.subr.msk.bf16.mxu1 %vm3755_vm5, %v3435_v17 }
  0x46   :  { %3085 = vmatpush3.bf16.msk.msra.mxu0 %vm3682_vm12, %v3435_v17  ;;  %vm3808_vm12 = vmpackc.low %vm403_vm7, %vm402_vm6  ;;  %3113 = vmatpush3.bf16.msk.msra.mxu1 %vm3755_vm5, %v3435_v17  ;;  %vm659_vm6 = vcmp.eq.s32.totalorder %v3522_v6, %v3767_v47  ;;  %vm660_vm7 = vcmp.eq.s32.totalorder %v3525_v7, %v3767_v47 }
  0x47   :  { %3087 = vmatprep.subr.msk.bf16.mxu0 %vm3734_vm2, %v3435_v17  ;;  %3115 = vmatprep.subr.msk.bf16.mxu1 %vm3808_vm12, %v3435_v17  ;;  %vm3854_vm5 = vmpackc.low %vm658_vm1, %vm657_vm0  ;;  %vm1190_vm1 = vcmp.eq.s32.totalorder %v3525_v7, %v3780_v49 }
  0x48   :  { %vm3923_vm10 = vmpackc.low %vm1190_vm1, %vm1189_vm14  ;;  %vm662_vm14 = vcmp.eq.s32.totalorder %v3542_v12, %v3767_v47 }
  0x4a   :  { %3089 = vmatpush3.bf16.msk.msra.mxu0 %vm3734_vm2, %v3435_v17  ;;  %vm406_vm2 = vcmp.eq.s32.totalorder %v3697_v36, %v3584_v19  ;;  %3117 = vmatpush3.bf16.msk.msra.mxu1 %vm3808_vm12, %v3435_v17  ;;  %vm3914_vm12 = vmpackc.low %vm1188_vm15, %vm1187_vm9  ;;  %vm661_vm15 = vcmp.eq.s32.totalorder %v3539_v11, %v3767_v47  ;;  %vm925_vm9 = vcmp.eq.s32.totalorder %v3525_v7, %v3852_v56  ;;  %v3987_v19 = vld [vmem:[#allocation6 + $0x28] sm:$0xff] }
  0x4b   :  { %3091 = vmatprep.subr.msk.bf16.mxu0 %vm3789_vm8, %v3435_v17  ;;  %vm3885_vm0 = vmpackc.low %vm407_vm4, %vm406_vm2  ;;  %3119 = vmatprep.subr.msk.bf16.mxu1 %vm3842_vm3, %v3435_v17  ;;  %vm922_vm2 = vcmp.eq.s32.totalorder %v3512_v2, %v3852_v56  ;;  %vm923_vm4 = vcmp.eq.s32.totalorder %v3519_v5, %v3852_v56 }
  0x4c   :  { %vm3974_vm1 = vmpackc.low %vm662_vm14, %vm661_vm15  ;;  %vm5057_vm14 = vcmp.eq.s32.totalorder %v3512_v2, %v3743_v45 }
  0x4e   :  { %3093 = vmatpush3.bf16.msk.msra.mxu0 %vm3789_vm8, %v3435_v17  ;;  %vm3907_vm8 = vmpackc.low %vm660_vm7, %vm659_vm6  ;;  %3121 = vmatpush3.bf16.msk.msra.mxu1 %vm3842_vm3, %v3435_v17  ;;  %vm663_vm6 = vcmp.eq.s32.totalorder %v3563_v15, %v3767_v47  ;;  %vm664_vm3 = vcmp.eq.s32.totalorder %v3566_v16, %v3767_v47  ;;  %vm924_vm7 = vcmp.eq.s32.totalorder %v3522_v6, %v3852_v56 }
  0x4f   :  { %3127 = vmatprep.subr.msk.bf16.mxu0 %vm3854_vm5, %v3435_v17  ;;  %3123 = vmatprep.subr.msk.bf16.mxu1 %vm3885_vm0, %v3435_v17  ;;  %vm3998_vm15 = vmpackc.low %vm664_vm3, %vm663_vm6  ;;  %vm665_vm3 = vcmp.eq.s32.totalorder %v3596_v21, %v3767_v47 }
  0x51   :  { %2743 = vmatmul.mubr.f32.vlgmr.msra.gmra.mrb[0].mxu0 %v3877_v58 }
  0x52   :  { %2745 = vmatprep.mubr.f32.mxu0 %v3893_v60  ;;  %3129 = vmatpush3.bf16.msk.msra.mxu0 %vm3854_vm5, %v3435_v17  ;;  %vm3965_vm5 = vmpackc.low %vm923_vm4, %vm922_vm2  ;;  %vm927_vm4 = vcmp.eq.s32.totalorder %v3542_v12, %v3852_v56 }
  0x53   :  { %3131 = vmatprep.subr.msk.bf16.mxu0 %vm3907_vm8, %v3435_v17  ;;  %3125 = vmatpush3.bf16.msk.msra.mxu1 %vm3885_vm0, %v3435_v17  ;;  %vm4013_vm0 = vmpackc.low %vm925_vm9, %vm924_vm7  ;;  %vm666_vm7 = vcmp.eq.s32.totalorder %v3599_v22, %v3767_v47  ;;  %vm5061_vm9 = vcmp.eq.s32.totalorder %v3522_v6, %v3743_v45 }
  0x54   :  { %3159 = vmatprep.subr.msk.bf16.mxu1 %vm3965_vm5, %v3435_v17  ;;  %vm4067_vm2 = vmpackc.low %vm666_vm7, %vm665_vm3  ;;  %vm5073_vm7 = vcmp.eq.s32.totalorder %v3512_v2, %v3784_v50 }
  0x55   :  { %2746 = vmatmul.mubr.f32.gmra.mrb[2].mxu0 %v3931_v1 }
  0x56   :  { %2748 = vmatprep.mubr.f32.mxu0 %v3940_v10  ;;  %3133 = vmatpush3.bf16.msk.msra.mxu0 %vm3907_vm8, %v3435_v17  ;;  %vm5058_vm8 = vcmp.eq.s32.totalorder %v3519_v5, %v3743_v45 }
  0x57   :  { %3135 = vmatprep.subr.msk.bf16.mxu0 %vm3974_vm1, %v3435_v17  ;;  %vm4026_vm6 = vmpackc.low %vm5058_vm8, %vm5057_vm14  ;;  %2787 = vmatmul.mubr.f32.vlgmr.msra.gmra.mrb[0].mxu1 %v3877_v58  ;;  %vm926_vm8 = vcmp.eq.s32.totalorder %v3539_v11, %v3852_v56 }
  0x58   :  { %vm4042_vm14 = vmpackc.low %vm5062_vm11, %vm5061_vm9  ;;  %2789 = vmatprep.mubr.f32.mxu1 %v3893_v60  ;;  %vm667_vm11 = vcmp.eq.s32.totalorder %v3625_v25, %v3767_v47  ;;  %vm668_vm9 = vcmp.eq.s32.totalorder %v3628_v26, %v3767_v47  ;;  %3161 = vmatpush3.bf16.msk.msra.mxu1 %vm3965_vm5, %v3435_v17 }
  0x59   :  { %2749 = vmatmul.mubr.f32.gmra.mrb[4].mxu0 %v3987_v19  ;;  %v5064_v28 = vsel %vm4042_vm14, 4294967295, %v5063_v28  ;;  %3163 = vmatprep.subr.msk.bf16.mxu1 %vm4013_vm0, %v3435_v17  ;;  %vm4080_vm5 = vmpackc.low %vm927_vm4, %vm926_vm8 }
  0x5a   :  { %2751 = vmatprep.mubr.f32.mxu0 %v4002_v23  ;;  %3137 = vmatpush3.bf16.msk.msra.mxu0 %vm3974_vm1, %v3435_v17  ;;  %vm928_vm1 = vcmp.eq.s32.totalorder %v3563_v15, %v3852_v56  ;;  %vm4085_vm3 = vmpackc.low %vm668_vm9, %vm667_vm11  ;;  %vm5077_vm11 = vcmp.eq.s32.totalorder %v3522_v6, %v3784_v50  ;;  %vm5078_vm9 = vcmp.eq.s32.totalorder %v3525_v7, %v3784_v50 }
  0x5b   :  { %3139 = vmatprep.subr.msk.bf16.mxu0 %vm3998_vm15, %v3435_v17  ;;  %2790 = vmatmul.mubr.f32.gmra.mrb[2].mxu1 %v3931_v1  ;;  %vm4096_vm4 = vmpackc.low %vm929_vm13, %vm928_vm1  ;;  %vm669_vm13 = vcmp.eq.s32.totalorder %v3658_v30, %v3767_v47 }
  0x5c   :  { %2792 = vmatprep.mubr.f32.mxu1 %v3940_v10  ;;  %3165 = vmatpush3.bf16.msk.msra.mxu1 %vm4013_vm0, %v3435_v17  ;;  %vm670_vm0 = vcmp.eq.s32.totalorder %v3661_v31, %v3767_v47  ;;  %vm4127_vm1 = vmpackc.low %vm5078_vm9, %vm5077_vm11  ;;  %vm672_vm11 = vcmp.eq.s32.totalorder %v3700_v37, %v3767_v47 }
  0x5d   :  { %2752 = vmatmul.mubr.f32.gmra.mrb[6].mxu0 %v4047_v29  ;;  %3167 = vmatprep.subr.msk.bf16.mxu1 %vm4080_vm5, %v3435_v17  ;;  %v5080_v41 = vsel %vm4127_vm1, 4294967295, %v5079_v41  ;;  %vm4149_vm9 = vmpackc.low %vm670_vm0, %vm669_vm13  ;;  %vm933_vm1 = vcmp.eq.s32.totalorder %v3628_v26, %v3852_v56  ;;  %vm5086_vm0 = vcmp.eq.s32.totalorder %v3519_v5, %v3954_v14 }
  0x5e   :  { %2830 = vmatprep.mubr.f32.mxu0 %v3532_v9  ;;  %3141 = vmatpush3.bf16.msk.msra.mxu0 %vm3998_vm15, %v3435_v17  ;;  %vm5074_vm15 = vcmp.eq.s32.totalorder %v3519_v5, %v3784_v50 }
  0x5f   :  { %3143 = vmatprep.subr.msk.bf16.mxu0 %vm4067_vm2, %v3435_v17  ;;  %vm4112_vm8 = vmpackc.low %vm5074_vm15, %vm5073_vm7  ;;  %2793 = vmatmul.mubr.f32.gmra.mrb[4].mxu1 %v3987_v19  ;;  %vm930_vm7 = vcmp.eq.s32.totalorder %v3596_v21, %v3852_v56  ;;  %vm931_vm15 = vcmp.eq.s32.totalorder %v3599_v22, %v3852_v56 }
  0x60   :  { %v5076_v40 = vsel %vm4112_vm8, 4294967295, %v5075_v40  ;;  %2795 = vmatprep.mubr.f32.mxu1 %v4002_v23  ;;  %vm671_vm8 = vcmp.eq.s32.totalorder %v3697_v36, %v3767_v47  ;;  %3169 = vmatpush3.bf16.msk.msra.mxu1 %vm4080_vm5, %v3435_v17  ;;  %vm3174_vm5 = vmpackc.low %vm931_vm15, %vm930_vm7  ;;  %vm934_vm15 = vcmp.eq.s32.totalorder %v3658_v30, %v3852_v56 }
  0x61   :  { %3171 = vmatprep.subr.msk.bf16.mxu1 %vm4096_vm4, %v3435_v17  ;;  %vm4161_vm14 = vmpackc.low %vm672_vm11, %vm671_vm8  ;;  %vm5085_vm8 = vcmp.eq.s32.totalorder %v3512_v2, %v3954_v14  ;;  %vm935_vm11 = vcmp.eq.s32.totalorder %v3661_v31, %v3852_v56 }
  0x62   :  { %3145 = vmatpush3.bf16.msk.msra.mxu0 %vm4067_vm2, %v3435_v17  ;;  %vm932_vm2 = vcmp.eq.s32.totalorder %v3625_v25, %v3852_v56  ;;  %vm4182_vm7 = vmpackc.low %vm5086_vm0, %vm5085_vm8  ;;  %vm936_vm8 = vcmp.eq.s32.totalorder %v3697_v36, %v3852_v56  ;;  %vm937_vm0 = vcmp.eq.s32.totalorder %v3700_v37, %v3852_v56 }
  0x63   :  { %3147 = vmatprep.subr.msk.bf16.mxu0 %vm4085_vm3, %v3435_v17  ;;  %2796 = vmatmul.mubr.f32.gmra.mrb[6].mxu1 %v4047_v29  ;;  %vm3178_vm13 = vmpackc.low %vm933_vm1, %vm932_vm2 }
  0x64   :  { %2874 = vmatprep.mubr.f32.mxu1 %v3532_v9  ;;  %3173 = vmatpush3.bf16.msk.msra.mxu1 %vm4096_vm4, %v3435_v17  ;;  %vm5090_vm4 = vcmp.eq.s32.totalorder %v3525_v7, %v3954_v14  ;;  %vm3182_vm2 = vmpackc.low %vm935_vm11, %vm934_vm15  ;;  %vm1195_vm15 = vcmp.eq.s32.totalorder %v3596_v21, %v3780_v49  ;;  %vm1456_vm11 = vcmp.eq.s32.totalorder %v3539_v11, %v3743_v45 }
  0x65   :  { %3175 = vmatprep.subr.msk.bf16.mxu1 %vm3174_vm5, %v3435_v17 }
  0x66   :  { %3149 = vmatpush3.bf16.msk.msra.mxu0 %vm4085_vm3, %v3435_v17  ;;  %vm5089_vm3 = vcmp.eq.s32.totalorder %v3522_v6, %v3954_v14 }
  0x67   :  { %3151 = vmatprep.subr.msk.bf16.mxu0 %vm4149_vm9, %v3435_v17  ;;  %vm4192_vm1 = vmpackc.low %vm5090_vm4, %vm5089_vm3  ;;  %vm1193_vm3 = vcmp.eq.s32.totalorder %v3563_v15, %v3780_v49 }
  0x68   :  { %3177 = vmatpush3.bf16.msk.msra.mxu1 %vm3174_vm5, %v3435_v17  ;;  %vm1191_vm5 = vcmp.eq.s32.totalorder %v3539_v11, %v3780_v49 }
  0x69   :  { %3179 = vmatprep.subr.msk.bf16.mxu1 %vm3178_vm13, %v3435_v17 }
  0x6a   :  { %3153 = vmatpush3.bf16.msk.msra.mxu0 %vm4149_vm9, %v3435_v17  ;;  %vm3186_vm9 = vmpackc.low %vm937_vm0, %vm936_vm8  ;;  %vm5099_vm0 = vnez %v5064_v28 }
  0x6b   :  { %3155 = vmatprep.subr.msk.bf16.mxu0 %vm4161_vm14, %v3435_v17 }
  0x6c   :  { %3181 = vmatpush3.bf16.msk.msra.mxu1 %vm3178_vm13, %v3435_v17 }
  0x6d   :  { %3183 = vmatprep.subr.msk.bf16.mxu1 %vm3182_vm2, %v3435_v17 }
  0x6e   :  { %3157 = vmatpush3.bf16.msk.msra.mxu0 %vm4161_vm14, %v3435_v17  ;;  %vm1192_vm14 = vcmp.eq.s32.totalorder %v3542_v12, %v3780_v49 }
  0x6f   :  { %3191 = vmatprep.subr.msk.bf16.mxu0 %vm3914_vm12, %v3435_v17  ;;  %vm4235_vm13 = vmpackc.low %vm1192_vm14, %vm1191_vm5  ;;  %vm1458_vm14 = vcmp.eq.s32.totalorder %v3563_v15, %v3743_v45 }
  0x70   :  { %3185 = vmatpush3.bf16.msk.msra.mxu1 %vm3182_vm2, %v3435_v17  ;;  %vm1457_vm2 = vcmp.eq.s32.totalorder %v3542_v12, %v3743_v45 }
  0x71   :  { %2831 = vmatmul.mubr.f32.vlgmr.msra.gmra.mrb[8].mxu0 %v3877_v58  ;;  %3187 = vmatprep.subr.msk.bf16.mxu1 %vm3186_vm9, %v3435_v17  ;;  %vm4292_vm5 = vmpackc.low %vm1457_vm2, %vm1456_vm11  ;;  %vm1461_vm11 = vcmp.eq.s32.totalorder %v3599_v22, %v3743_v45 }
  0x72   :  { %2833 = vmatprep.mubr.f32.mxu0 %v3893_v60  ;;  %3193 = vmatpush3.bf16.msk.msra.mxu0 %vm3914_vm12, %v3435_v17  ;;  %vm1194_vm12 = vcmp.eq.s32.totalorder %v3566_v16, %v3780_v49 }
  0x73   :  { %3195 = vmatprep.subr.msk.bf16.mxu0 %vm3923_vm10, %v3435_v17  ;;  %vm4256_vm4 = vmpackc.low %vm1194_vm12, %vm1193_vm3  ;;  %vm1199_vm12 = vcmp.eq.s32.totalorder %v3658_v30, %v3780_v49 }
  0x74   :  { %3189 = vmatpush3.bf16.msk.msra.mxu1 %vm3186_vm9, %v3435_v17  ;;  %vm1197_vm9 = vcmp.eq.s32.totalorder %v3625_v25, %v3780_v49 }
  0x75   :  { %2834 = vmatmul.mubr.f32.gmra.mrb[10].mxu0 %v3931_v1  ;;  %3223 = vmatprep.subr.msk.bf16.mxu1 %vm4026_vm6, %v3435_v17 }
  0x76   :  { %2836 = vmatprep.mubr.f32.mxu0 %v3940_v10  ;;  %3197 = vmatpush3.bf16.msk.msra.mxu0 %vm3923_vm10, %v3435_v17  ;;  %vm1196_vm10 = vcmp.eq.s32.totalorder %v3599_v22, %v3780_v49 }
  0x77   :  { %3199 = vmatprep.subr.msk.bf16.mxu0 %vm4235_vm13, %v3435_v17  ;;  %2875 = vmatmul.mubr.f32.vlgmr.msra.gmra.mrb[8].mxu1 %v3877_v58  ;;  %vm4279_vm8 = vmpackc.low %vm1196_vm10, %vm1195_vm15  ;;  %vm1460_vm10 = vcmp.eq.s32.totalorder %v3596_v21, %v3743_v45 }
  0x78   :  { %2877 = vmatprep.mubr.f32.mxu1 %v3893_v60  ;;  %3225 = vmatpush3.bf16.msk.msra.mxu1 %vm4026_vm6, %v3435_v17  ;;  %vm1198_vm6 = vcmp.eq.s32.totalorder %v3628_v26, %v3780_v49 }
  0x79   :  { %2837 = vmatmul.mubr.f32.gmra.mrb[12].mxu0 %v3987_v19  ;;  %3227 = vmatprep.subr.msk.bf16.mxu1 %vm5099_vm0, %v3435_v17  ;;  %vm4311_vm3 = vmpackc.low %vm1198_vm6, %vm1197_vm9  ;;  %vm1462_vm6 = vcmp.eq.s32.totalorder %v3625_v25, %v3743_v45 }
  0x7a   :  { %2839 = vmatprep.mubr.f32.mxu0 %v4002_v23  ;;  %3201 = vmatpush3.bf16.msk.msra.mxu0 %vm4235_vm13, %v3435_v17  ;;  %vm1459_vm13 = vcmp.eq.s32.totalorder %v3566_v16, %v3743_v45  ;;  %vm3238_vm9 = vmpackc.low %vm1461_vm11, %vm1460_vm10  ;;  %vm1467_vm10 = vcmp.eq.s32.totalorder %v3700_v37, %v3743_v45  ;;  %vm5108_vm11 = vnez %v5076_v40 }
  0x7b   :  { %3203 = vmatprep.subr.msk.bf16.mxu0 %vm4256_vm4, %v3435_v17  ;;  %2878 = vmatmul.mubr.f32.gmra.mrb[10].mxu1 %v3931_v1  ;;  %vm4323_vm15 = vmpackc.low %vm1459_vm13, %vm1458_vm14 }
  0x7c   :  { %2880 = vmatprep.mubr.f32.mxu1 %v3940_v10  ;;  %3229 = vmatpush3.bf16.msk.msra.mxu1 %vm5099_vm0, %v3435_v17  ;;  %vm1202_vm0 = vcmp.eq.s32.totalorder %v3700_v37, %v3780_v49 }
  0x7d   :  { %2840 = vmatmul.mubr.f32.gmra.mrb[14].mxu0 %v4047_v29  ;;  %3231 = vmatprep.subr.msk.bf16.mxu1 %vm4292_vm5, %v3435_v17 }
  0x7e   :  { %2918 = vmatprep.mubr.f32.mxu0 %v3532_v9  ;;  %3205 = vmatpush3.bf16.msk.msra.mxu0 %vm4256_vm4, %v3435_v17  ;;  %vm1200_vm4 = vcmp.eq.s32.totalorder %v3661_v31, %v3780_v49 }
  0x7f   :  { %3207 = vmatprep.subr.msk.bf16.mxu0 %vm4279_vm8, %v3435_v17  ;;  %2881 = vmatmul.mubr.f32.gmra.mrb[12].mxu1 %v3987_v19  ;;  %vm4341_vm2 = vmpackc.low %vm1200_vm4, %vm1199_vm12  ;;  %vm1464_vm12 = vcmp.eq.s32.totalorder %v3658_v30, %v3743_v45  ;;  %vm1465_vm4 = vcmp.eq.s32.totalorder %v3661_v31, %v3743_v45 }
  0x80   :  { %2883 = vmatprep.mubr.f32.mxu1 %v4002_v23  ;;  %3233 = vmatpush3.bf16.msk.msra.mxu1 %vm4292_vm5, %v3435_v17  ;;  %vm1463_vm5 = vcmp.eq.s32.totalorder %v3628_v26, %v3743_v45 }
  0x81   :  { %3235 = vmatprep.subr.msk.bf16.mxu1 %vm4323_vm15, %v3435_v17  ;;  %vm3242_vm13 = vmpackc.low %vm1463_vm5, %vm1462_vm6  ;;  %vm1723_vm5 = vcmp.eq.s32.totalorder %v3563_v15, %v3784_v50 }
  0x82   :  { %3209 = vmatpush3.bf16.msk.msra.mxu0 %vm4279_vm8, %v3435_v17  ;;  %vm1201_vm8 = vcmp.eq.s32.totalorder %v3697_v36, %v3780_v49 }
  0x83   :  { %3211 = vmatprep.subr.msk.bf16.mxu0 %vm4311_vm3, %v3435_v17  ;;  %2884 = vmatmul.mubr.f32.gmra.mrb[14].mxu1 %v4047_v29  ;;  %vm3218_vm14 = vmpackc.low %vm1202_vm0, %vm1201_vm8  ;;  %vm1721_vm8 = vcmp.eq.s32.totalorder %v3539_v11, %v3784_v50  ;;  %vm1722_vm0 = vcmp.eq.s32.totalorder %v3542_v12, %v3784_v50 }
  0x84   :  { %2962 = vmatprep.mubr.f32.mxu1 %v3532_v9  ;;  %3237 = vmatpush3.bf16.msk.msra.mxu1 %vm4323_vm15, %v3435_v17  ;;  %vm1466_vm15 = vcmp.eq.s32.totalorder %v3697_v36, %v3743_v45  ;;  %vm3262_vm6 = vmpackc.low %vm1722_vm0, %vm1721_vm8  ;;  %vm1986_vm8 = vcmp.eq.s32.totalorder %v3539_v11, %v3954_v14 }
  0x85   :  { %3239 = vmatprep.subr.msk.bf16.mxu1 %vm3238_vm9, %v3435_v17 }
  0x86   :  { %3213 = vmatpush3.bf16.msk.msra.mxu0 %vm4311_vm3, %v3435_v17  ;;  %vm3246_vm3 = vmpackc.low %vm1465_vm4, %vm1464_vm12  ;;  %vm1725_vm12 = vcmp.eq.s32.totalorder %v3596_v21, %v3784_v50  ;;  %vm1726_vm4 = vcmp.eq.s32.totalorder %v3599_v22, %v3784_v50 }
  0x87   :  { %3215 = vmatprep.subr.msk.bf16.mxu0 %vm4341_vm2, %v3435_v17 }
  0x88   :  { %3241 = vmatpush3.bf16.msk.msra.mxu1 %vm3238_vm9, %v3435_v17  ;;  %vm5109_vm9 = vnez %v5080_v41 }
  0x89   :  { %3243 = vmatprep.subr.msk.bf16.mxu1 %vm3242_vm13, %v3435_v17 }
  0x8a   :  { %3217 = vmatpush3.bf16.msk.msra.mxu0 %vm4341_vm2, %v3435_v17  ;;  %vm3250_vm2 = vmpackc.low %vm1467_vm10, %vm1466_vm15  ;;  %vm1727_vm15 = vcmp.eq.s32.totalorder %v3625_v25, %v3784_v50 }
  0x8b   :  { %3219 = vmatprep.subr.msk.bf16.mxu0 %vm3218_vm14, %v3435_v17 }
  0x8c   :  { %3245 = vmatpush3.bf16.msk.msra.mxu1 %vm3242_vm13, %v3435_v17 }
  0x8d   :  { %3247 = vmatprep.subr.msk.bf16.mxu1 %vm3246_vm3, %v3435_v17 }
  0x8e   :  { %3221 = vmatpush3.bf16.msk.msra.mxu0 %vm3218_vm14, %v3435_v17  ;;  %vm1724_vm14 = vcmp.eq.s32.totalorder %v3566_v16, %v3784_v50 }
  0x8f   :  { %3255 = vmatprep.subr.msk.bf16.mxu0 %vm5108_vm11, %v3435_v17  ;;  %vm4418_vm13 = vmpackc.low %vm1724_vm14, %vm1723_vm5  ;;  %vm1732_vm5 = vcmp.eq.s32.totalorder %v3700_v37, %v3784_v50  ;;  %vm1988_vm14 = vcmp.eq.s32.totalorder %v3563_v15, %v3954_v14 }
  0x90   :  { %3249 = vmatpush3.bf16.msk.msra.mxu1 %vm3246_vm3, %v3435_v17  ;;  %vm3270_vm3 = vmpackc.low %vm1726_vm4, %vm1725_vm12 }
  0x91   :  { %2919 = vmatmul.mubr.f32.vlgmr.msra.gmra.mrb[16].mxu0 %v3877_v58  ;;  %3251 = vmatprep.subr.msk.bf16.mxu1 %vm3250_vm2, %v3435_v17 }
  0x92   :  { %2921 = vmatprep.mubr.f32.mxu0 %v3893_v60  ;;  %3257 = vmatpush3.bf16.msk.msra.mxu0 %vm5108_vm11, %v3435_v17  ;;  %vm1729_vm11 = vcmp.eq.s32.totalorder %v3658_v30, %v3784_v50 }
  0x93   :  { %3259 = vmatprep.subr.msk.bf16.mxu0 %vm5109_vm9, %v3435_v17 }
  0x94   :  { %3253 = vmatpush3.bf16.msk.msra.mxu1 %vm3250_vm2, %v3435_v17  ;;  %vm1730_vm2 = vcmp.eq.s32.totalorder %v3661_v31, %v3784_v50 }
  0x95   :  { %2922 = vmatmul.mubr.f32.gmra.mrb[18].mxu0 %v3931_v1  ;;  %3287 = vmatprep.subr.msk.bf16.mxu1 %vm4182_vm7, %v3435_v17 }
  0x96   :  { %2924 = vmatprep.mubr.f32.mxu0 %v3940_v10  ;;  %3261 = vmatpush3.bf16.msk.msra.mxu0 %vm5109_vm9, %v3435_v17  ;;  %vm3278_vm9 = vmpackc.low %vm1730_vm2, %vm1729_vm11  ;;  %vm1993_vm11 = vcmp.eq.s32.totalorder %v3628_v26, %v3954_v14 }
  0x97   :  { %3263 = vmatprep.subr.msk.bf16.mxu0 %vm3262_vm6, %v3435_v17  ;;  %2963 = vmatmul.mubr.f32.vlgmr.msra.gmra.mrb[16].mxu1 %v3877_v58 }
  0x98   :  { %2965 = vmatprep.mubr.f32.mxu1 %v3893_v60  ;;  %3289 = vmatpush3.bf16.msk.msra.mxu1 %vm4182_vm7, %v3435_v17  ;;  %vm1728_vm7 = vcmp.eq.s32.totalorder %v3628_v26, %v3784_v50 }
  0x99   :  { %2925 = vmatmul.mubr.f32.gmra.mrb[20].mxu0 %v3987_v19  ;;  %3291 = vmatprep.subr.msk.bf16.mxu1 %vm4192_vm1, %v3435_v17  ;;  %vm4454_vm10 = vmpackc.low %vm1728_vm7, %vm1727_vm15  ;;  %vm1991_vm15 = vcmp.eq.s32.totalorder %v3599_v22, %v3954_v14 }
  0x9a   :  { %2927 = vmatprep.mubr.f32.mxu0 %v4002_v23  ;;  %3265 = vmatpush3.bf16.msk.msra.mxu0 %vm3262_vm6, %v3435_v17  ;;  %vm1731_vm6 = vcmp.eq.s32.totalorder %v3697_v36, %v3784_v50 }
  0x9b   :  { %3267 = vmatprep.subr.msk.bf16.mxu0 %vm4418_vm13, %v3435_v17  ;;  %2966 = vmatmul.mubr.f32.gmra.mrb[18].mxu1 %v3931_v1  ;;  %vm3282_vm4 = vmpackc.low %vm1732_vm5, %vm1731_vm6  ;;  %vm1997_vm6 = vcmp.eq.s32.totalorder %v3700_v37, %v3954_v14 }
  0x9c   :  { %2968 = vmatprep.mubr.f32.mxu1 %v3940_v10  ;;  %3293 = vmatpush3.bf16.msk.msra.mxu1 %vm4192_vm1, %v3435_v17  ;;  %vm1987_vm1 = vcmp.eq.s32.totalorder %v3542_v12, %v3954_v14 }
  0x9d   :  { %2928 = vmatmul.mubr.f32.gmra.mrb[22].mxu0 %v4047_v29  ;;  %vm3294_vm0 = vmpackc.low %vm1987_vm1, %vm1986_vm8  ;;  %vm1994_vm8 = vcmp.eq.s32.totalorder %v3658_v30, %v3954_v14  ;;  %vm1995_vm1 = vcmp.eq.s32.totalorder %v3661_v31, %v3954_v14 }
  0x9e   :  { %3006 = vmatprep.mubr.f32.mxu0 %v3532_v9  ;;  %3269 = vmatpush3.bf16.msk.msra.mxu0 %vm4418_vm13, %v3435_v17  ;;  %vm1989_vm13 = vcmp.eq.s32.totalorder %v3566_v16, %v3954_v14 }
  0x9f   :  { %3271 = vmatprep.subr.msk.bf16.mxu0 %vm3270_vm3, %v3435_v17  ;;  %2969 = vmatmul.mubr.f32.gmra.mrb[20].mxu1 %v3987_v19  ;;  %vm3298_vm12 = vmpackc.low %vm1989_vm13, %vm1988_vm14 }
  0xa0   :  { %2971 = vmatprep.mubr.f32.mxu1 %v4002_v23  ;;  %3295 = vmatprep.subr.msk.bf16.mxu1 %vm3294_vm0, %v3435_v17 }
  0xa1   :  { %3297 = vmatpush3.bf16.msk.msra.mxu1 %vm3294_vm0, %v3435_v17  ;;  %vm3310_vm0 = vmpackc.low %vm1995_vm1, %vm1994_vm8 }
  0xa2   :  { %3273 = vmatpush3.bf16.msk.msra.mxu0 %vm3270_vm3, %v3435_v17  ;;  %3299 = vmatprep.subr.msk.bf16.mxu1 %vm3298_vm12, %v3435_v17  ;;  %vm1990_vm3 = vcmp.eq.s32.totalorder %v3596_v21, %v3954_v14  ;;  %v4545_v21 = vld [vmem:[%s5002_s1] sm:$0xff]  ;;  %s3442_s1 = smov [#allocation8]  }
  0xa3   :  { %3275 = vmatprep.subr.msk.bf16.mxu0 %vm4454_vm10, %v3435_v17  ;;  %2972 = vmatmul.mubr.f32.gmra.mrb[22].mxu1 %v4047_v29  ;;  %vm3302_vm7 = vmpackc.low %vm1991_vm15, %vm1990_vm3  ;;  %v295_v22 = vrot.slane %v4545_v21, %v3711_v39  ;;  %v305_v26 = vrot.slane %v4545_v21, %v3720_v42  ;;  %v285_v30 = vrot.slane %v4545_v21, %v3516_v4  ;;  %s2249_s27 = sshll.u32 %s3442_s1, 4  ;;  %s2250_s27 = int_to_ptr.vmem [resolvable:$true] %s2249_s27 }
  0xa4   :  { %3050 = vmatprep.mubr.f32.mxu1 %v3532_v9  ;;  %v290_v31 = vrot.slane %v4545_v21, %v3547_v13  ;;  %v320_v37 = vrot.slane %v4545_v21, %v3928_v0  ;;  %v310_v50 = vrot.slane %v4545_v21, %v3690_v35  ;;  %s3401_s28 = scalar_lea.vmem %s2250_s27, 1024  ;;  %p3406_p3 = scmp.lt.s32.totalorder %s2250_s27, %s2250_s27 }
  0xa5   :  { %3301 = vmatpush3.bf16.msk.msra.mxu1 %vm3298_vm12, %v3435_v17  ;;  %p3402_p2 = scmp.ne.s32.totalorder %s2250_s27, %s3401_s28  ;;  %p3407_p4 = scmp.lt.s32.totalorder %s3401_s28, %s3401_s28 }
  0xa6   :  { %3277 = vmatpush3.bf16.msk.msra.mxu0 %vm4454_vm10, %v3435_v17  ;;  %3303 = vmatprep.subr.msk.bf16.mxu1 %vm3302_vm7, %v3435_v17  ;;  %vm1992_vm10 = vcmp.eq.s32.totalorder %v3625_v25, %v3954_v14  ;;  %v300_v25 = vrot.slane %v4545_v21, %v3801_v52 }
  0xa7   :  { %3279 = vmatprep.subr.msk.bf16.mxu0 %vm3278_vm9, %v3435_v17  ;;  %vm3306_vm2 = vmpackc.low %vm1993_vm11, %vm1992_vm10  ;;  %p3408_p5 = por %p3407_p4, %p3406_p3 }
  0xa9   :  { %3305 = vmatpush3.bf16.msk.msra.mxu1 %vm3302_vm7, %v3435_v17  ;;  %v4530_v9 = vpop.permute.xlu1 %79  ;;  %v4536_v15 = vpop.permute.xlu0 %71  ;;  %p3409_p6 = pnand %p3408_p5, %p3402_p2 }
  0xaa   :  { %3281 = vmatpush3.bf16.msk.msra.mxu0 %vm3278_vm9, %v3435_v17  ;;  %3307 = vmatprep.subr.msk.bf16.mxu1 %vm3306_vm2, %v3435_v17  ;;  %vm1996_vm9 = vcmp.eq.s32.totalorder %v3697_v36, %v3954_v14  ;;  %v315_v36 = vrot.slane %v4545_v21, %v3723_v43  ;;  %v296_v57 = vmul.f32 %v295_v22, %v4530_v9 }
  0xab   :  { %3283 = vmatprep.subr.msk.bf16.mxu0 %vm3282_vm4, %v3435_v17  ;;  %vm3314_vm5 = vmpackc.low %vm1997_vm6, %vm1996_vm9 }
  0xad   :  { %3309 = vmatpush3.bf16.msk.msra.mxu1 %vm3306_vm2, %v3435_v17 }
  0xae   :  { %3285 = vmatpush3.bf16.msk.msra.mxu0 %vm3282_vm4, %v3435_v17  ;;  %3311 = vmatprep.subr.msk.bf16.mxu1 %vm3310_vm0, %v3435_v17  ;;  %v4532_v11 = vpop.permute.xlu1 %83 }
  0xb1   :  { %3007 = vmatmul.mubr.f32.vlgmr.msra.gmra.mrb[24].mxu0 %v3877_v58  ;;  %3313 = vmatpush3.bf16.msk.msra.mxu1 %vm3310_vm0, %v3435_v17 }
  0xb2   :  { %3009 = vmatprep.mubr.f32.mxu0 %v3893_v60  ;;  %3315 = vmatprep.subr.msk.bf16.mxu1 %vm3314_vm5, %v3435_v17 }
  0xb3   :  { %v4534_v12 = vpop.permute.xlu1 %87 }
  0xb4   :  { %v306_v59 = vmul.f32 %v305_v26, %v4534_v12 }
  0xb5   :  { %3010 = vmatmul.mubr.f32.gmra.mrb[26].mxu0 %v3931_v1  ;;  %3317 = vmatpush3.bf16.msk.msra.mxu1 %vm3314_vm5, %v3435_v17  ;;  %v4540_v17 = vpop.permute.xlu0 %75 }
  0xb6   :  { %3012 = vmatprep.mubr.f32.mxu0 %v3940_v10  ;;  %v291_v61 = vmul.f32 %v290_v31, %v4540_v17 }
  0xb8   :  { %3051 = vmatmul.mubr.f32.vlgmr.msra.gmra.mrb[24].mxu1 %v3877_v58  ;;  %v4538_v16 = vpop.permute.xlu1 %95  ;;  %v301_v58 = vmul.f32 %v300_v25, %v4532_v11 }
  0xb9   :  { %3013 = vmatmul.mubr.f32.gmra.mrb[28].mxu0 %v3987_v19  ;;  %3053 = vmatprep.mubr.f32.mxu1 %v3893_v60  ;;  %v4565_v56 = vpop.permute.xlu0 %91  ;;  %v286_v60 = vmul.f32 %v285_v30, %v4536_v15  ;;  %v316_v62 = vmul.f32 %v315_v36, %v4538_v16 }
  0xba   :  { %3015 = vmatprep.mubr.f32.mxu0 %v4002_v23 }
  0xbb   :  { %v322_v14 = vadd.f32 %v291_v61, %v286_v60 }
  0xbc   :  { %3054 = vmatmul.mubr.f32.gmra.mrb[26].mxu1 %v3931_v1  ;;  %v311_v1 = vmul.f32 %v310_v50, %v4565_v56 }
  0xbd   :  { %3016 = vmatmul.mubr.f32.gmra.mrb[30].mxu0 %v4047_v29  ;;  %3056 = vmatprep.mubr.f32.mxu1 %v3940_v10  ;;  %v323_v10 = vadd.f32 %v301_v58, %v296_v57  ;;  %v4575_v24 = vpop.permute.xlu0 %105 }
  0xbe   :  { %v324_v8 = vadd.f32 %v311_v1, %v306_v59 }
  0xbf   :  { %v4563_v55 = vpop.permute.xlu1 %99 }
  0xc0   :  { %3057 = vmatmul.mubr.f32.gmra.mrb[28].mxu1 %v3987_v19  ;;  %v321_v63 = vmul.f32 %v320_v37, %v4563_v55  ;;  %v326_v19 = vadd.f32 %v323_v10, %v322_v14 }
  0xc1   :  { %3059 = vmatprep.mubr.f32.mxu1 %v4002_v23 }
  0xc2   :  { %v325_v18 = vadd.f32 %v321_v63, %v316_v62  ;;  %v4596_v62 = vld [vmem:[#allocation3] sm:$0x1] }
  0xc3   :  { %vm379_vm14 = vcmp.gt.s32.totalorder %v4596_v62, 0  ;;  %vm643_vm12 = vcmp.gt.s32.totalorder %v4596_v62, 1  ;;  %vm908_vm3 = vcmp.gt.s32.totalorder %v4596_v62, 2  ;;  %vm1173_vm7 = vcmp.gt.s32.totalorder %v4596_v62, 3 }
  0xc4   :  { %3060 = vmatmul.mubr.f32.gmra.mrb[30].mxu1 %v4047_v29  ;;  %v327_v20 = vadd.f32 %v325_v18, %v324_v8  ;;  %v380_v8 = vsel %vm379_vm14, 1, %v5011_v3  ;;  %vm1438_vm11 = vcmp.gt.s32.totalorder %v4596_v62, 4  ;;  %vm1703_vm8 = vcmp.gt.s32.totalorder %v4596_v62, 5 }
  0xc5   :  { %vm1968_vm0 = vcmp.gt.s32.totalorder %v4596_v62, 6  ;;  %vm2233_vm6 = vcmp.gt.s32.totalorder %v4596_v62, 7 }
  0xc6   :  { %v328_v23 = vadd.f32 %v327_v20, %v326_v19  ;;  %v384_v19 = vrot.slane %v380_v8, %v3516_v4 }
  0xc8   :  { %v329_v27 = vadd.f32 %v328_v23, %v4575_v24  ;;  %vm385_vm13 = vcmp.eq.s32.totalorder %v384_v19, 1 }
  0xca   :  { %v338_v28 = vrot.slane %v329_v27, %v3547_v13  ;;  %v333_v32 = vrot.slane %v329_v27, %v3516_v4  ;;  %v348_v40 = vrot.slane %v329_v27, %v3801_v52  ;;  %v343_v46 = vrot.slane %v329_v27, %v3711_v39 }
  0xcb   :  { %v358_v5 = vrot.slane %v329_v27, %v3690_v35  ;;  %v353_v51 = vrot.slane %v329_v27, %v3720_v42  ;;  %v368_v26 = vrot.slane %v329_v27, %v3928_v0  ;;  %v363_v36 = vrot.slane %v329_v27, %v3723_v43 }
 0x124   :  { %v2744_v29 = vpop.f32.mrb[0].mxu0 }
 0x125   :  { %v339_v33 = vmul.f32 %v2744_v29, %v338_v28  ;;  %v243_v34 = vpop.f32.mrb[1].mxu0 }
 0x126   :  { %v334_v38 = vmul.f32 %v333_v32, %v243_v34 }
 0x128   :  { %v370_v41 = vadd.f32 %v339_v33, %v334_v38  ;;  %v2747_v44 = vpop.f32.mrb[2].mxu0 }
 0x129   :  { %v349_v47 = vmul.f32 %v2747_v44, %v348_v40  ;;  %v253_v48 = vpop.f32.mrb[3].mxu0 }
 0x12a   :  { %v344_v2 = vmul.f32 %v343_v46, %v253_v48  ;;  %v4584_v53 = vpop.f32.mrb[0].mxu1 }
 0x12b   :  { %v4586_v49 = vpop.f32.mrb[1].mxu1 }
 0x12c   :  { %v371_v6 = vadd.f32 %v349_v47, %v344_v2  ;;  %v2750_v7 = vpop.f32.mrb[4].mxu0 }
 0x12d   :  { %v359_v54 = vmul.f32 %v2750_v7, %v358_v5  ;;  %v263_v45 = vpop.f32.mrb[5].mxu0 }
 0x12e   :  { %v374_v22 = vadd.f32 %v371_v6, %v370_v41  ;;  %v354_v25 = vmul.f32 %v353_v51, %v263_v45  ;;  %v4590_v37 = vpop.f32.mrb[2].mxu1 }
 0x12f   :  { %v4592_v58 = vpop.f32.mrb[3].mxu1 }
 0x130   :  { %v372_v30 = vadd.f32 %v359_v54, %v354_v25  ;;  %v2753_v31 = vpop.f32.mrb[6].mxu0 }
 0x131   :  { %v369_v50 = vmul.f32 %v2753_v31, %v368_v26  ;;  %v273_v57 = vpop.f32.mrb[7].mxu0 }
 0x132   :  { %v364_v59 = vmul.f32 %v363_v36, %v273_v57  ;;  %v4594_v61 = vpop.f32.mrb[4].mxu1 }
 0x133   :  { %v4598_v63 = vpop.f32.mrb[5].mxu1 }
 0x134   :  { %v373_v60 = vadd.f32 %v369_v50, %v364_v59 }
 0x136   :  { %v375_v1 = vadd.f32 %v373_v60, %v372_v30  ;;  %v2797_v14 = vpop.f32.mrb[6].mxu1 }
 0x137   :  { %v536_v18 = vpop.f32.mrb[7].mxu1 }
 0x138   :  { %v376_v10 = vadd.f32 %v375_v1, %v374_v22 }
 0x13a   :  { %3341 = vtanh.f32 %v376_v10 }
 0x144   :  { %v3342_v20 = vpop.eup %3341  ;;  %v4606_v27 = vpop.f32.mrb[8].mxu0 }
 0x145   :  { %v4604_v23 = vsel %vm385_vm13, %v3342_v20, %v4545_v21  ;;  %v4617_v34 = vpop.f32.mrb[9].mxu0 }
 0x146   :  { %v548_v28 = vrot.slane %v4604_v23, %v3516_v4  ;;  %v553_v29 = vrot.slane %v4604_v23, %v3547_v13  ;;  %v558_v32 = vrot.slane %v4604_v23, %v3711_v39  ;;  %v563_v33 = vrot.slane %v4604_v23, %v3801_v52  ;;  %387 = vst [vmem:[#allocation8] sm:$0xff] %v4604_v23 }
 0x147   :  { %v568_v21 = vrot.slane %v4604_v23, %v3720_v42  ;;  %v573_v38 = vrot.slane %v4604_v23, %v3690_v35  ;;  %v578_v40 = vrot.slane %v4604_v23, %v3723_v43  ;;  %v583_v41 = vrot.slane %v4604_v23, %v3928_v0 }
 0x148   :  { %v549_v44 = vmul.f32 %v548_v28, %v4536_v15  ;;  %v554_v46 = vmul.f32 %v553_v29, %v4540_v17  ;;  %v559_v47 = vmul.f32 %v558_v32, %v4530_v9  ;;  %v564_v48 = vmul.f32 %v563_v33, %v4532_v11  ;;  %v4635_v51 = vpop.f32.mrb[10].mxu0 }
 0x149   :  { %v569_v2 = vmul.f32 %v568_v21, %v4534_v12  ;;  %v574_v5 = vmul.f32 %v573_v38, %v4565_v56  ;;  %v579_v6 = vmul.f32 %v578_v40, %v4538_v16  ;;  %v584_v7 = vmul.f32 %v583_v41, %v4563_v55  ;;  %v4637_v22 = vpop.f32.mrb[11].mxu0 }
 0x14a   :  { %v585_v54 = vadd.f32 %v554_v46, %v549_v44  ;;  %v586_v45 = vadd.f32 %v564_v48, %v559_v47  ;;  %v4641_v50 = vpop.f32.mrb[8].mxu1 }
 0x14b   :  { %v587_v25 = vadd.f32 %v574_v5, %v569_v2  ;;  %v588_v26 = vadd.f32 %v584_v7, %v579_v6  ;;  %v4645_v59 = vpop.f32.mrb[9].mxu1 }
 0x14c   :  { %v589_v30 = vadd.f32 %v586_v45, %v585_v54  ;;  %v4639_v36 = vpop.f32.mrb[12].mxu0 }
 0x14d   :  { %v590_v31 = vadd.f32 %v588_v26, %v587_v25  ;;  %v4643_v57 = vpop.f32.mrb[13].mxu0 }
 0x14e   :  { %v4650_v8 = vpop.f32.mrb[10].mxu1 }
 0x14f   :  { %v591_v60 = vadd.f32 %v590_v31, %v589_v30  ;;  %v4654_v20 = vpop.f32.mrb[11].mxu1 }
 0x150   :  { %v4648_v10 = vpop.f32.mrb[14].mxu0 }
 0x151   :  { %v592_v1 = vadd.f32 %v591_v60, %v4575_v24  ;;  %v4652_v19 = vpop.f32.mrb[15].mxu0 }
 0x152   :  { %v4668_v2 = vpop.f32.mrb[12].mxu1 }
 0x153   :  { %v601_v28 = vrot.slane %v592_v1, %v3547_v13  ;;  %v596_v29 = vrot.slane %v592_v1, %v3516_v4  ;;  %v611_v32 = vrot.slane %v592_v1, %v3801_v52  ;;  %v606_v33 = vrot.slane %v592_v1, %v3711_v39  ;;  %v4672_v45 = vpop.f32.mrb[13].mxu1 }
 0x154   :  { %v621_v21 = vrot.slane %v592_v1, %v3690_v35  ;;  %v616_v38 = vrot.slane %v592_v1, %v3720_v42  ;;  %v631_v40 = vrot.slane %v592_v1, %v3928_v0  ;;  %v626_v41 = vrot.slane %v592_v1, %v3723_v43 }
 0x155   :  { %v602_v44 = vmul.f32 %v4584_v53, %v601_v28  ;;  %v597_v46 = vmul.f32 %v596_v29, %v4586_v49  ;;  %v612_v47 = vmul.f32 %v4590_v37, %v611_v32  ;;  %v607_v48 = vmul.f32 %v606_v33, %v4592_v58 }
 0x156   :  { %v622_v5 = vmul.f32 %v4594_v61, %v621_v21  ;;  %v617_v6 = vmul.f32 %v616_v38, %v4598_v63  ;;  %v632_v7 = vmul.f32 %v2797_v14, %v631_v40  ;;  %v627_v54 = vmul.f32 %v626_v41, %v536_v18  ;;  %v4674_v49 = vpop.f32.mrb[14].mxu1 }
 0x157   :  { %v633_v25 = vadd.f32 %v602_v44, %v597_v46  ;;  %v634_v26 = vadd.f32 %v612_v47, %v607_v48  ;;  %v4676_v60 = vpop.f32.mrb[15].mxu1  ;;  %v644_v61 = vsel %vm643_vm12, 1, %v5011_v3 }
 0x158   :  { %v635_v30 = vadd.f32 %v622_v5, %v617_v6  ;;  %v636_v53 = vadd.f32 %v632_v7, %v627_v54  ;;  %v648_v63 = vrot.slane %v644_v61, %v3516_v4 }
 0x159   :  { %v637_v31 = vadd.f32 %v634_v26, %v633_v25 }
 0x15a   :  { %v638_v37 = vadd.f32 %v636_v53, %v635_v30  ;;  %vm649_vm4 = vcmp.eq.s32.totalorder %v648_v63, 1 }
 0x15c   :  { %v639_v58 = vadd.f32 %v638_v37, %v637_v31 }
 0x15e   :  { %3343 = vtanh.f32 %v639_v58 }
 0x164   :  { %v4681_v14 = vpop.f32.mrb[16].mxu0 }
 0x165   :  { %v4683_v18 = vpop.f32.mrb[17].mxu0 }
 0x168   :  { %v3344_v1 = vpop.eup %3343  ;;  %v4697_v38 = vpop.f32.mrb[18].mxu0 }
 0x169   :  { %v4686_v28 = vsel %vm649_vm4, %v3344_v1, %v4604_v23  ;;  %v4707_v46 = vpop.f32.mrb[19].mxu0 }
 0x16a   :  { %v813_v29 = vrot.slane %v4686_v28, %v3516_v4  ;;  %v818_v32 = vrot.slane %v4686_v28, %v3547_v13  ;;  %v823_v33 = vrot.slane %v4686_v28, %v3711_v39  ;;  %v828_v21 = vrot.slane %v4686_v28, %v3801_v52  ;;  %652 = vst [vmem:[#allocation8 + $0x8] sm:$0xff] %v4686_v28  ;;  %v4719_v37 = vpop.f32.mrb[16].mxu1 }
 0x16b   :  { %v833_v23 = vrot.slane %v4686_v28, %v3720_v42  ;;  %v838_v40 = vrot.slane %v4686_v28, %v3690_v35  ;;  %v843_v41 = vrot.slane %v4686_v28, %v3723_v43  ;;  %v848_v44 = vrot.slane %v4686_v28, %v3928_v0  ;;  %v4723_v1 = vpop.f32.mrb[17].mxu1 }
 0x16c   :  { %v814_v47 = vmul.f32 %v813_v29, %v4536_v15  ;;  %v819_v48 = vmul.f32 %v818_v32, %v4540_v17  ;;  %v824_v5 = vmul.f32 %v823_v33, %v4530_v9  ;;  %v829_v6 = vmul.f32 %v828_v21, %v4532_v11  ;;  %v4717_v31 = vpop.f32.mrb[20].mxu0  ;;  %5114 = vst [vmem:[#allocation12_spill] sm:$0xff] %v4723_v1 }
 0x16d   :  { %v834_v7 = vmul.f32 %v833_v23, %v4534_v12  ;;  %v839_v54 = vmul.f32 %v838_v40, %v4565_v56  ;;  %v844_v25 = vmul.f32 %v843_v41, %v4538_v16  ;;  %v849_v26 = vmul.f32 %v848_v44, %v4563_v55  ;;  %v4721_v63 = vpop.f32.mrb[21].mxu0 }
 0x16e   :  { %v850_v30 = vadd.f32 %v819_v48, %v814_v47  ;;  %v851_v53 = vadd.f32 %v829_v6, %v824_v5  ;;  %v4727_v21 = vpop.f32.mrb[18].mxu1 }
 0x16f   :  { %v852_v58 = vadd.f32 %v839_v54, %v834_v7  ;;  %v853_v61 = vadd.f32 %v849_v26, %v844_v25  ;;  %5115 = vst [vmem:[#allocation13_spill] sm:$0xff] %v4727_v21  ;;  %v4731_v41 = vpop.f32.mrb[19].mxu1 }
 0x170   :  { %v854_v29 = vadd.f32 %v851_v53, %v850_v30  ;;  %v4725_v33 = vpop.f32.mrb[22].mxu0  ;;  %5116 = vst [vmem:[#allocation14_spill] sm:$0xff] %v4731_v41 }
 0x171   :  { %v855_v32 = vadd.f32 %v853_v61, %v852_v58  ;;  %v4729_v40 = vpop.f32.mrb[23].mxu0 }
 0x172   :  { %v4734_v47 = vpop.f32.mrb[20].mxu1 }
 0x173   :  { %v856_v23 = vadd.f32 %v855_v32, %v854_v29  ;;  %5117 = vst [vmem:[#allocation15_spill] sm:$0xff] %v4734_v47  ;;  %v4740_v54 = vpop.f32.mrb[21].mxu1 }
 0x174   :  { %5118 = vst [vmem:[#allocation16_spill] sm:$0xff] %v4740_v54 }
 0x175   :  { %v857_v44 = vadd.f32 %v856_v23, %v4575_v24 }
 0x176   :  { %v4754_v41 = vpop.f32.mrb[22].mxu1 }
 0x177   :  { %v866_v48 = vrot.slane %v857_v44, %v3547_v13  ;;  %v861_v5 = vrot.slane %v857_v44, %v3516_v4  ;;  %v876_v6 = vrot.slane %v857_v44, %v3801_v52  ;;  %v871_v7 = vrot.slane %v857_v44, %v3711_v39  ;;  %v4756_v1 = vpop.f32.mrb[23].mxu1 }
 0x178   :  { %v886_v25 = vrot.slane %v857_v44, %v3690_v35  ;;  %v881_v26 = vrot.slane %v857_v44, %v3720_v42  ;;  %v896_v30 = vrot.slane %v857_v44, %v3928_v0  ;;  %v891_v53 = vrot.slane %v857_v44, %v3723_v43 }
 0x179   :  { %v867_v58 = vmul.f32 %v4606_v27, %v866_v48  ;;  %v862_v61 = vmul.f32 %v861_v5, %v4617_v34  ;;  %v877_v29 = vmul.f32 %v4635_v51, %v876_v6  ;;  %v872_v32 = vmul.f32 %v871_v7, %v4637_v22 }
 0x17a   :  { %v887_v23 = vmul.f32 %v4639_v36, %v886_v25  ;;  %v882_v3 = vmul.f32 %v881_v26, %v4643_v57  ;;  %v897_v54 = vmul.f32 %v4648_v10, %v896_v30  ;;  %v892_v47 = vmul.f32 %v891_v53, %v4652_v19 }
 0x17b   :  { %v898_v21 = vadd.f32 %v867_v58, %v862_v61  ;;  %v899_v44 = vadd.f32 %v877_v29, %v872_v32  ;;  %v5119_v22 = vmov 0  }
 0x17c   :  { %v900_v27 = vadd.f32 %v887_v23, %v882_v3  ;;  %v901_v34 = vadd.f32 %v897_v54, %v892_v47  ;;  %v909_v36 = vsel %vm908_vm3, 1, %v5119_v22 }
 0x17d   :  { %v902_v48 = vadd.f32 %v899_v44, %v898_v21  ;;  %v913_v57 = vrot.slane %v909_v36, %v3516_v4 }
 0x17e   :  { %v903_v51 = vadd.f32 %v901_v34, %v900_v27 }
 0x17f   :  { %vm914_vm15 = vcmp.eq.s32.totalorder %v913_v57, 1 }
 0x180   :  { %v904_v5 = vadd.f32 %v903_v51, %v902_v48 }
 0x182   :  { %3345 = vtanh.f32 %v904_v5 }
 0x184   :  { %v4761_v10 = vpop.f32.mrb[24].mxu0 }
 0x185   :  { %v4763_v19 = vpop.f32.mrb[25].mxu0 }
 0x188   :  { %v4765_v6 = vpop.f32.mrb[26].mxu0 }
 0x189   :  { %v4767_v3 = vpop.f32.mrb[27].mxu0 }
 0x18a   :  { %5120 = vst [vmem:[#allocation17_spill] sm:$0xff] %v4767_v3 }
 0x18c   :  { %v3346_v7 = vpop.eup %3345  ;;  %v4789_v61 = vpop.f32.mrb[28].mxu0 }
 0x18d   :  { %v4770_v21 = vsel %vm914_vm15, %v3346_v7, %v4686_v28  ;;  %5121 = vst [vmem:[#allocation18_spill] sm:$0xff] %v4789_v61  ;;  %v4795_v27 = vpop.f32.mrb[29].mxu0 }
 0x18e   :  { %v1078_v47 = vrot.slane %v4770_v21, %v3516_v4  ;;  %v1083_v54 = vrot.slane %v4770_v21, %v3547_v13  ;;  %v1088_v25 = vrot.slane %v4770_v21, %v3711_v39  ;;  %v1093_v26 = vrot.slane %v4770_v21, %v3801_v52  ;;  %917 = vst [vmem:[#allocation8 + $0x10] sm:$0xff] %v4770_v21 }
 0x18f   :  { %v1098_v30 = vrot.slane %v4770_v21, %v3720_v42  ;;  %v1103_v28 = vrot.slane %v4770_v21, %v3690_v35  ;;  %v1108_v53 = vrot.slane %v4770_v21, %v3723_v43  ;;  %v1113_v58 = vrot.slane %v4770_v21, %v3928_v0  ;;  %5122 = vst [vmem:[#allocation19_spill] sm:$0xff] %v4795_v27 }
 0x190   :  { %v1079_v29 = vmul.f32 %v1078_v47, %v4536_v15  ;;  %v1084_v32 = vmul.f32 %v1083_v54, %v4540_v17  ;;  %v1089_v23 = vmul.f32 %v1088_v25, %v4530_v9  ;;  %v1094_v44 = vmul.f32 %v1093_v26, %v4532_v11  ;;  %v4801_v61 = vpop.f32.mrb[30].mxu0 }
 0x191   :  { %v1099_v34 = vmul.f32 %v1098_v30, %v4534_v12  ;;  %v1104_v48 = vmul.f32 %v1103_v28, %v4565_v56  ;;  %v1109_v51 = vmul.f32 %v1108_v53, %v4538_v16  ;;  %v1114_v5 = vmul.f32 %v1113_v58, %v4563_v55  ;;  %v4803_v25 = vpop.f32.mrb[31].mxu0 }
 0x192   :  { %v1115_v36 = vadd.f32 %v1084_v32, %v1079_v29  ;;  %v1116_v57 = vadd.f32 %v1094_v44, %v1089_v23 }
 0x193   :  { %v1117_v7 = vadd.f32 %v1104_v48, %v1099_v34  ;;  %v1118_v47 = vadd.f32 %v1114_v5, %v1109_v51  ;;  %v4818_v5 = vpop.f32.mrb[24].mxu1 }
 0x194   :  { %v1119_v54 = vadd.f32 %v1116_v57, %v1115_v36 }
 0x195   :  { %v1120_v26 = vadd.f32 %v1118_v47, %v1117_v7 }
 0x197   :  { %v1121_v3 = vadd.f32 %v1120_v26, %v1119_v54  ;;  %v4824_v26 = vpop.f32.mrb[25].mxu1 }
 0x199   :  { %v1122_v27 = vadd.f32 %v1121_v3, %v4575_v24 }
 0x19b   :  { %v1131_v30 = vrot.slane %v1122_v27, %v3547_v13  ;;  %v1126_v28 = vrot.slane %v1122_v27, %v3516_v4  ;;  %v1141_v53 = vrot.slane %v1122_v27, %v3801_v52  ;;  %v1136_v58 = vrot.slane %v1122_v27, %v3711_v39 }
 0x19c   :  { %v1151_v29 = vrot.slane %v1122_v27, %v3690_v35  ;;  %v1146_v32 = vrot.slane %v1122_v27, %v3720_v42  ;;  %v1161_v23 = vrot.slane %v1122_v27, %v3928_v0  ;;  %v1156_v44 = vrot.slane %v1122_v27, %v3723_v43 }
 0x19d   :  { %v1132_v34 = vmul.f32 %v4641_v50, %v1131_v30  ;;  %v1127_v3 = vmul.f32 %v1126_v28, %v4645_v59  ;;  %v1142_v48 = vmul.f32 %v4650_v8, %v1141_v53  ;;  %v1137_v51 = vmul.f32 %v1136_v58, %v4654_v20  ;;  %v4826_v28 = vpop.f32.mrb[26].mxu1 }
 0x19e   :  { %v1152_v36 = vmul.f32 %v4668_v2, %v1151_v29  ;;  %v1147_v57 = vmul.f32 %v1146_v32, %v4672_v45  ;;  %v1162_v7 = vmul.f32 %v4674_v49, %v1161_v23  ;;  %v1157_v47 = vmul.f32 %v1156_v44, %v4676_v60  ;;  %v4828_v20 = vpop.f32.mrb[27].mxu1 }
 0x19f   :  { %v1163_v54 = vadd.f32 %v1132_v34, %v1127_v3  ;;  %v1164_v27 = vadd.f32 %v1142_v48, %v1137_v51  ;;  %v4831_v2 = vpop.f32.mrb[28].mxu1  ;;  %v1174_v45 = vsel %vm1173_vm7, 1, %v5119_v22 }
 0x1a0   :  { %v1165_v50 = vadd.f32 %v1152_v36, %v1147_v57  ;;  %v1166_v59 = vadd.f32 %v1162_v7, %v1157_v47  ;;  %v4834_v49 = vpop.f32.mrb[29].mxu1  ;;  %v1178_v60 = vrot.slane %v1174_v45, %v3516_v4 }
 0x1a1   :  { %v1167_v30 = vadd.f32 %v1164_v27, %v1163_v54  ;;  %v4837_v58 = vpop.f32.mrb[30].mxu1 }
 0x1a2   :  { %v1168_v8 = vadd.f32 %v1166_v59, %v1165_v50  ;;  %5123 = vst [vmem:[#allocation20_spill] sm:$0xff] %v4837_v58  ;;  %v4839_v29 = vpop.f32.mrb[31].mxu1  ;;  %vm1179_vm10 = vcmp.eq.s32.totalorder %v1178_v60, 1 }
 0x1a3   :  { %5124 = vst [vmem:[#allocation21_spill] sm:$0xff] %v4839_v29 }
 0x1a4   :  { %v1169_v53 = vadd.f32 %v1168_v8, %v1167_v30 }
 0x1a6   :  { %3347 = vtanh.f32 %v1169_v53 }
 0x1b0   :  { %v3348_v32 = vpop.eup %3347 }
 0x1b1   :  { %v1180_v23 = vsel %vm1179_vm10, %v3348_v32, %v4770_v21 }
 0x1b2   :  { %v1343_v44 = vrot.slane %v1180_v23, %v3516_v4  ;;  %v1348_v34 = vrot.slane %v1180_v23, %v3547_v13  ;;  %v1353_v3 = vrot.slane %v1180_v23, %v3711_v39  ;;  %v1358_v48 = vrot.slane %v1180_v23, %v3801_v52  ;;  %1182 = vst [vmem:[#allocation8 + $0x18] sm:$0xff] %v1180_v23 }
 0x1b3   :  { %v1363_v51 = vrot.slane %v1180_v23, %v3720_v42  ;;  %v1368_v36 = vrot.slane %v1180_v23, %v3690_v35  ;;  %v1373_v57 = vrot.slane %v1180_v23, %v3723_v43  ;;  %v1378_v7 = vrot.slane %v1180_v23, %v3928_v0 }
 0x1b4   :  { %v1344_v47 = vmul.f32 %v1343_v44, %v4536_v15  ;;  %v1349_v21 = vmul.f32 %v1348_v34, %v4540_v17  ;;  %v1354_v54 = vmul.f32 %v1353_v3, %v4530_v9  ;;  %v1359_v27 = vmul.f32 %v1358_v48, %v4532_v11 }
 0x1b5   :  { %v1364_v50 = vmul.f32 %v1363_v51, %v4534_v12  ;;  %v1369_v59 = vmul.f32 %v1368_v36, %v4565_v56  ;;  %v1374_v30 = vmul.f32 %v1373_v57, %v4538_v16  ;;  %v1379_v8 = vmul.f32 %v1378_v7, %v4563_v55 }
 0x1b6   :  { %v1380_v53 = vadd.f32 %v1349_v21, %v1344_v47  ;;  %v1381_v45 = vadd.f32 %v1359_v27, %v1354_v54 }
 0x1b7   :  { %v1382_v60 = vadd.f32 %v1369_v59, %v1364_v50  ;;  %v1383_v32 = vadd.f32 %v1379_v8, %v1374_v30 }
 0x1b8   :  { %v1384_v29 = vadd.f32 %v1381_v45, %v1380_v53 }
 0x1b9   :  { %v1385_v44 = vadd.f32 %v1383_v32, %v1382_v60 }
 0x1bb   :  { %v1386_v58 = vadd.f32 %v1385_v44, %v1384_v29 }
 0x1bd   :  { %v1387_v34 = vadd.f32 %v1386_v58, %v4575_v24 }
 0x1bf   :  { %v1396_v3 = vrot.slane %v1387_v34, %v3547_v13  ;;  %v1391_v48 = vrot.slane %v1387_v34, %v3516_v4  ;;  %v1406_v51 = vrot.slane %v1387_v34, %v3801_v52  ;;  %v1401_v36 = vrot.slane %v1387_v34, %v3711_v39 }
 0x1c0   :  { %v1416_v57 = vrot.slane %v1387_v34, %v3690_v35  ;;  %v1411_v7 = vrot.slane %v1387_v34, %v3720_v42  ;;  %v1426_v47 = vrot.slane %v1387_v34, %v3928_v0  ;;  %v1421_v21 = vrot.slane %v1387_v34, %v3723_v43 }
 0x1c1   :  { %v1397_v29 = vmul.f32 %v4681_v14, %v1396_v3  ;;  %v1392_v58 = vmul.f32 %v1391_v48, %v4683_v18  ;;  %v1407_v54 = vmul.f32 %v4697_v38, %v1406_v51  ;;  %v1402_v27 = vmul.f32 %v1401_v36, %v4707_v46 }
 0x1c2   :  { %v1417_v50 = vmul.f32 %v4717_v31, %v1416_v57  ;;  %v1412_v59 = vmul.f32 %v1411_v7, %v4721_v63  ;;  %v1427_v30 = vmul.f32 %v4725_v33, %v1426_v47  ;;  %v1422_v8 = vmul.f32 %v1421_v21, %v4729_v40 }
 0x1c3   :  { %v1428_v53 = vadd.f32 %v1397_v29, %v1392_v58  ;;  %v1429_v45 = vadd.f32 %v1407_v54, %v1402_v27  ;;  %v1439_v18 = vsel %vm1438_vm11, 1, %v5119_v22 }
 0x1c4   :  { %v1430_v60 = vadd.f32 %v1417_v50, %v1412_v59  ;;  %v1431_v32 = vadd.f32 %v1427_v30, %v1422_v8  ;;  %v1443_v38 = vrot.slane %v1439_v18, %v3516_v4 }
 0x1c5   :  { %v1432_v44 = vadd.f32 %v1429_v45, %v1428_v53 }
 0x1c6   :  { %v1433_v14 = vadd.f32 %v1431_v32, %v1430_v60  ;;  %vm1444_vm2 = vcmp.eq.s32.totalorder %v1443_v38, 1 }
 0x1c8   :  { %v1434_v34 = vadd.f32 %v1433_v14, %v1432_v44 }
 0x1ca   :  { %3349 = vtanh.f32 %v1434_v34 }
 0x1d4   :  { %v3350_v46 = vpop.eup %3349 }
 0x1d5   :  { %v1445_v31 = vsel %vm1444_vm2, %v3350_v46, %v1180_v23 }
 0x1d6   :  { %v1608_v63 = vrot.slane %v1445_v31, %v3516_v4  ;;  %v1613_v33 = vrot.slane %v1445_v31, %v3547_v13  ;;  %v1618_v40 = vrot.slane %v1445_v31, %v3711_v39  ;;  %v1623_v3 = vrot.slane %v1445_v31, %v3801_v52  ;;  %1447 = vst [vmem:[#allocation8 + $0x20] sm:$0xff] %v1445_v31 }
 0x1d7   :  { %v1628_v48 = vrot.slane %v1445_v31, %v3720_v42  ;;  %v1633_v51 = vrot.slane %v1445_v31, %v3690_v35  ;;  %v1638_v36 = vrot.slane %v1445_v31, %v3723_v43  ;;  %v1643_v57 = vrot.slane %v1445_v31, %v3928_v0 }
 0x1d8   :  { %v1609_v7 = vmul.f32 %v1608_v63, %v4536_v15  ;;  %v1614_v23 = vmul.f32 %v1613_v33, %v4540_v17  ;;  %v1619_v47 = vmul.f32 %v1618_v40, %v4530_v9  ;;  %v1624_v21 = vmul.f32 %v1623_v3, %v4532_v11  ;;  %v5125_v3 = vld [vmem:[#allocation12_spill] sm:$0xff] }
 0x1d9   :  { %v1629_v29 = vmul.f32 %v1628_v48, %v4534_v12  ;;  %v1634_v58 = vmul.f32 %v1633_v51, %v4565_v56  ;;  %v1639_v54 = vmul.f32 %v1638_v36, %v4538_v16  ;;  %v1644_v27 = vmul.f32 %v1643_v57, %v4563_v55  ;;  %v5126_v51 = vld [vmem:[#allocation13_spill] sm:$0xff]  ;;  %v5127_v57 = vld [vmem:[#allocation14_spill] sm:$0xff] }
 0x1da   :  { %v1645_v50 = vadd.f32 %v1614_v23, %v1609_v7  ;;  %v1646_v59 = vadd.f32 %v1624_v21, %v1619_v47  ;;  %v5128_v23 = vld [vmem:[#allocation15_spill] sm:$0xff]  ;;  %v5129_v21 = vld [vmem:[#allocation16_spill] sm:$0xff] }
 0x1db   :  { %v1647_v30 = vadd.f32 %v1634_v58, %v1629_v29  ;;  %v1648_v8 = vadd.f32 %v1644_v27, %v1639_v54 }
 0x1dc   :  { %v1649_v53 = vadd.f32 %v1646_v59, %v1645_v50 }
 0x1dd   :  { %v1650_v45 = vadd.f32 %v1648_v8, %v1647_v30 }
 0x1df   :  { %v1651_v60 = vadd.f32 %v1650_v45, %v1649_v53  ;;  %v1704_v45 = vsel %vm1703_vm8, 1, %v5119_v22 }
 0x1e1   :  { %v1652_v32 = vadd.f32 %v1651_v60, %v4575_v24  ;;  %v1708_v60 = vrot.slane %v1704_v45, %v3516_v4 }
 0x1e3   :  { %v1661_v44 = vrot.slane %v1652_v32, %v3547_v13  ;;  %v1656_v14 = vrot.slane %v1652_v32, %v3516_v4  ;;  %v1671_v34 = vrot.slane %v1652_v32, %v3801_v52  ;;  %v1666_v18 = vrot.slane %v1652_v32, %v3711_v39 }
 0x1e4   :  { %v1681_v38 = vrot.slane %v1652_v32, %v3690_v35  ;;  %v1676_v46 = vrot.slane %v1652_v32, %v3720_v42  ;;  %v1691_v63 = vrot.slane %v1652_v32, %v3928_v0  ;;  %v1686_v33 = vrot.slane %v1652_v32, %v3723_v43 }
 0x1e5   :  { %v1662_v40 = vmul.f32 %v4719_v37, %v1661_v44  ;;  %v1657_v48 = vmul.f32 %v1656_v14, %v5125_v3  ;;  %v1672_v36 = vmul.f32 %v5126_v51, %v1671_v34  ;;  %v1667_v7 = vmul.f32 %v1666_v18, %v5127_v57 }
 0x1e6   :  { %v1682_v47 = vmul.f32 %v5128_v23, %v1681_v38  ;;  %v1677_v29 = vmul.f32 %v1676_v46, %v5129_v21  ;;  %v1692_v58 = vmul.f32 %v4754_v41, %v1691_v63  ;;  %v1687_v54 = vmul.f32 %v1686_v33, %v4756_v1 }
 0x1e7   :  { %v1693_v27 = vadd.f32 %v1662_v40, %v1657_v48  ;;  %v1694_v50 = vadd.f32 %v1672_v36, %v1667_v7  ;;  %vm1709_vm1 = vcmp.eq.s32.totalorder %v1708_v60, 1 }
 0x1e8   :  { %v1695_v59 = vadd.f32 %v1682_v47, %v1677_v29  ;;  %v1696_v30 = vadd.f32 %v1692_v58, %v1687_v54 }
 0x1e9   :  { %v1697_v8 = vadd.f32 %v1694_v50, %v1693_v27 }
 0x1ea   :  { %v1698_v37 = vadd.f32 %v1696_v30, %v1695_v59 }
 0x1ec   :  { %v1699_v53 = vadd.f32 %v1698_v37, %v1697_v8 }
 0x1ee   :  { %3351 = vtanh.f32 %v1699_v53 }
 0x1f8   :  { %v3352_v32 = vpop.eup %3351 }
 0x1f9   :  { %v1710_v44 = vsel %vm1709_vm1, %v3352_v32, %v1445_v31 }
 0x1fa   :  { %v1873_v41 = vrot.slane %v1710_v44, %v3516_v4  ;;  %v1878_v1 = vrot.slane %v1710_v44, %v3547_v13  ;;  %v1883_v14 = vrot.slane %v1710_v44, %v3711_v39  ;;  %v1888_v34 = vrot.slane %v1710_v44, %v3801_v52  ;;  %1712 = vst [vmem:[#allocation8 + $0x28] sm:$0xff] %v1710_v44 }
 0x1fb   :  { %v1893_v18 = vrot.slane %v1710_v44, %v3720_v42  ;;  %v1898_v38 = vrot.slane %v1710_v44, %v3690_v35  ;;  %v1903_v46 = vrot.slane %v1710_v44, %v3723_v43  ;;  %v1908_v63 = vrot.slane %v1710_v44, %v3928_v0 }
 0x1fc   :  { %v1874_v33 = vmul.f32 %v1873_v41, %v4536_v15  ;;  %v1879_v31 = vmul.f32 %v1878_v1, %v4540_v17  ;;  %v1884_v40 = vmul.f32 %v1883_v14, %v4530_v9  ;;  %v1889_v3 = vmul.f32 %v1888_v34, %v4532_v11  ;;  %v5130_v14 = vld [vmem:[#allocation17_spill] sm:$0xff] }
 0x1fd   :  { %v1894_v48 = vmul.f32 %v1893_v18, %v4534_v12  ;;  %v1899_v51 = vmul.f32 %v1898_v38, %v4565_v56  ;;  %v1904_v36 = vmul.f32 %v1903_v46, %v4538_v16  ;;  %v1909_v57 = vmul.f32 %v1908_v63, %v4563_v55  ;;  %v5131_v18 = vld [vmem:[#allocation18_spill] sm:$0xff]  ;;  %v5132_v46 = vld [vmem:[#allocation19_spill] sm:$0xff] }
 0x1fe   :  { %v1910_v7 = vadd.f32 %v1879_v31, %v1874_v33  ;;  %v1911_v23 = vadd.f32 %v1889_v3, %v1884_v40 }
 0x1ff   :  { %v1912_v47 = vadd.f32 %v1899_v51, %v1894_v48  ;;  %v1913_v21 = vadd.f32 %v1909_v57, %v1904_v36 }
 0x200   :  { %v1914_v29 = vadd.f32 %v1911_v23, %v1910_v7 }
 0x201   :  { %v1915_v58 = vadd.f32 %v1913_v21, %v1912_v47 }
 0x203   :  { %v1916_v54 = vadd.f32 %v1915_v58, %v1914_v29 }
 0x205   :  { %v1917_v27 = vadd.f32 %v1916_v54, %v4575_v24 }
 0x207   :  { %v1926_v50 = vrot.slane %v1917_v27, %v3547_v13  ;;  %v1921_v59 = vrot.slane %v1917_v27, %v3516_v4  ;;  %v1936_v30 = vrot.slane %v1917_v27, %v3801_v52  ;;  %v1931_v8 = vrot.slane %v1917_v27, %v3711_v39 }
 0x208   :  { %v1946_v37 = vrot.slane %v1917_v27, %v3690_v35  ;;  %v1941_v53 = vrot.slane %v1917_v27, %v3720_v42  ;;  %v1956_v45 = vrot.slane %v1917_v27, %v3928_v0  ;;  %v1951_v60 = vrot.slane %v1917_v27, %v3723_v43 }
 0x209   :  { %v1927_v32 = vmul.f32 %v4761_v10, %v1926_v50  ;;  %v1922_v41 = vmul.f32 %v1921_v59, %v4763_v19  ;;  %v1937_v1 = vmul.f32 %v4765_v6, %v1936_v30  ;;  %v1932_v34 = vmul.f32 %v1931_v8, %v5130_v14 }
 0x20a   :  { %v1947_v38 = vmul.f32 %v5131_v18, %v1946_v37  ;;  %v1942_v63 = vmul.f32 %v1941_v53, %v5132_v46  ;;  %v1957_v33 = vmul.f32 %v4801_v61, %v1956_v45  ;;  %v1952_v31 = vmul.f32 %v1951_v60, %v4803_v25 }
 0x20b   :  { %v1958_v40 = vadd.f32 %v1927_v32, %v1922_v41  ;;  %v1959_v3 = vadd.f32 %v1937_v1, %v1932_v34  ;;  %v1969_v19 = vsel %vm1968_vm0, 1, %v5119_v22 }
 0x20c   :  { %v1960_v48 = vadd.f32 %v1947_v38, %v1942_v63  ;;  %v1961_v51 = vadd.f32 %v1957_v33, %v1952_v31  ;;  %v1973_v6 = vrot.slane %v1969_v19, %v3516_v4  ;;  %v5133_v33 = vld [vmem:[#allocation20_spill] sm:$0xff]  ;;  %v5134_v31 = vld [vmem:[#allocation21_spill] sm:$0xff] }
 0x20d   :  { %v1962_v36 = vadd.f32 %v1959_v3, %v1958_v40 }
 0x20e   :  { %v1963_v10 = vadd.f32 %v1961_v51, %v1960_v48  ;;  %vm1974_vm9 = vcmp.eq.s32.totalorder %v1973_v6, 1 }
 0x210   :  { %v1964_v57 = vadd.f32 %v1963_v10, %v1962_v36 }
 0x212   :  { %3353 = vtanh.f32 %v1964_v57 }
 0x21c   :  { %v3354_v7 = vpop.eup %3353 }
 0x21d   :  { %v1975_v23 = vsel %vm1974_vm9, %v3354_v7, %v1710_v44 }
 0x21e   :  { %1977 = vst [vmem:[#allocation8 + $0x30] sm:$0xff] %v1975_v23  ;;  %v2138_v61 = vrot.slane %v1975_v23, %v3516_v4  ;;  %v2143_v25 = vrot.slane %v1975_v23, %v3547_v13  ;;  %v2148_v47 = vrot.slane %v1975_v23, %v3711_v39  ;;  %v2153_v21 = vrot.slane %v1975_v23, %v3801_v52 }
 0x21f   :  { %v2158_v29 = vrot.slane %v1975_v23, %v3720_v42  ;;  %v2163_v58 = vrot.slane %v1975_v23, %v3690_v35  ;;  %v2168_v54 = vrot.slane %v1975_v23, %v3723_v43  ;;  %v2173_v27 = vrot.slane %v1975_v23, %v3928_v0 }
 0x220   :  { %v2139_v50 = vmul.f32 %v2138_v61, %v4536_v15  ;;  %v2144_v44 = vmul.f32 %v2143_v25, %v4540_v17  ;;  %v2149_v59 = vmul.f32 %v2148_v47, %v4530_v9  ;;  %v2154_v30 = vmul.f32 %v2153_v21, %v4532_v11 }
 0x221   :  { %v2159_v8 = vmul.f32 %v2158_v29, %v4534_v12  ;;  %v2164_v37 = vmul.f32 %v2163_v58, %v4565_v56  ;;  %v2169_v53 = vmul.f32 %v2168_v54, %v4538_v16  ;;  %v2174_v45 = vmul.f32 %v2173_v27, %v4563_v55 }
 0x222   :  { %v2175_v60 = vadd.f32 %v2144_v44, %v2139_v50  ;;  %v2176_v32 = vadd.f32 %v2154_v30, %v2149_v59 }
 0x223   :  { %v2177_v41 = vadd.f32 %v2164_v37, %v2159_v8  ;;  %v2178_v1 = vadd.f32 %v2174_v45, %v2169_v53 }
 0x224   :  { %v2179_v14 = vadd.f32 %v2176_v32, %v2175_v60 }
 0x225   :  { %v2180_v15 = vadd.f32 %v2178_v1, %v2177_v41 }
 0x227   :  { %v2181_v34 = vadd.f32 %v2180_v15, %v2179_v14 }
 0x229   :  { %v2182_v17 = vadd.f32 %v2181_v34, %v4575_v24 }
 0x22b   :  { %v2191_v9 = vrot.slane %v2182_v17, %v3547_v13  ;;  %v2186_v11 = vrot.slane %v2182_v17, %v3516_v4  ;;  %v2201_v12 = vrot.slane %v2182_v17, %v3801_v52  ;;  %v2196_v56 = vrot.slane %v2182_v17, %v3711_v39 }
 0x22c   :  { %v2211_v16 = vrot.slane %v2182_v17, %v3690_v35  ;;  %v2206_v55 = vrot.slane %v2182_v17, %v3720_v42  ;;  %v2221_v18 = vrot.slane %v2182_v17, %v3928_v0  ;;  %v2216_v38 = vrot.slane %v2182_v17, %v3723_v43 }
 0x22d   :  { %v2192_v46 = vmul.f32 %v4818_v5, %v2191_v9  ;;  %v2187_v24 = vmul.f32 %v2186_v11, %v4824_v26  ;;  %v2202_v13 = vmul.f32 %v4826_v28, %v2201_v12  ;;  %v2197_v63 = vmul.f32 %v2196_v56, %v4828_v20 }
 0x22e   :  { %v2212_v52 = vmul.f32 %v4831_v2, %v2211_v16  ;;  %v2207_v39 = vmul.f32 %v2206_v55, %v4834_v49  ;;  %v2222_v35 = vmul.f32 %v5133_v33, %v2221_v18  ;;  %v2217_v42 = vmul.f32 %v2216_v38, %v5134_v31 }
 0x22f   :  { %v2223_v40 = vadd.f32 %v2192_v46, %v2187_v24  ;;  %v2224_v0 = vadd.f32 %v2202_v13, %v2197_v63  ;;  %v2234_v26 = vsel %vm2233_vm6, 1, %v5119_v22 }
 0x230   :  { %v2225_v3 = vadd.f32 %v2212_v52, %v2207_v39  ;;  %v2226_v43 = vadd.f32 %v2222_v35, %v2217_v42  ;;  %v2238_v28 = vrot.slane %v2234_v26, %v3516_v4 }
 0x231   :  { %v2227_v48 = vadd.f32 %v2224_v0, %v2223_v40 }
 0x232   :  { %v2228_v5 = vadd.f32 %v2226_v43, %v2225_v3  ;;  %vm2239_vm5 = vcmp.eq.s32.totalorder %v2238_v28, 1 }
 0x234   :  { %v2229_v51 = vadd.f32 %v2228_v5, %v2227_v48 }
 0x236   :  { %3355 = vtanh.f32 %v2229_v51 }
 0x240   :  { %v3356_v20 = vpop.eup %3355 }
 0x241   :  { %v2240_v2 = vsel %vm2239_vm5, %v3356_v20, %v1975_v23 }
 0x242   :  { %2242 = vst [vmem:[#allocation8 + $0x38] sm:$0xff] %v2240_v2 }
 0x243   :  { %3412 = shalt.err (!%p3409_p6)
}
 0x244   :  { %s3413_s7 = scalar_lea.hbm %s5007_s6, 1024 }
 0x245   :  { %p3414_p7 = scmp.ne.s32.totalorder %s5007_s6, %s3413_s7  ;;  %p3417_p8 = scmp.lt.u32.totalorder %s3413_s7, %s5007_s6 }
 0x247   :  { %p3419_p9 = pnand %p3417_p8, %p3414_p7 }
 0x249   :  { %3422 = shalt.err (!%p3419_p9)
}
 0x24a   :  { %2255 = dma.vmem_to_hbm [thread:$0]  %s2250_s27, 1024, %s5007_s6, [#allocation5], %s3431_s0, %s3431_s0, %s3432_s20  }
 0x24b   :  { %3427 = dma.done.wait [#allocation5], 1024  }
 0x24c   :  { %3428 = vsyncadd [#allocation5], 4294966272 }
 0x24d   :  { %2259 = vsyncpa [#allocation4], 1 }
 0x24e   :  { %2260 = vsyncpa [#allocation7], 1 }
 0x24f   :  { %2261 = vsyncpa [#allocation5], 1 }

</bundles_post_ra>
